<compile_context>
chip_gen: v5e
topology: v5e:2x2
jax: 0.10.0
libtpu: 0.0.40
codegen_flags: <defaults>
</compile_context>

<pallas_src>
import functools

import jax
import jax.numpy as jnp
from jax import lax
from jax.experimental import pallas as pl
from jax.experimental.pallas import tpu as pltpu

NEG_SLOPE = 0.1          # LeakyReLU(0.1)
BN_EPS = 1e-5
CPAD = 128               # lane-dense channel padding for all conv/head outputs
_VMEM_LIMIT_BYTES = 48 * 1024 * 1024   # safe on v7x (64 MiB phys) and v5e/v6e (128 MiB)


# ----------------------------------------------------------------------------
# Kernel helpers (traced inside kernel bodies)
# ----------------------------------------------------------------------------
def _conv_patch(xs_ref, ksize):
    """Build the (rows, K) LHS patch for one wide-K conv matmul.

    ksize == 1: input is already per-pixel patches (wrapper-side im2col, Cin=27).
    ksize == 3: concat the nine shifted windows along the lane axis; Cin is a
    multiple of 128, so every concat offset is lane-aligned.
    """
    _, hs, ws, cin = xs_ref.shape
    hc = hs - (ksize - 1)
    wc = ws - (ksize - 1)
    if ksize == 1:
        return xs_ref[0].reshape(hc * wc, cin), hc, wc
    cols = [xs_ref[0, ky:ky + hc, kx:kx + wc, :]
            for ky in range(ksize) for kx in range(ksize)]
    patch = jnp.concatenate(cols, axis=-1).reshape(hc * wc, ksize * ksize * cin)
    return patch, hc, wc


def _bn_lrelu_pool(acc, scale, shift, hc, wc, cout):
    """f32 epilogue: folded BatchNorm (eval), LeakyReLU(0.1), 2x2 max-pool."""
    y = acc * scale + shift
    y = jnp.where(y >= 0.0, y, NEG_SLOPE * y)
    hout, wout = hc // 2, wc // 2
    y = y.reshape(hc, wout, 2, cout)
    y = jnp.max(y, axis=2)
    y = y.reshape(hout, 2, wout, cout)
    y = jnp.max(y, axis=1)                  # (hout, wout, cout) f32
    return y, hout, wout


# ----------------------------------------------------------------------------
# Kernels
# ----------------------------------------------------------------------------
def _conv_bn_lrelu_pool_kernel(xs_ref, w_ref, scale_ref, shift_ref, o_ref, *, ksize):
    """Fused conv + BN + LeakyReLU + MaxPool2d(2) for one (image, row-strip)."""
    cout = w_ref.shape[-1]
    patch, hc, wc = _conv_patch(xs_ref, ksize)
    acc = jnp.dot(patch, w_ref[...], preferred_element_type=jnp.float32)
    y, hout, wout = _bn_lrelu_pool(acc, scale_ref[...], shift_ref[...], hc, wc, cout)
    o_ref[...] = y.reshape(1, hout, wout, cout).astype(o_ref.dtype)


def _conv_bn_lrelu_pool_heads_kernel(xs_ref, w_ref, scale_ref, shift_ref,
                                     wh_ref, bh_ref, o_ref, *, ksize):
    """Fused conv + BN + LeakyReLU + MaxPool2d(2) + merged 1x1 detect heads.

    The pooled feature map stays in VMEM/vregs and feeds the head matmul
    directly; only the (lane-dense) detect output is written to HBM.
    """
    cout = w_ref.shape[-1]
    patch, hc, wc = _conv_patch(xs_ref, ksize)
    acc = jnp.dot(patch, w_ref[...], preferred_element_type=jnp.float32)
    y, hout, wout = _bn_lrelu_pool(acc, scale_ref[...], shift_ref[...], hc, wc, cout)
    f = y.reshape(hout * wout, cout).astype(jnp.bfloat16)     # backbone feature tile
    det = jnp.dot(f, wh_ref[...], preferred_element_type=jnp.float32) + bh_ref[...]
    o_ref[...] = det.reshape(1, hout, wout, wh_ref.shape[-1])


# ----------------------------------------------------------------------------
# Wrappers (XLA glue: padding / im2col / strips / pallas_call plumbing)
# ----------------------------------------------------------------------------
def _pick_strip_rows(h, cap):
    """Largest even divisor of h that is <= cap (h assumed even, >= 2)."""
    best = 2
    for d in range(2, min(h, cap) + 1, 2):
        if h % d == 0:
            best = d
    return best


def _make_strips(x_nhwc, ksize, max_strip_rows):
    """Row strips with a (ksize-1)-row/col halo, stacked so each grid step reads
    one contiguous, non-overlapping block."""
    n, h, w, cin = x_nhwc.shape
    halo = ksize - 1
    th = _pick_strip_rows(h, max_strip_rows)
    nt = h // th
    if halo:
        xq = jnp.pad(x_nhwc, ((0, 0), (1, 1), (1, 1), (0, 0)))
    else:
        xq = x_nhwc
    if nt == 1:
        xs = xq                                              # no duplication needed
    else:
        xs = jnp.stack([xq[:, t * th: t * th + th + halo] for t in range(nt)], axis=1)
        xs = xs.reshape(n * nt, th + halo, w + halo, cin)
    return xs, th, nt


def _conv_block(x_nhwc, w_flat, scale, shift, *, ksize, max_strip_rows=8):
    """Fused Conv('same') + BN + LeakyReLU + MaxPool2d(2): (N,H,W,Cin)->(N,H/2,W/2,Cout)."""
    n, h, w, cin = x_nhwc.shape
    k, cout = w_flat.shape
    assert k == ksize * ksize * cin
    assert h % 2 == 0 and w % 2 == 0
    halo = ksize - 1

    xs, th, nt = _make_strips(x_nhwc, ksize, max_strip_rows)
    hout, wout, tho = h // 2, w // 2, th // 2

    flops = 2 * n * h * w * k * cout
    bytes_accessed = (xs.size * 2 + k * cout * 2 + 2 * cout * 4
                      + n * hout * wout * cout * 2)

    kernel = functools.partial(_conv_bn_lrelu_pool_kernel, ksize=ksize)
    return pl.pallas_call(
        kernel,
        out_shape=jax.ShapeDtypeStruct((n, hout, wout, cout), jnp.bfloat16),
        grid=(n, nt),
        in_specs=[
            pl.BlockSpec((1, th + halo, w + halo, cin),
                         lambda b, t: (b * nt + t, 0, 0, 0)),
            pl.BlockSpec((k, cout), lambda b, t: (0, 0)),
            pl.BlockSpec((1, cout), lambda b, t: (0, 0)),
            pl.BlockSpec((1, cout), lambda b, t: (0, 0)),
        ],
        out_specs=pl.BlockSpec((1, tho, wout, cout), lambda b, t: (b, t, 0, 0)),
        compiler_params=pltpu.CompilerParams(
            dimension_semantics=("parallel", "parallel"),
            vmem_limit_bytes=_VMEM_LIMIT_BYTES),
        cost_estimate=pl.CostEstimate(flops=flops, transcendentals=0,
                                      bytes_accessed=bytes_accessed),
    )(xs, w_flat, scale, shift)


def _conv_block_with_heads(x_nhwc, w_flat, scale, shift, wh, bh, *,
                           ksize, max_strip_rows=8):
    """Fused Conv + BN + LeakyReLU + MaxPool2d(2) + merged 1x1 detect heads.

    (N,H,W,Cin) -> (N,H/2,W/2,Cout_heads) f32.  The intermediate feature map
    never leaves VMEM.
    """
    n, h, w, cin = x_nhwc.shape
    k, cout = w_flat.shape
    cout_h = wh.shape[1]
    assert k == ksize * ksize * cin
    assert h % 2 == 0 and w % 2 == 0
    halo = ksize - 1

    xs, th, nt = _make_strips(x_nhwc, ksize, max_strip_rows)
    hout, wout, tho = h // 2, w // 2, th // 2

    flops = 2 * n * h * w * k * cout + 2 * n * hout * wout * cout * cout_h
    bytes_accessed = (xs.size * 2 + k * cout * 2 + 2 * cout * 4
                      + cout * cout_h * 2 + cout_h * 4
                      + n * hout * wout * cout_h * 4)

    kernel = functools.partial(_conv_bn_lrelu_pool_heads_kernel, ksize=ksize)
    return pl.pallas_call(
        kernel,
        out_shape=jax.ShapeDtypeStruct((n, hout, wout, cout_h), jnp.float32),
        grid=(n, nt),
        in_specs=[
            pl.BlockSpec((1, th + halo, w + halo, cin),
                         lambda b, t: (b * nt + t, 0, 0, 0)),
            pl.BlockSpec((k, cout), lambda b, t: (0, 0)),
            pl.BlockSpec((1, cout), lambda b, t: (0, 0)),
            pl.BlockSpec((1, cout), lambda b, t: (0, 0)),
            pl.BlockSpec((cout, cout_h), lambda b, t: (0, 0)),
            pl.BlockSpec((1, cout_h), lambda b, t: (0, 0)),
        ],
        out_specs=pl.BlockSpec((1, tho, wout, cout_h), lambda b, t: (b, t, 0, 0)),
        compiler_params=pltpu.CompilerParams(
            dimension_semantics=("parallel", "parallel"),
            vmem_limit_bytes=_VMEM_LIMIT_BYTES),
        cost_estimate=pl.CostEstimate(flops=flops, transcendentals=0,
                                      bytes_accessed=bytes_accessed),
    )(xs, w_flat, scale, shift, wh, bh)


def _prep_conv_weights(w_hwio, scale, shift, *, cin_pad, cout_pad):
    """Pad channels to lane-dense sizes and flatten the taps into one K dim."""
    kh, kw, cin, cout = w_hwio.shape
    wp = jnp.zeros((kh, kw, cin_pad, cout_pad), jnp.float32)
    wp = wp.at[:, :, :cin, :cout].set(w_hwio)
    w_flat = wp.reshape(kh * kw * cin_pad, cout_pad).astype(jnp.bfloat16)
    sp = jnp.zeros((1, cout_pad), jnp.float32).at[0, :cout].set(scale)
    tp = jnp.zeros((1, cout_pad), jnp.float32).at[0, :cout].set(shift)
    return w_flat, sp, tp


def _prep_head_weights(heads, *, cin_pad, cout_pad):
    """Concatenate the three head weights along Cout and pad to 128 lanes."""
    ws = jnp.concatenate([w for w, _ in heads], axis=1)     # (cin, 3*det)
    bs = jnp.concatenate([b for _, b in heads], axis=0)     # (3*det,)
    cin, cout = ws.shape
    wp = jnp.zeros((cin_pad, cout_pad), jnp.float32).at[:cin, :cout].set(ws)
    bp = jnp.zeros((1, cout_pad), jnp.float32).at[0, :cout].set(bs)
    return wp.astype(jnp.bfloat16), bp


def yolov3_forward(x_nchw, params):
    """Returns [detect1, detect2, detect3], each NCHW like the PyTorch module."""
    x = jnp.transpose(x_nchw, (0, 2, 3, 1)).astype(jnp.bfloat16)     # NCHW -> NHWC, bf16
    n, h, w, _ = x.shape

    # Weight prep (cheap XLA glue, constant-folded under jit).
    w1, s1, t1 = _prep_conv_weights(params["w1"], params["s1"], params["t1"],
                                    cin_pad=params["w1"].shape[2], cout_pad=CPAD)
    w2, s2, t2 = _prep_conv_weights(params["w2"], params["s2"], params["t2"],
                                    cin_pad=CPAD, cout_pad=CPAD)
    wh, bh = _prep_head_weights(
        [(params["wd1"], params["bd1"]), (params["wd2"], params["bd2"]),
         (params["wd3"], params["bd3"])], cin_pad=CPAD, cout_pad=CPAD)

    # Layer 1 (Cin=3): wrapper-side im2col so the kernel is one K=27 matmul.
    xp = jnp.pad(x, ((0, 0), (1, 1), (1, 1), (0, 0)))
    x_i2c = jnp.concatenate(
        [xp[:, ky:ky + h, kx:kx + w, :] for ky in range(3) for kx in range(3)],
        axis=-1)                                                     # (N, H, W, 27)
    f = _conv_block(x_i2c, w1, s1, t1, ksize=1)                      # (N, H/2, W/2, 128)

    # Layer 2 (Cin padded to 128, K=1152 matmul) + merged detect heads fused in
    # one kernel: the backbone feature map never round-trips through HBM.
    o = _conv_block_with_heads(f, w2, s2, t2, wh, bh, ksize=3)       # (N, H/4, W/4, 128) f32

    det = params["wd1"].shape[1]
    outs = []
    for i in range(3):
        oi = o[..., i * det:(i + 1) * det]
        outs.append(jnp.transpose(oi, (0, 3, 1, 2)))                 # back to NCHW
    return outs


yolov3_forward_jit = jax.jit(yolov3_forward)


# ----------------------------------------------------------------------------
# Deterministic parameter construction (synthetic, no checkpoint)
# ----------------------------------------------------------------------------
def make_params(num_classes, key):
    det_out = 3 * (5 + num_classes)
    ks = jax.random.split(key, 18)

    def conv_bn(kw, kb, kg, kbe, km, kv, cin, cout):
        w = 0.1 * jax.random.normal(kw, (3, 3, cin, cout), jnp.float32)   # HWIO
        b = 0.1 * jax.random.normal(kb, (cout,), jnp.float32)
        gamma = 1.0 + 0.1 * jax.random.normal(kg, (cout,), jnp.float32)
        beta = 0.1 * jax.random.normal(kbe, (cout,), jnp.float32)
        mean = 0.1 * jax.random.normal(km, (cout,), jnp.float32)
        var = 0.5 + jax.random.uniform(kv, (cout,), jnp.float32)
        scale = gamma / jnp.sqrt(var + BN_EPS)          # eval-mode BN fold
        shift = beta + scale * (b - mean)
        return w, scale, shift

    w1, s1, t1 = conv_bn(*ks[0:6], 3, 32)
    w2, s2, t2 = conv_bn(*ks[6:12], 32, 64)

    # TODO(synk): the PyTorch module declares detect1/2/3 with in_channels
    # 512/256/128, but its backbone emits only 64 channels, so the original
    # forward() cannot execute as written; heads are built with in_channels=64
    # (the actual backbone output) to give a runnable forward.
    feat_c = 64

    def head(kw, kb, cin, cout):
        w = 0.1 * jax.random.normal(kw, (cin, cout), jnp.float32)
        b = 0.1 * jax.random.normal(kb, (cout,), jnp.float32)
        return w, b

    wd1, bd1 = head(ks[12], ks[13], feat_c, det_out)
    wd2, bd2 = head(ks[14], ks[15], feat_c, det_out)
    wd3, bd3 = head(ks[16], ks[17], feat_c, det_out)
    return dict(w1=w1, s1=s1, t1=t1, w2=w2, s2=s2, t2=t2,
                wd1=wd1, bd1=bd1, wd2=wd2, bd2=bd2, wd3=wd3, bd3=bd3)


# ----------------------------------------------------------------------------
# Pure-JAX reference (mirrors the kernel's bf16 quantization points)
# ----------------------------------------------------------------------------
def reference_forward(x_nchw, p):
    x = jnp.transpose(x_nchw, (0, 2, 3, 1)).astype(jnp.bfloat16)

    def block(x, w, scale, shift):
        y = lax.conv_general_dilated(
            x, w.astype(jnp.bfloat16), window_strides=(1, 1), padding="SAME",
            dimension_numbers=("NHWC", "HWIO", "NHWC"),
            preferred_element_type=jnp.float32)
        y = y * scale[None, None, None, :] + shift[None, None, None, :]
        y = jnp.where(y >= 0, y, NEG_SLOPE * y)
        y = lax.reduce_window(y, -jnp.inf, lax.max,
                              (1, 2, 2, 1), (1, 2, 2, 1), "VALID")
        return y.astype(jnp.bfloat16)

    f = block(x, p["w1"], p["s1"], p["t1"])
    f = block(f, p["w2"], p["s2"], p["t2"])
    outs = []
    for w, b in ((p["wd1"], p["bd1"]), (p["wd2"], p["bd2"]), (p["wd3"], p["bd3"])):
        o = jnp.einsum("nhwc,cd->nhwd", f, w.astype(jnp.bfloat16),
                       preferred_element_type=jnp.float32) + b[None, None, None, :]
        outs.append(jnp.transpose(o, (0, 3, 1, 2)))
    return outs


# ----------------------------------------------------------------------------
if __name__ == "__main__":
    key = jax.random.PRNGKey(0)
    pkey, xkey = jax.random.split(key)
    num_classes = 2
    params = make_params(num_classes, pkey)

    # NCHW input, like the PyTorch module: batch=2, 3 channels, 16x16 spatial.
    x = jax.random.normal(xkey, (2, 3, 16, 16), jnp.float32)

    outs = yolov3_forward_jit(x, params)
    outs = [jax.block_until_ready(o) for o in outs]

    refs = reference_forward(x, params)
    det_out = 3 * (5 + num_classes)
    for o, r in zip(outs, refs):
        assert o.shape == (2, det_out, 4, 4), o.shape
        assert o.dtype == jnp.float32, o.dtype
        err = float(jnp.max(jnp.abs(o - r)))
        assert jnp.allclose(o, r, atol=5e-3, rtol=5e-3), err

    print("KERNEL_OK")
</pallas_src>

<mosaic_0001>
module attributes {stable_mosaic.version = 11 : i64} {
  func.func @_conv_bn_lrelu_pool_kernel(%arg0: i32, %arg1: i32, %arg2: memref<1x8x16x27xbf16, #tpu.memory_space<vmem>>, %arg3: memref<27x128xbf16, #tpu.memory_space<vmem>>, %arg4: memref<1x128xf32, #tpu.memory_space<vmem>>, %arg5: memref<1x128xf32, #tpu.memory_space<vmem>>, %arg6: memref<1x4x8x128xbf16, #tpu.memory_space<vmem>>) attributes {dimension_semantics = [#tpu.dimension_semantics<parallel>, #tpu.dimension_semantics<parallel>], iteration_bounds = array<i64: 2, 2>, scalar_prefetch = 0 : i64, scratch_operands = 0 : i64, tpu.core_type = #tpu.core_type<tc>, window_params = [{transform_indices = @transform_0, window_bounds = array<i64: 1, 8, 16, 27>}, {pipeline_mode = #tpu.pipeline_mode<synchronous>, transform_indices = @transform_1, window_bounds = array<i64: 27, 128>}, {pipeline_mode = #tpu.pipeline_mode<synchronous>, transform_indices = @transform_2, window_bounds = array<i64: 1, 128>}, {pipeline_mode = #tpu.pipeline_mode<synchronous>, transform_indices = @transform_3, window_bounds = array<i64: 1, 128>}, {transform_indices = @transform_4, window_bounds = array<i64: 1, 4, 8, 128>}]} {
    %c0 = arith.constant 0 : index
    %c0_0 = arith.constant 0 : index
    %c0_1 = arith.constant 0 : index
    %c0_2 = arith.constant 0 : index
    %0 = vector.load %arg2[%c0, %c0_0, %c0_1, %c0_2] : memref<1x8x16x27xbf16, #tpu.memory_space<vmem>>, vector<1x8x16x27xbf16>
    %1 = vector.shape_cast %0 : vector<1x8x16x27xbf16> to vector<8x16x27xbf16>
    %2 = vector.shape_cast %1 : vector<8x16x27xbf16> to vector<128x27xbf16>
    %c0_3 = arith.constant 0 : index
    %c0_4 = arith.constant 0 : index
    %3 = vector.load %arg3[%c0_3, %c0_4] : memref<27x128xbf16, #tpu.memory_space<vmem>>, vector<27x128xbf16>
    %cst = arith.constant dense<0.000000e+00> : vector<128x128xf32>
    %4 = tpu.matmul %2, %3, %cst {dimension_numbers = #tpu.dot_dimension_numbers<[1], [0], [0], [1], [0, 0, 1, 1], [], []>} : vector<128x27xbf16>, vector<27x128xbf16>, vector<128x128xf32> -> vector<128x128xf32>
    %c0_5 = arith.constant 0 : index
    %c0_6 = arith.constant 0 : index
    %5 = vector.load %arg4[%c0_5, %c0_6] : memref<1x128xf32, #tpu.memory_space<vmem>>, vector<1x128xf32>
    %c0_7 = arith.constant 0 : index
    %c0_8 = arith.constant 0 : index
    %6 = vector.load %arg5[%c0_7, %c0_8] : memref<1x128xf32, #tpu.memory_space<vmem>>, vector<1x128xf32>
    %7 = vector.broadcast %5 : vector<1x128xf32> to vector<128x128xf32>
    %8 = arith.mulf %4, %7 : vector<128x128xf32>
    %9 = vector.broadcast %6 : vector<1x128xf32> to vector<128x128xf32>
    %10 = arith.addf %8, %9 : vector<128x128xf32>
    %cst_9 = arith.constant 0.000000e+00 : f32
    %11 = vector.broadcast %cst_9 : f32 to vector<128x128xf32>
    %12 = arith.cmpf oge, %10, %11 : vector<128x128xf32>
    %cst_10 = arith.constant 1.000000e-01 : f32
    %13 = vector.broadcast %cst_10 : f32 to vector<128x128xf32>
    %14 = arith.mulf %13, %10 : vector<128x128xf32>
    %15 = arith.select %12, %10, %14 : vector<128x128xi1>, vector<128x128xf32>
    %16 = vector.shape_cast %15 : vector<128x128xf32> to vector<8x8x2x128xf32>
    %cst_11 = arith.constant dense<0xFF800000> : vector<8x8x128xf32>
    %17 = vector.multi_reduction <maximumf>, %16, %cst_11 [2] : vector<8x8x2x128xf32> to vector<8x8x128xf32>
    %18 = vector.shape_cast %17 : vector<8x8x128xf32> to vector<4x2x8x128xf32>
    %cst_12 = arith.constant dense<0xFF800000> : vector<4x8x128xf32>
    %19 = vector.multi_reduction <maximumf>, %18, %cst_12 [1] : vector<4x2x8x128xf32> to vector<4x8x128xf32>
    %20 = vector.shape_cast %19 : vector<4x8x128xf32> to vector<1x4x8x128xf32>
    %21 = arith.truncf %20 : vector<1x4x8x128xf32> to vector<1x4x8x128xbf16>
    %c0_13 = arith.constant 0 : index
    %c0_14 = arith.constant 0 : index
    %c0_15 = arith.constant 0 : index
    %c0_16 = arith.constant 0 : index
    %22 = vector.load %arg6[%c0_13, %c0_14, %c0_15, %c0_16] : memref<1x4x8x128xbf16, #tpu.memory_space<vmem>>, vector<1x4x8x128xbf16>
    tpu.vector_store %arg6[%c0_13, %c0_14, %c0_15, %c0_16], %21 {strides = array<i32>} : memref<1x4x8x128xbf16, #tpu.memory_space<vmem>>, vector<1x4x8x128xbf16>,
    return
  }
  func.func @transform_0(%arg0: i32, %arg1: i32) -> (i32, i32, i32, i32) {
    %c2_i32 = arith.constant 2 : i32
    %0 = arith.muli %arg0, %c2_i32 : i32
    %1 = arith.addi %0, %arg1 : i32
    %c0_i32 = arith.constant 0 : i32
    %c0_i32_0 = arith.constant 0 : i32
    %c0_i32_1 = arith.constant 0 : i32
    %c0_i32_2 = arith.constant 0 : i32
    return %1, %c0_i32, %c0_i32_0, %c0_i32_1 : i32, i32, i32, i32
  }
  func.func @transform_1(%arg0: i32, %arg1: i32) -> (i32, i32) {
    %c0_i32 = arith.constant 0 : i32
    %c0_i32_0 = arith.constant 0 : i32
    %c0_i32_1 = arith.constant 0 : i32
    return %c0_i32, %c0_i32_0 : i32, i32
  }
  func.func @transform_2(%arg0: i32, %arg1: i32) -> (i32, i32) {
    %c0_i32 = arith.constant 0 : i32
    %c0_i32_0 = arith.constant 0 : i32
    %c0_i32_1 = arith.constant 0 : i32
    return %c0_i32, %c0_i32_0 : i32, i32
  }
  func.func @transform_3(%arg0: i32, %arg1: i32) -> (i32, i32) {
    %c0_i32 = arith.constant 0 : i32
    %c0_i32_0 = arith.constant 0 : i32
    %c0_i32_1 = arith.constant 0 : i32
    return %c0_i32, %c0_i32_0 : i32, i32
  }
  func.func @transform_4(%arg0: i32, %arg1: i32) -> (i32, i32, i32, i32) {
    %c0_i32 = arith.constant 0 : i32
    %c0_i32_0 = arith.constant 0 : i32
    %c0_i32_1 = arith.constant 0 : i32
    return %arg0, %arg1, %c0_i32, %c0_i32_0 : i32, i32, i32, i32
  }
}

module attributes {stable_mosaic.version = 11 : i64} {
  func.func @_conv_bn_lrelu_pool_heads_kernel(%arg0: i32, %arg1: i32, %arg2: memref<1x10x10x128xbf16, #tpu.memory_space<vmem>>, %arg3: memref<1152x128xbf16, #tpu.memory_space<vmem>>, %arg4: memref<1x128xf32, #tpu.memory_space<vmem>>, %arg5: memref<1x128xf32, #tpu.memory_space<vmem>>, %arg6: memref<128x128xbf16, #tpu.memory_space<vmem>>, %arg7: memref<1x128xf32, #tpu.memory_space<vmem>>, %arg8: memref<1x4x4x128xf32, #tpu.memory_space<vmem>>) attributes {dimension_semantics = [#tpu.dimension_semantics<parallel>, #tpu.dimension_semantics<parallel>], iteration_bounds = array<i64: 2, 1>, scalar_prefetch = 0 : i64, scratch_operands = 0 : i64, tpu.core_type = #tpu.core_type<tc>, window_params = [{transform_indices = @transform_0, window_bounds = array<i64: 1, 10, 10, 128>}, {pipeline_mode = #tpu.pipeline_mode<synchronous>, transform_indices = @transform_1, window_bounds = array<i64: 1152, 128>}, {pipeline_mode = #tpu.pipeline_mode<synchronous>, transform_indices = @transform_2, window_bounds = array<i64: 1, 128>}, {pipeline_mode = #tpu.pipeline_mode<synchronous>, transform_indices = @transform_3, window_bounds = array<i64: 1, 128>}, {pipeline_mode = #tpu.pipeline_mode<synchronous>, transform_indices = @transform_4, window_bounds = array<i64: 128, 128>}, {pipeline_mode = #tpu.pipeline_mode<synchronous>, transform_indices = @transform_5, window_bounds = array<i64: 1, 128>}, {transform_indices = @transform_6, window_bounds = array<i64: 1, 4, 4, 128>}]} {
    %c0 = arith.constant 0 : index
    %c0_0 = arith.constant 0 : index
    %c0_1 = arith.constant 0 : index
    %c0_2 = arith.constant 0 : index
    %0 = vector.load %arg2[%c0, %c0_0, %c0_1, %c0_2] : memref<1x10x10x128xbf16, #tpu.memory_space<vmem>>, vector<1x8x8x128xbf16>
    %1 = vector.shape_cast %0 : vector<1x8x8x128xbf16> to vector<8x8x128xbf16>
    %c0_3 = arith.constant 0 : index
    %c0_4 = arith.constant 0 : index
    %c1 = arith.constant 1 : index
    %c0_5 = arith.constant 0 : index
    %2 = vector.load %arg2[%c0_3, %c0_4, %c1, %c0_5] : memref<1x10x10x128xbf16, #tpu.memory_space<vmem>>, vector<1x8x8x128xbf16>
    %3 = vector.shape_cast %2 : vector<1x8x8x128xbf16> to vector<8x8x128xbf16>
    %c0_6 = arith.constant 0 : index
    %c0_7 = arith.constant 0 : index
    %c2 = arith.constant 2 : index
    %c0_8 = arith.constant 0 : index
    %4 = vector.load %arg2[%c0_6, %c0_7, %c2, %c0_8] : memref<1x10x10x128xbf16, #tpu.memory_space<vmem>>, vector<1x8x8x128xbf16>
    %5 = vector.shape_cast %4 : vector<1x8x8x128xbf16> to vector<8x8x128xbf16>
    %c0_9 = arith.constant 0 : index
    %c1_10 = arith.constant 1 : index
    %c0_11 = arith.constant 0 : index
    %c0_12 = arith.constant 0 : index
    %6 = vector.load %arg2[%c0_9, %c1_10, %c0_11, %c0_12] : memref<1x10x10x128xbf16, #tpu.memory_space<vmem>>, vector<1x8x8x128xbf16>
    %7 = vector.shape_cast %6 : vector<1x8x8x128xbf16> to vector<8x8x128xbf16>
    %c0_13 = arith.constant 0 : index
    %c1_14 = arith.constant 1 : index
    %c1_15 = arith.constant 1 : index
    %c0_16 = arith.constant 0 : index
    %8 = vector.load %arg2[%c0_13, %c1_14, %c1_15, %c0_16] : memref<1x10x10x128xbf16, #tpu.memory_space<vmem>>, vector<1x8x8x128xbf16>
    %9 = vector.shape_cast %8 : vector<1x8x8x128xbf16> to vector<8x8x128xbf16>
    %c0_17 = arith.constant 0 : index
    %c1_18 = arith.constant 1 : index
    %c2_19 = arith.constant 2 : index
    %c0_20 = arith.constant 0 : index
    %10 = vector.load %arg2[%c0_17, %c1_18, %c2_19, %c0_20] : memref<1x10x10x128xbf16, #tpu.memory_space<vmem>>, vector<1x8x8x128xbf16>
    %11 = vector.shape_cast %10 : vector<1x8x8x128xbf16> to vector<8x8x128xbf16>
    %c0_21 = arith.constant 0 : index
    %c2_22 = arith.constant 2 : index
    %c0_23 = arith.constant 0 : index
    %c0_24 = arith.constant 0 : index
    %12 = vector.load %arg2[%c0_21, %c2_22, %c0_23, %c0_24] : memref<1x10x10x128xbf16, #tpu.memory_space<vmem>>, vector<1x8x8x128xbf16>
    %13 = vector.shape_cast %12 : vector<1x8x8x128xbf16> to vector<8x8x128xbf16>
    %c0_25 = arith.constant 0 : index
    %c2_26 = arith.constant 2 : index
    %c1_27 = arith.constant 1 : index
    %c0_28 = arith.constant 0 : index
    %14 = vector.load %arg2[%c0_25, %c2_26, %c1_27, %c0_28] : memref<1x10x10x128xbf16, #tpu.memory_space<vmem>>, vector<1x8x8x128xbf16>
    %15 = vector.shape_cast %14 : vector<1x8x8x128xbf16> to vector<8x8x128xbf16>
    %c0_29 = arith.constant 0 : index
    %c2_30 = arith.constant 2 : index
    %c2_31 = arith.constant 2 : index
    %c0_32 = arith.constant 0 : index
    %16 = vector.load %arg2[%c0_29, %c2_30, %c2_31, %c0_32] : memref<1x10x10x128xbf16, #tpu.memory_space<vmem>>, vector<1x8x8x128xbf16>
    %17 = vector.shape_cast %16 : vector<1x8x8x128xbf16> to vector<8x8x128xbf16>
    %18 = tpu.concatenate %1, %3, %5, %7, %9, %11, %13, %15, %17 in 2 : vector<8x8x128xbf16>, vector<8x8x128xbf16>, vector<8x8x128xbf16>, vector<8x8x128xbf16>, vector<8x8x128xbf16>, vector<8x8x128xbf16>, vector<8x8x128xbf16>, vector<8x8x128xbf16>, vector<8x8x128xbf16> -> vector<8x8x1152xbf16>
    %19 = vector.shape_cast %18 : vector<8x8x1152xbf16> to vector<64x1152xbf16>
    %c0_33 = arith.constant 0 : index
    %c0_34 = arith.constant 0 : index
    %20 = vector.load %arg3[%c0_33, %c0_34] : memref<1152x128xbf16, #tpu.memory_space<vmem>>, vector<1152x128xbf16>
    %cst = arith.constant dense<0.000000e+00> : vector<64x128xf32>
    %21 = tpu.matmul %19, %20, %cst {dimension_numbers = #tpu.dot_dimension_numbers<[1], [0], [0], [1], [0, 0, 1, 1], [], []>} : vector<64x1152xbf16>, vector<1152x128xbf16>, vector<64x128xf32> -> vector<64x128xf32>
    %c0_35 = arith.constant 0 : index
    %c0_36 = arith.constant 0 : index
    %22 = vector.load %arg4[%c0_35, %c0_36] : memref<1x128xf32, #tpu.memory_space<vmem>>, vector<1x128xf32>
    %c0_37 = arith.constant 0 : index
    %c0_38 = arith.constant 0 : index
    %23 = vector.load %arg5[%c0_37, %c0_38] : memref<1x128xf32, #tpu.memory_space<vmem>>, vector<1x128xf32>
    %24 = vector.broadcast %22 : vector<1x128xf32> to vector<64x128xf32>
    %25 = arith.mulf %21, %24 : vector<64x128xf32>
    %26 = vector.broadcast %23 : vector<1x128xf32> to vector<64x128xf32>
    %27 = arith.addf %25, %26 : vector<64x128xf32>
    %cst_39 = arith.constant 0.000000e+00 : f32
    %28 = vector.broadcast %cst_39 : f32 to vector<64x128xf32>
    %29 = arith.cmpf oge, %27, %28 : vector<64x128xf32>
    %cst_40 = arith.constant 1.000000e-01 : f32
    %30 = vector.broadcast %cst_40 : f32 to vector<64x128xf32>
    %31 = arith.mulf %30, %27 : vector<64x128xf32>
    %32 = arith.select %29, %27, %31 : vector<64x128xi1>, vector<64x128xf32>
    %33 = vector.shape_cast %32 : vector<64x128xf32> to vector<8x4x2x128xf32>
    %cst_41 = arith.constant dense<0xFF800000> : vector<8x4x128xf32>
    %34 = vector.multi_reduction <maximumf>, %33, %cst_41 [2] : vector<8x4x2x128xf32> to vector<8x4x128xf32>
    %35 = vector.shape_cast %34 : vector<8x4x128xf32> to vector<4x2x4x128xf32>
    %cst_42 = arith.constant dense<0xFF800000> : vector<4x4x128xf32>
    %36 = vector.multi_reduction <maximumf>, %35, %cst_42 [1] : vector<4x2x4x128xf32> to vector<4x4x128xf32>
    %37 = vector.shape_cast %36 : vector<4x4x128xf32> to vector<16x128xf32>
    %38 = arith.truncf %37 : vector<16x128xf32> to vector<16x128xbf16>
    %c0_43 = arith.constant 0 : index
    %c0_44 = arith.constant 0 : index
    %39 = vector.load %arg6[%c0_43, %c0_44] : memref<128x128xbf16, #tpu.memory_space<vmem>>, vector<128x128xbf16>
    %cst_45 = arith.constant dense<0.000000e+00> : vector<16x128xf32>
    %40 = tpu.matmul %38, %39, %cst_45 {dimension_numbers = #tpu.dot_dimension_numbers<[1], [0], [0], [1], [0, 0, 1, 1], [], []>} : vector<16x128xbf16>, vector<128x128xbf16>, vector<16x128xf32> -> vector<16x128xf32>
    %c0_46 = arith.constant 0 : index
    %c0_47 = arith.constant 0 : index
    %41 = vector.load %arg7[%c0_46, %c0_47] : memref<1x128xf32, #tpu.memory_space<vmem>>, vector<1x128xf32>
    %42 = vector.broadcast %41 : vector<1x128xf32> to vector<16x128xf32>
    %43 = arith.addf %40, %42 : vector<16x128xf32>
    %44 = vector.shape_cast %43 : vector<16x128xf32> to vector<1x4x4x128xf32>
    %c0_48 = arith.constant 0 : index
    %c0_49 = arith.constant 0 : index
    %c0_50 = arith.constant 0 : index
    %c0_51 = arith.constant 0 : index
    %45 = vector.load %arg8[%c0_48, %c0_49, %c0_50, %c0_51] : memref<1x4x4x128xf32, #tpu.memory_space<vmem>>, vector<1x4x4x128xf32>
    tpu.vector_store %arg8[%c0_48, %c0_49, %c0_50, %c0_51], %44 {strides = array<i32>} : memref<1x4x4x128xf32, #tpu.memory_space<vmem>>, vector<1x4x4x128xf32>,
    return
  }
  func.func @transform_0(%arg0: i32, %arg1: i32) -> (i32, i32, i32, i32) {
    %c1_i32 = arith.constant 1 : i32
    %0 = arith.muli %arg0, %c1_i32 : i32
    %1 = arith.addi %0, %arg1 : i32
    %c0_i32 = arith.constant 0 : i32
    %c0_i32_0 = arith.constant 0 : i32
    %c0_i32_1 = arith.constant 0 : i32
    %c0_i32_2 = arith.constant 0 : i32
    return %1, %c0_i32, %c0_i32_0, %c0_i32_1 : i32, i32, i32, i32
  }
  func.func @transform_1(%arg0: i32, %arg1: i32) -> (i32, i32) {
    %c0_i32 = arith.constant 0 : i32
    %c0_i32_0 = arith.constant 0 : i32
    %c0_i32_1 = arith.constant 0 : i32
    return %c0_i32, %c0_i32_0 : i32, i32
  }
  func.func @transform_2(%arg0: i32, %arg1: i32) -> (i32, i32) {
    %c0_i32 = arith.constant 0 : i32
    %c0_i32_0 = arith.constant 0 : i32
    %c0_i32_1 = arith.constant 0 : i32
    return %c0_i32, %c0_i32_0 : i32, i32
  }
  func.func @transform_3(%arg0: i32, %arg1: i32) -> (i32, i32) {
    %c0_i32 = arith.constant 0 : i32
    %c0_i32_0 = arith.constant 0 : i32
    %c0_i32_1 = arith.constant 0 : i32
    return %c0_i32, %c0_i32_0 : i32, i32
  }
  func.func @transform_4(%arg0: i32, %arg1: i32) -> (i32, i32) {
    %c0_i32 = arith.constant 0 : i32
    %c0_i32_0 = arith.constant 0 : i32
    %c0_i32_1 = arith.constant 0 : i32
    return %c0_i32, %c0_i32_0 : i32, i32
  }
  func.func @transform_5(%arg0: i32, %arg1: i32) -> (i32, i32) {
    %c0_i32 = arith.constant 0 : i32
    %c0_i32_0 = arith.constant 0 : i32
    %c0_i32_1 = arith.constant 0 : i32
    return %c0_i32, %c0_i32_0 : i32, i32
  }
  func.func @transform_6(%arg0: i32, %arg1: i32) -> (i32, i32, i32, i32) {
    %c0_i32 = arith.constant 0 : i32
    %c0_i32_0 = arith.constant 0 : i32
    %c0_i32_1 = arith.constant 0 : i32
    return %arg0, %arg1, %c0_i32, %c0_i32_0 : i32, i32, i32, i32
  }
}

</mosaic_0001>

<bundles_post_ra>
// kernel: yolov3_forward.2
= control target key start
LH: loop header
LB: loop body
LE: loop exit
PB: predicated region body
PF: predicated region fallthrough
CT: control target
= control target key end

     0   :  { %s1487_s15 = smov 0   ;;  %s1489_s16 = smov 0   ;;  %s1858_s0 = inlined_call_operand.vmem [shape: bf16[4,8,16,27], index: 0, kind: input, shape index: {}]   ;;  %s1859_s1 = inlined_call_operand.vmem [shape: bf16[27,128], index: 1, kind: input, shape index: {}]   ;;  %s1860_s2 = inlined_call_operand.vmem [shape: f32[1,128], index: 2, kind: input, shape index: {}]   ;;  %s1861_s3 = inlined_call_operand.vmem [shape: f32[1,128], index: 3, kind: input, shape index: {}]   ;;  %s1862_s4 = inlined_call_operand.vmem [shape: bf16[2,8,8,128], index: 4, kind: output, shape index: {}]  }
   0x1   :  { %s1491_s17 = smov 0   ;;  %s1493_s18 = smov 0  }
   0x2   :  { %s1495_s19 = smov 0  }
   0x3 LB: > { %s23_s20 = sadd.s32 1, %s1451_s17  ;;  %s26_s21 = sadd.s32 1, %s1455_s18  ;;  %s1459_s19 = sphi %s1495_s19, %s14_s19   ;;  %s1455_s18 = sphi %s1493_s18, %s1882_s18   ;;  %s1451_s17 = sphi %s1491_s17, %s1881_s17   ;;  %s1447_s16 = sphi %s1489_s16, %s1880_s16   ;;  %s1443_s15 = sphi %s1487_s15, %s1879_s15  }
   0x4   : > { %p24_p0 = scmp.ge.s32.totalorder %s23_s20, 2  ;;  %p1302_p1 = scmp.ge.s32.totalorder %s1459_s19, 1 }
   0x5   : > { %p184_p2 = scmp.lt.s32.totalorder %s1459_s19, 5 }
   0x6   : > { %s1884_s20 = smov (%p24_p0, %s23_s20), 0  ;;  %s1886_s21 = smov (!%p24_p0, %s26_s21), %s1455_s18 }
   0x7   : > { %p185_p3 = pnand %p1302_p1, %p184_p2  ;;  %p28_p4 = scmp.ge.s32.totalorder %s1886_s21, 2 }
   0x9   : > { %s1888_s21 = smov (%p28_p4, %s1886_s21), 0  ;;  %188 = sbr.rel (%p185_p3) target bundleno = 343 (0x157), region = 36 }
   0xe   : > { %v1347_v0 = vld [vmem:[%s1859_s1 + $0x8] sm:$0xf]  ;;  %v1369_v1 = vld [vmem:[%s1859_s1 + $0x8] sm:$0x30]  ;;  %vm332_vm0 = vcmask 1044480   ;;  %vm333_vm1 = vcmask 1045504  }
   0xf   : > { %v1348_v2 = vor.u32 %v1369_v1, %v1347_v0  ;;  %s1303_s26 = sshll.u32 %s1447_s16, 1  ;;  %v1461_v3 = vmov 65535   ;;  %v1368_v7 = vld [vmem:[%s1859_s1] sm:$0xff]  ;;  %vm307_vm2 = vcmask 220160   ;;  %vm588_vm3 = vcmask 1041408   ;;  %s1306_s12 = sshll.u32 %s1443_s15, 2 }
  0x10   : > { %v334_v4 = vsel %vm332_vm0, 4294967295, %v1461_v3  ;;  %s217_s27 = sadd.s32 %s1443_s15, %s1303_s26  ;;  %v1546_v16 = vld [vmem:[%s1860_s2] ss:$0 sm:$0xff]  ;;  %vm1165_vm15 = vcmask 1041409   ;;  %vm1167_vm0 = vcmask 1042434   ;;  %p226_p6 = scmp.lt.s32.totalorder %s1447_s16, 1 }
  0x11   : > { %v335_v5 = vsel %vm333_vm1, %v334_v4, 0  ;;  %p218_p5 = scmp.lt.s32.totalorder %s217_s27, 3  ;;  %v1551_v17 = vld [vmem:[%s1861_s3] ss:$0 sm:$0xff]  ;;  %p1741_p7 = scmp.lt.s32.totalorder %s1306_s12, 7 }
  0x12   : > { %v337_v6 = vand.u32 %v1348_v2, %v335_v5  ;;  %s1892_s16 = smov (!%p226_p6, %s1447_s16), 1 }
  0x13   : > { %s1890_s27 = smov (!%p218_p5, %s217_s27), 3  ;;  %s1894_s12 = smov (!%p1741_p7, %s1306_s12), 7 }
  0x14   : > { %345 = vmatpush.bf16.msra.mxu0 %v337_v6  ;;  %1370 = vmatpush.bf16.msra.mxu1 %v337_v6  ;;  %s1359_s30 = sshll.u32 %s1890_s27, 6  ;;  %s1307_s25 = sshll.u32 %s1892_s16, 3 }
  0x15   : > { %1371 = vmatpush.bf16.msra.mxu2 %v337_v6  ;;  %1372 = vmatpush.bf16.msra.mxu3 %v337_v6  ;;  %s222_s7 = scalar_lea.vmem %s1858_s0, %s1359_s30  ;;  %s231_s15 = sadd.s32 %s1307_s25, %s1894_s12 }
  0x16   : > { %v1360_v8 = vld [vmem:[%s222_s7] sm:$0xff]  ;;  %v1362_v9 = vld [vmem:[%s222_s7 + $0x10] sm:$0xff]  ;;  %v1361_v12 = vld [vmem:[%s222_s7 + $0x8] sm:$0xff]  ;;  %s1308_s16 = sshll.u32 %s231_s15, 2 }
  0x17   : > { %v1364_v10 = vld [vmem:[%s222_s7 + $0x20] sm:$0xff]  ;;  %v1366_v11 = vld [vmem:[%s222_s7 + $0x30] sm:$0xff]  ;;  %v1363_v13 = vld [vmem:[%s222_s7 + $0x18] sm:$0xff]  ;;  %s1783_s28 = scalar_lea.vmem %s1862_s4, %s1308_s16 }
  0x18   : > { %346 = vmatpush.bf16.msra.mxu0 %v1368_v7  ;;  %1373 = vmatpush.bf16.msra.mxu1 %v1368_v7  ;;  %v1365_v14 = vld [vmem:[%s222_s7 + $0x28] sm:$0xff]  ;;  %v1367_v15 = vld [vmem:[%s222_s7 + $0x38] sm:$0xff] }
  0x19   : > { %1374 = vmatpush.bf16.msra.mxu2 %v1368_v7  ;;  %1375 = vmatpush.bf16.msra.mxu3 %v1368_v7 }
  0x1b   : > { %1349 = vmatmul.msk.bf16.vlgmr.msra.gmra.mxu0 %vm307_vm2, %v1360_v8  ;;  %1351 = vmatmul.msk.bf16.vlgmr.msra.gmra.mxu1 %vm307_vm2, %v1362_v9 }
  0x1c   : > { %1353 = vmatmul.msk.bf16.vlgmr.msra.gmra.mxu2 %vm307_vm2, %v1364_v10  ;;  %1355 = vmatmul.msk.bf16.vlgmr.msra.gmra.mxu3 %vm307_vm2, %v1366_v11 }
  0x2b   : > { %1350 = vmatmul.msk.bf16.gmra.mxu0 %vm307_vm2, %v1361_v12  ;;  %1352 = vmatmul.msk.bf16.gmra.mxu1 %vm307_vm2, %v1363_v13 }
  0x2c   : > { %1354 = vmatmul.msk.bf16.gmra.mxu2 %vm307_vm2, %v1365_v14  ;;  %1356 = vmatmul.msk.bf16.gmra.mxu3 %vm307_vm2, %v1367_v15  ;;  %vm1169_vm2 = vcmask 1043459  }
  0x98   : > { %v348_v18 = vpop.f32.mrf.mxu0  ;;  %v358_v19 = vpop.f32.mrf.mxu1 }
  0x99   : > { %v393_v20 = vmul.f32 %v1546_v16, %v348_v18  ;;  %v397_v21 = vmul.f32 %v1546_v16, %v358_v19 }
  0x9b   : > { %v412_v22 = vadd.f32 %v1551_v17, %v393_v20  ;;  %v416_v23 = vadd.f32 %v1551_v17, %v397_v21 }
  0x9d   : > { %vm428_vm4 = vcmp.ge.f32.partialorder %v412_v22, 0.0  ;;  %v444_v24 = vmul.f32 0.1, %v412_v22  ;;  %vm432_vm5 = vcmp.ge.f32.partialorder %v416_v23, 0.0  ;;  %v448_v25 = vmul.f32 0.1, %v416_v23 }
  0x9f   : > { %v460_v26 = vsel %vm428_vm4, %v412_v22, %v444_v24  ;;  %v464_v27 = vsel %vm432_vm5, %v416_v23, %v448_v25  ;;  %v368_v56 = vpop.f32.mrf.mxu2  ;;  %v378_v60 = vpop.f32.mrf.mxu3  ;;  %vm1171_vm5 = vcmask 1044484  }
  0xa0   : > { %v492_v28 = vrot.slane %v460_v26, 2  ;;  %v493_v29 = vrot.slane %v460_v26, 4  ;;  %v494_v30 = vrot.slane %v460_v26, 6  ;;  %v589_v31 = vsel %vm588_vm3, %v460_v26, -inf  ;;  %v350_v15 = vpop.f32.mrf.mxu0 }
  0xa1   : > { %v590_v32 = vrot.slane %v589_v31, 4  ;;  %v504_v36 = vrot.slane %v464_v27, 2  ;;  %v505_v38 = vrot.slane %v464_v27, 4  ;;  %v506_v39 = vrot.slane %v464_v27, 6 }
  0xa2   : > { %v596_v33 = vsel %vm588_vm3, %v492_v28, -inf  ;;  %v603_v34 = vsel %vm588_vm3, %v493_v29, -inf  ;;  %v610_v35 = vsel %vm588_vm3, %v494_v30, -inf  ;;  %v701_v40 = vsel %vm588_vm3, %v464_v27, -inf }
  0xa3   : > { %v597_v37 = vrot.slane %v596_v33, 4  ;;  %v591_v41 = vmax.f32 %v589_v31, %v590_v32  ;;  %v604_v42 = vrot.slane %v603_v34, 4  ;;  %v611_v43 = vrot.slane %v610_v35, 4 }
  0xa4   : > { %v702_v44 = vrot.slane %v701_v40, 4  ;;  %v708_v46 = vsel %vm588_vm3, %v504_v36, -inf  ;;  %v715_v47 = vsel %vm588_vm3, %v505_v38, -inf  ;;  %v722_v48 = vsel %vm588_vm3, %v506_v39, -inf }
  0xa5   : > { %v598_v45 = vmax.f32 %v596_v33, %v597_v37  ;;  %v592_v49 = vrot.slane %v591_v41, 2  ;;  %v605_v50 = vmax.f32 %v603_v34, %v604_v42  ;;  %v612_v51 = vmax.f32 %v610_v35, %v611_v43 }
  0xa6   : > { %v703_v52 = vmax.f32 %v701_v40, %v702_v44  ;;  %v709_v53 = vrot.slane %v708_v46, 4  ;;  %v716_v54 = vrot.slane %v715_v47, 4  ;;  %v723_v55 = vrot.slane %v722_v48, 4 }
  0xa7   : > { %v599_v57 = vrot.slane %v598_v45, 2  ;;  %v593_v58 = vmax.f32 %v591_v41, %v592_v49  ;;  %v606_v59 = vrot.slane %v605_v50, 2  ;;  %v613_v61 = vrot.slane %v612_v51, 2 }
  0xa8   : > { %v401_v62 = vmul.f32 %v1546_v16, %v368_v56  ;;  %v704_v63 = vrot.slane %v703_v52, 2  ;;  %v710_v0 = vmax.f32 %v708_v46, %v709_v53  ;;  %v717_v1 = vmax.f32 %v715_v47, %v716_v54 }
  0xa9   : > { %v724_v2 = vmax.f32 %v722_v48, %v723_v55  ;;  %v600_v3 = vmax.f32 %v598_v45, %v599_v57  ;;  %v405_v5 = vmul.f32 %v1546_v16, %v378_v60  ;;  %v594_v6 = vrot.slane %v593_v58, 1  ;;  %v360_v48 = vpop.f32.mrf.mxu1 }
  0xaa   : > { %v420_v4 = vadd.f32 %v1551_v17, %v401_v62  ;;  %v607_v7 = vmax.f32 %v605_v50, %v606_v59  ;;  %v614_v8 = vmax.f32 %v612_v51, %v613_v61  ;;  %v705_v11 = vmax.f32 %v703_v52, %v704_v63 }
  0xab   : > { %v424_v10 = vadd.f32 %v1551_v17, %v405_v5  ;;  %v711_v12 = vrot.slane %v710_v0, 2  ;;  %v718_v13 = vrot.slane %v717_v1, 2  ;;  %v725_v14 = vrot.slane %v724_v2, 2 }
  0xac   : > { %vm436_vm6 = vcmp.ge.f32.partialorder %v420_v4, 0.0  ;;  %v452_v9 = vmul.f32 0.1, %v420_v4  ;;  %v601_v18 = vrot.slane %v600_v3, 1  ;;  %v608_v25 = vrot.slane %v607_v7, 1 }
  0xad   : > { %vm440_vm7 = vcmp.ge.f32.partialorder %v424_v10, 0.0  ;;  %v456_v20 = vmul.f32 0.1, %v424_v10  ;;  %v394_v28 = vmul.f32 %v1546_v16, %v350_v15  ;;  %v1574_v33 = vmax.f32 %v593_v58, %v594_v6 }
  0xae   : > { %v468_v19 = vsel %vm436_vm6, %v420_v4, %v452_v9  ;;  %v615_v36 = vrot.slane %v614_v8, 1  ;;  %v712_v37 = vmax.f32 %v710_v0, %v711_v12  ;;  %v706_v40 = vrot.slane %v705_v11, 1  ;;  %v370_v0 = vpop.f32.mrf.mxu2 }
  0xaf   : > { %v516_v21 = vrot.slane %v468_v19, 2  ;;  %v517_v22 = vrot.slane %v468_v19, 4  ;;  %v518_v23 = vrot.slane %v468_v19, 6  ;;  %v813_v24 = vsel %vm588_vm3, %v468_v19, -inf  ;;  %v380_v19 = vpop.f32.mrf.mxu3 }
  0xb0   : > { %v814_v26 = vrot.slane %v813_v24, 4  ;;  %v472_v27 = vsel %vm440_vm7, %v424_v10, %v456_v20  ;;  %v719_v41 = vmax.f32 %v717_v1, %v718_v13  ;;  %v413_v43 = vadd.f32 %v1551_v17, %v394_v28 }
  0xb1   : > { %v820_v29 = vsel %vm588_vm3, %v516_v21, -inf  ;;  %v827_v30 = vsel %vm588_vm3, %v517_v22, -inf  ;;  %v834_v31 = vsel %vm588_vm3, %v518_v23, -inf  ;;  %v528_v32 = vrot.slane %v472_v27, 2 }
  0xb2   : > { %v815_v34 = vmax.f32 %v813_v24, %v814_v26  ;;  %v821_v35 = vrot.slane %v820_v29, 4  ;;  %v828_v38 = vrot.slane %v827_v30, 4  ;;  %v835_v39 = vrot.slane %v834_v31, 4 }
  0xb3   : > { %v925_v42 = vsel %vm588_vm3, %v472_v27, -inf  ;;  %v1578_v44 = vmax.f32 %v600_v3, %v601_v18  ;;  %v1580_v45 = vmax.f32 %v607_v7, %v608_v25  ;;  %v726_v46 = vmax.f32 %v724_v2, %v725_v14 }
  0xb4   : > { %v932_v47 = vsel %vm588_vm3, %v528_v32, -inf  ;;  %v816_v49 = vrot.slane %v815_v34, 2  ;;  %v822_v50 = vmax.f32 %v820_v29, %v821_v35  ;;  %v529_v51 = vrot.slane %v472_v27, 4 }
  0xb5   : > { %v530_v52 = vrot.slane %v472_v27, 6  ;;  %v713_v53 = vrot.slane %v712_v37, 1  ;;  %v829_v54 = vmax.f32 %v827_v30, %v828_v38  ;;  %v836_v55 = vmax.f32 %v834_v31, %v835_v39 }
  0xb6   : > { %v926_v56 = vrot.slane %v925_v42, 4  ;;  %v1583_v57 = vmax.f32 %v614_v8, %v615_v36  ;;  %v933_v58 = vrot.slane %v932_v47, 4  ;;  %v445_v59 = vmul.f32 0.1, %v413_v43 }
  0xb7   : > { %v398_v60 = vmul.f32 %v1546_v16, %v360_v48  ;;  %v1586_v61 = vmax.f32 %v705_v11, %v706_v40  ;;  %v720_v62 = vrot.slane %v719_v41, 1  ;;  %v727_v63 = vrot.slane %v726_v46, 1 }
  0xb8   : > { %vm429_vm8 = vcmp.ge.f32.partialorder %v413_v43, 0.0  ;;  %v817_v1 = vmax.f32 %v815_v34, %v816_v49  ;;  %v823_v2 = vrot.slane %v822_v50, 2  ;;  %v939_v3 = vsel %vm588_vm3, %v529_v51, -inf }
  0xb9   : > { %v946_v4 = vsel %vm588_vm3, %v530_v52, -inf  ;;  %v1590_v5 = vmax.f32 %v712_v37, %v713_v53  ;;  %v830_v6 = vrot.slane %v829_v54, 2  ;;  %v837_v7 = vrot.slane %v836_v55, 2 }
  0xba   : > { %v927_v8 = vmax.f32 %v925_v42, %v926_v56  ;;  %v934_v9 = vmax.f32 %v932_v47, %v933_v58  ;;  %v461_v10 = vsel %vm429_vm8, %v413_v43, %v445_v59  ;;  %v417_v11 = vadd.f32 %v1551_v17, %v398_v60 }
  0xbb   : > { %v402_v12 = vmul.f32 %v1546_v16, %v370_v0  ;;  %v1594_v13 = vmax.f32 %v719_v41, %v720_v62  ;;  %v1596_v14 = vmax.f32 %v726_v46, %v727_v63  ;;  %v940_v15 = vrot.slane %v939_v3, 4 }
  0xbc   : > { %v947_v18 = vrot.slane %v946_v4, 4  ;;  %v818_v20 = vrot.slane %v817_v1, 1  ;;  %v824_v21 = vmax.f32 %v822_v50, %v823_v2  ;;  %v495_v22 = vrot.slane %v461_v10, 2 }
  0xbd   : > { %v496_v23 = vrot.slane %v461_v10, 4  ;;  %v831_v24 = vmax.f32 %v829_v54, %v830_v6  ;;  %v838_v25 = vmax.f32 %v836_v55, %v837_v7  ;;  %v928_v26 = vrot.slane %v927_v8, 2 }
  0xbe   : > { %v497_v27 = vrot.slane %v461_v10, 6  ;;  %v935_v28 = vrot.slane %v934_v9, 2  ;;  %vm433_vm9 = vcmp.ge.f32.partialorder %v417_v11, 0.0  ;;  %v421_v29 = vadd.f32 %v1551_v17, %v402_v12 }
  0xbf   : > { %v1600_v30 = vmul.f32 %v1546_v16, %v380_v19  ;;  %v941_v31 = vmax.f32 %v939_v3, %v940_v15  ;;  %v948_v32 = vmax.f32 %v946_v4, %v947_v18  ;;  %v617_v34 = vsel %vm588_vm3, %v461_v10, -inf }
  0xc0   : > { %v624_v35 = vsel %vm588_vm3, %v495_v22, -inf  ;;  %v1604_v36 = vmax.f32 %v817_v1, %v818_v20  ;;  %v825_v37 = vrot.slane %v824_v21, 1  ;;  %v631_v38 = vsel %vm588_vm3, %v496_v23, -inf }
  0xc1   : > { %v449_v39 = vmul.f32 0.1, %v417_v11  ;;  %v832_v40 = vrot.slane %v831_v24, 1  ;;  %v839_v41 = vrot.slane %v838_v25, 1  ;;  %v929_v42 = vmax.f32 %v927_v8, %v928_v26 }
  0xc2   : > { %v638_v43 = vsel %vm588_vm3, %v497_v27, -inf  ;;  %v936_v46 = vmax.f32 %v934_v9, %v935_v28  ;;  %v618_v47 = vrot.slane %v617_v34, 4  ;;  %v625_v48 = vrot.slane %v624_v35, 4 }
  0xc3   : > { %v465_v49 = vsel %vm433_vm9, %v417_v11, %v449_v39  ;;  %v942_v50 = vrot.slane %v941_v31, 2  ;;  %v632_v51 = vrot.slane %v631_v38, 4  ;;  %v949_v54 = vrot.slane %v948_v32, 2 }
  0xc4   : > { %v507_v52 = vrot.slane %v465_v49, 2  ;;  %v508_v53 = vrot.slane %v465_v49, 4  ;;  %v639_v55 = vrot.slane %v638_v43, 4  ;;  %v509_v56 = vrot.slane %v465_v49, 6 }
  0xc5   : > { %v729_v58 = vsel %vm588_vm3, %v465_v49, -inf  ;;  %v1610_v59 = vmax.f32 %v824_v21, %v825_v37  ;;  %v1612_v60 = vmax.f32 %v831_v24, %v832_v40  ;;  %v619_v0 = vmax.f32 %v617_v34, %v618_v47  ;;  %v353_v47 = vpop.f32.mrf.mxu0 }
  0xc6   : > { %v730_v62 = vrot.slane %v729_v58, 4  ;;  %v736_v63 = vsel %vm588_vm3, %v507_v52, -inf  ;;  %v626_v1 = vmax.f32 %v624_v35, %v625_v48  ;;  %v743_v2 = vsel %vm588_vm3, %v508_v53, -inf }
  0xc7   : > { %v453_v3 = vmul.f32 0.1, %v421_v29  ;;  %v633_v4 = vmax.f32 %v631_v38, %v632_v51  ;;  %v737_v6 = vrot.slane %v736_v63, 4  ;;  %v744_v7 = vrot.slane %v743_v2, 4 }
  0xc8   : > { %vm437_vm10 = vcmp.ge.f32.partialorder %v421_v29, 0.0  ;;  %v930_v8 = vrot.slane %v929_v42, 1  ;;  %v937_v9 = vrot.slane %v936_v46, 1  ;;  %v640_v10 = vmax.f32 %v638_v43, %v639_v55 }
  0xc9   : > { %v750_v11 = vsel %vm588_vm3, %v509_v56, -inf  ;;  %v1617_v12 = vmax.f32 %v838_v25, %v839_v41  ;;  %v943_v15 = vmax.f32 %v941_v31, %v942_v50  ;;  %v950_v18 = vmax.f32 %v948_v32, %v949_v54 }
  0xca   : > { %v731_v19 = vmax.f32 %v729_v58, %v730_v62  ;;  %v620_v20 = vrot.slane %v619_v0, 2  ;;  %v627_v21 = vrot.slane %v626_v1, 2  ;;  %v751_v22 = vrot.slane %v750_v11, 4 }
  0xcb   : > { %v469_v23 = vsel %vm437_vm10, %v421_v29, %v453_v3  ;;  %v634_v24 = vrot.slane %v633_v4, 2  ;;  %v738_v26 = vmax.f32 %v736_v63, %v737_v6  ;;  %v745_v27 = vmax.f32 %v743_v2, %v744_v7 }
  0xcc   : > { %v519_v28 = vrot.slane %v469_v23, 2  ;;  %v1619_v34 = vmax.f32 %v929_v42, %v930_v8  ;;  %v1621_v35 = vmax.f32 %v936_v46, %v937_v9  ;;  %v641_v37 = vrot.slane %v640_v10, 2 }
  0xcd   : > { %v752_v38 = vmax.f32 %v750_v11, %v751_v22  ;;  %v944_v39 = vrot.slane %v943_v15, 1  ;;  %v732_v25 = vrot.slane %v731_v19, 2  ;;  %v520_v40 = vrot.slane %v469_v23, 4 }
  0xce   : > { %v841_v31 = vsel %vm588_vm3, %v469_v23, -inf  ;;  %v621_v32 = vmax.f32 %v619_v0, %v620_v20  ;;  %v521_v41 = vrot.slane %v469_v23, 6  ;;  %v848_v43 = vsel %vm588_vm3, %v519_v28, -inf }
  0xcf   : > { %v425_v29 = vadd.f32 %v1551_v17, %v1600_v30  ;;  %v628_v48 = vmax.f32 %v626_v1, %v627_v21  ;;  %v635_v42 = vmax.f32 %v633_v4, %v634_v24  ;;  %v739_v49 = vrot.slane %v738_v26, 2 }
  0xd0   : > { %v746_v46 = vrot.slane %v745_v27, 2  ;;  %v951_v50 = vrot.slane %v950_v18, 1  ;;  %v642_v51 = vmax.f32 %v640_v10, %v641_v37  ;;  %v753_v52 = vrot.slane %v752_v38, 2 }
  0xd1   : > { %v842_v53 = vrot.slane %v841_v31, 4  ;;  %v733_v54 = vmax.f32 %v731_v19, %v732_v25  ;;  %v849_v55 = vrot.slane %v848_v43, 4  ;;  %v855_v56 = vsel %vm588_vm3, %v520_v40, -inf }
  0xd2   : > { %v395_v58 = vmul.f32 %v1546_v16, %v353_v47  ;;  %v622_v62 = vrot.slane %v621_v32, 1  ;;  %v862_v63 = vsel %vm588_vm3, %v521_v41, -inf  ;;  %vm441_vm11 = vcmp.ge.f32.partialorder %v425_v29, 0.0 }
  0xd3   : > { %v457_v30 = vmul.f32 0.1, %v425_v29  ;;  %v629_v0 = vrot.slane %v628_v48, 1  ;;  %v636_v1 = vrot.slane %v635_v42, 1  ;;  %v740_v2 = vmax.f32 %v738_v26, %v739_v49 }
  0xd4   : > { %v747_v3 = vmax.f32 %v745_v27, %v746_v46  ;;  %v643_v4 = vrot.slane %v642_v51, 1  ;;  %v754_v6 = vmax.f32 %v752_v38, %v753_v52  ;;  %v843_v7 = vmax.f32 %v841_v31, %v842_v53 }
  0xd5   : > { %v856_v8 = vrot.slane %v855_v56, 4  ;;  %v734_v9 = vrot.slane %v733_v54, 1  ;;  %v850_v10 = vmax.f32 %v848_v43, %v849_v55  ;;  %v863_v11 = vrot.slane %v862_v63, 4 }
  0xd6   : > { %v473_v19 = vsel %vm441_vm11, %v425_v29, %v457_v30  ;;  %v1630_v20 = vmax.f32 %v943_v15, %v944_v39  ;;  %v1632_v21 = vmax.f32 %v950_v18, %v951_v50  ;;  %v1634_v22 = vmax.f32 %v621_v32, %v622_v62 }
  0xd7   : > { %v414_v23 = vadd.f32 %v1551_v17, %v395_v58  ;;  %v1637_v24 = vmax.f32 %v628_v48, %v629_v0  ;;  %v1639_v26 = vmax.f32 %v635_v42, %v636_v1  ;;  %v741_v27 = vrot.slane %v740_v2, 1 }
  0xd8   : > { %1867 = vst [vmem:[#allocation2_spill] sm:$0xff] %v1630_v20  ;;  %v748_v28 = vrot.slane %v747_v3, 1  ;;  %v755_v37 = vrot.slane %v754_v6, 1  ;;  %v844_v38 = vrot.slane %v843_v7, 2  ;;  %v857_v25 = vmax.f32 %v855_v56, %v856_v8 }
  0xd9   : > { %1868 = vst [vmem:[#allocation3_spill] sm:$0xff] %v1632_v21  ;;  %v953_v40 = vsel %vm588_vm3, %v473_v19, -inf  ;;  %v1642_v31 = vmax.f32 %v642_v51, %v643_v4  ;;  %v1644_v15 = vmax.f32 %v733_v54, %v734_v9  ;;  %v851_v18 = vrot.slane %v850_v10, 2 }
  0xda   : > { %v864_v39 = vmax.f32 %v862_v63, %v863_v11  ;;  %v531_v32 = vrot.slane %v473_v19, 2  ;;  %v532_v41 = vrot.slane %v473_v19, 4  ;;  %vm430_vm12 = vcmp.ge.f32.partialorder %v414_v23, 0.0 }
  0xdb   : > { %v446_v43 = vmul.f32 0.1, %v414_v23  ;;  %v1646_v29 = vmax.f32 %v740_v2, %v741_v27  ;;  %v1648_v47 = vmax.f32 %v747_v3, %v748_v28  ;;  %v533_v48 = vrot.slane %v473_v19, 6  ;;  %v363_v19 = vpop.f32.mrf.mxu1 }
  0xdc   : > { %v954_v42 = vrot.slane %v953_v40, 4  ;;  %v1650_v49 = vmax.f32 %v754_v6, %v755_v37  ;;  %v845_v46 = vmax.f32 %v843_v7, %v844_v38  ;;  %v858_v50 = vrot.slane %v857_v25, 2  ;;  %v373_v38 = vpop.f32.mrf.mxu2 }
  0xdd   : > { %v462_v51 = vsel %vm430_vm12, %v414_v23, %v446_v43  ;;  %v852_v52 = vmax.f32 %v850_v10, %v851_v18  ;;  %v865_v53 = vrot.slane %v864_v39, 2  ;;  %v960_v56 = vsel %vm588_vm3, %v531_v32, -inf }
  0xde   : > { %v498_v54 = vrot.slane %v462_v51, 2  ;;  %v499_v55 = vrot.slane %v462_v51, 4  ;;  %v967_v58 = vsel %vm588_vm3, %v532_v41, -inf  ;;  %v500_v62 = vrot.slane %v462_v51, 6 }
  0xdf   : > { %v645_v63 = vsel %vm588_vm3, %v462_v51, -inf  ;;  %v955_v30 = vmax.f32 %v953_v40, %v954_v42  ;;  %v974_v0 = vsel %vm588_vm3, %v533_v48, -inf  ;;  %v846_v3 = vrot.slane %v845_v46, 1 }
  0xe0   : > { %v646_v1 = vrot.slane %v645_v63, 4  ;;  %v652_v2 = vsel %vm588_vm3, %v498_v54, -inf  ;;  %v859_v4 = vmax.f32 %v857_v25, %v858_v50  ;;  %v659_v7 = vsel %vm588_vm3, %v499_v55, -inf }
  0xe1   : > { %v653_v6 = vrot.slane %v652_v2, 4  ;;  %v866_v8 = vmax.f32 %v864_v39, %v865_v53  ;;  %v961_v9 = vrot.slane %v960_v56, 4  ;;  %v660_v11 = vrot.slane %v659_v7, 4 }
  0xe2   : > { %v647_v10 = vmax.f32 %v645_v63, %v646_v1  ;;  %v968_v23 = vrot.slane %v967_v58, 4  ;;  %v975_v27 = vrot.slane %v974_v0, 4  ;;  %v666_v37 = vsel %vm588_vm3, %v500_v62, -inf }
  0xe3   : > { %v654_v28 = vmax.f32 %v652_v2, %v653_v6  ;;  %v956_v40 = vrot.slane %v955_v30, 2  ;;  %v661_v32 = vmax.f32 %v659_v7, %v660_v11  ;;  %v667_v41 = vrot.slane %v666_v37, 4 }
  0xe4   : > { %v648_v18 = vrot.slane %v647_v10, 2  ;;  %v853_v43 = vrot.slane %v852_v52, 1  ;;  %v860_v25 = vrot.slane %v859_v4, 1  ;;  %v399_v42 = vmul.f32 %v1546_v16, %v363_v19 }
  0xe5   : > { %v655_v48 = vrot.slane %v654_v28, 2  ;;  %v867_v39 = vrot.slane %v866_v8, 1  ;;  %v662_v50 = vrot.slane %v661_v32, 2  ;;  %v668_v51 = vmax.f32 %v666_v37, %v667_v41 }
  0xe6   : > { %v403_v53 = vmul.f32 %v1546_v16, %v373_v38  ;;  %v962_v54 = vmax.f32 %v960_v56, %v961_v9  ;;  %v969_v55 = vmax.f32 %v967_v58, %v968_v23  ;;  %v418_v62 = vadd.f32 %v1551_v17, %v399_v42 }
  0xe7   : > { %v656_v63 = vmax.f32 %v654_v28, %v655_v48  ;;  %v1662_v1 = vmax.f32 %v845_v46, %v846_v3  ;;  %v1664_v2 = vmax.f32 %v955_v30, %v956_v40  ;;  %v976_v6 = vmax.f32 %v974_v0, %v975_v27  ;;  %v383_v40 = vpop.f32.mrf.mxu3 }
  0xe8   : > { %v649_v7 = vmax.f32 %v647_v10, %v648_v18  ;;  %v1666_v11 = vmax.f32 %v852_v52, %v853_v43  ;;  %v663_v21 = vmax.f32 %v661_v32, %v662_v50  ;;  %vm434_vm13 = vcmp.ge.f32.partialorder %v418_v62, 0.0 }
  0xe9   : > { %1869 = vst [vmem:[#allocation4_spill] sm:$0xff] %v1664_v2  ;;  %v450_v19 = vmul.f32 0.1, %v418_v62  ;;  %v1668_v20 = vmax.f32 %v859_v4, %v860_v25  ;;  %v1670_v37 = vmax.f32 %v866_v8, %v867_v39  ;;  %v669_v56 = vrot.slane %v668_v51, 2 }
  0xea   : > { %v422_v58 = vadd.f32 %v1551_v17, %v403_v53  ;;  %v963_v9 = vrot.slane %v962_v54, 2  ;;  %v970_v23 = vrot.slane %v969_v55, 2  ;;  %v657_v46 = vrot.slane %v656_v63, 1 }
  0xeb   : > { %v466_v3 = vsel %vm434_vm13, %v418_v62, %v450_v19  ;;  %v977_v0 = vrot.slane %v976_v6, 2  ;;  %v650_v10 = vrot.slane %v649_v7, 1  ;;  %v664_v27 = vrot.slane %v663_v21, 1 }
  0xec   : > { %v510_v52 = vrot.slane %v466_v3, 2  ;;  %v511_v28 = vrot.slane %v466_v3, 4  ;;  %v512_v38 = vrot.slane %v466_v3, 6  ;;  %v757_v4 = vsel %vm588_vm3, %v466_v3, -inf  ;;  %v355_v3 = vpop.f32.mrf.mxu0 }
  0xed   : > { %v670_v8 = vmax.f32 %v668_v51, %v669_v56  ;;  %v758_v18 = vrot.slane %v757_v4, 4  ;;  %vm438_vm14 = vcmp.ge.f32.partialorder %v422_v58, 0.0  ;;  %v454_v32 = vmul.f32 0.1, %v422_v58 }
  0xee   : > { %v658_v41 = vmax.f32 %v656_v63, %v657_v46  ;;  %v764_v43 = vsel %vm588_vm3, %v510_v52, -inf  ;;  %v771_v25 = vsel %vm588_vm3, %v511_v28, -inf  ;;  %v778_v48 = vsel %vm588_vm3, %v512_v38, -inf }
  0xef   : > { %v1678_v42 = vmax.f32 %v962_v54, %v963_v9  ;;  %v1680_v39 = vmax.f32 %v969_v55, %v970_v23  ;;  %v759_v50 = vmax.f32 %v757_v4, %v758_v18  ;;  %v407_v53 = vmul.f32 %v1546_v16, %v383_v40 }
  0xf0   : > { %v1683_v62 = vmax.f32 %v976_v6, %v977_v0  ;;  %v765_v51 = vrot.slane %v764_v43, 4  ;;  %v772_v19 = vrot.slane %v771_v25, 4  ;;  %v779_v56 = vrot.slane %v778_v48, 4 }
  0xf1   : > { %1870 = vst [vmem:[#allocation5_spill] sm:$0xff] %v1680_v39  ;;  %v651_v63 = vmax.f32 %v649_v7, %v650_v10  ;;  %v671_v46 = vrot.slane %v670_v8, 1  ;;  %v760_v52 = vrot.slane %v759_v50, 2  ;;  %v470_v28 = vsel %vm438_vm14, %v422_v58, %v454_v32 }
  0xf2   : > { %1871 = vst [vmem:[#allocation6_spill] sm:$0xff] %v1683_v62  ;;  %v665_v30 = vmax.f32 %v663_v21, %v664_v27  ;;  %v1038_v54 = vmax.f32 %v1578_v44, %v658_v41  ;;  %v766_v9 = vmax.f32 %v764_v43, %v765_v51  ;;  %v773_v55 = vmax.f32 %v771_v25, %v772_v19 }
  0xf3   : > { %v780_v23 = vmax.f32 %v778_v48, %v779_v56  ;;  %v522_v38 = vrot.slane %v470_v28, 2  ;;  %v426_v4 = vadd.f32 %v1551_v17, %v407_v53  ;;  %v1689_v6 = vmul.f32 %v1546_v16, %v355_v3 }
  0xf4   : > { %v761_v0 = vmax.f32 %v759_v50, %v760_v52  ;;  %v767_v40 = vrot.slane %v766_v9, 2  ;;  %v774_v18 = vrot.slane %v773_v55, 2  ;;  %v523_v7 = vrot.slane %v470_v28, 4 }
  0xf5   : > { %v672_v10 = vmax.f32 %v670_v8, %v671_v46  ;;  %v1037_v2 = vmax.f32 %v1574_v33, %v651_v63  ;;  %v524_v21 = vrot.slane %v470_v28, 6  ;;  %v869_v44 = vsel %vm588_vm3, %v470_v28, -inf }
  0xf6   : > { %v1039_v58 = vmax.f32 %v1580_v45, %v665_v30  ;;  %v1070_v27 = vpack.c.bf16 %v1038_v54, %v1038_v54  ;;  %v768_v32 = vmax.f32 %v766_v9, %v767_v40  ;;  %v870_v41 = vrot.slane %v869_v44, 4 }
  0xf7   : > { %v781_v43 = vrot.slane %v780_v23, 2  ;;  %v876_v16 = vsel %vm588_vm3, %v522_v38, -inf  ;;  %v883_v25 = vsel %vm588_vm3, %v523_v7, -inf  ;;  %v890_v48 = vsel %vm588_vm3, %v524_v21, -inf }
  0xf8   : > { %v762_v8 = vrot.slane %v761_v0, 1  ;;  %v769_v50 = vrot.slane %v768_v32, 1  ;;  %v775_v33 = vmax.f32 %v773_v55, %v774_v18  ;;  %v871_v53 = vmax.f32 %v869_v44, %v870_v41 }
  0xf9   : > { %v1069_v51 = vpack.c.bf16 %v1037_v2, %v1037_v2  ;;  %v877_v19 = vrot.slane %v876_v16, 4  ;;  %v884_v56 = vrot.slane %v883_v25, 4  ;;  %v891_v3 = vrot.slane %v890_v48, 4 }
  0xfa   : > { %v1040_v45 = vmax.f32 %v1583_v57, %v672_v10  ;;  %v1071_v30 = vpack.c.bf16 %v1039_v58, %v1039_v58  ;;  %v1134_v63 = vunpack.c.l.b16 %v1070_v27  ;;  %v872_v46 = vrot.slane %v871_v53, 2 }
  0xfb   : > { %v782_v52 = vmax.f32 %v780_v23, %v781_v43  ;;  %v878_v28 = vmax.f32 %v876_v16, %v877_v19  ;;  %v885_v54 = vmax.f32 %v883_v25, %v884_v56  ;;  %v892_v9 = vmax.f32 %v890_v48, %v891_v3 }
  0xfc   : > { %v763_v38 = vmax.f32 %v761_v0, %v762_v8  ;;  %v770_v40 = vmax.f32 %v768_v32, %v769_v50  ;;  %v776_v7 = vrot.slane %v775_v33, 1  ;;  %v873_v21 = vmax.f32 %v871_v53, %v872_v46 }
  0xfd   : > { %v879_v62 = vrot.slane %v878_v28, 2  ;;  %v886_v55 = vrot.slane %v885_v54, 2  ;;  %v893_v18 = vrot.slane %v892_v9, 2  ;;  %vm442_vm1 = vcmp.ge.f32.partialorder %v426_v4, 0.0 }
  0xfe   : > { %v1072_v2 = vpack.c.bf16 %v1040_v45, %v1040_v45  ;;  %v1133_v44 = vunpack.c.l.b16 %v1069_v51  ;;  %v1135_v41 = vunpack.c.l.b16 %v1071_v30  ;;  %v874_v39 = vrot.slane %v873_v21, 1 }
  0xff   : > { %v783_v57 = vrot.slane %v782_v52, 1  ;;  %v880_v10 = vmax.f32 %v878_v28, %v879_v62  ;;  %v887_v58 = vmax.f32 %v885_v54, %v886_v55  ;;  %v458_v27 = vmul.f32 0.1, %v426_v4 }
 0x100   : > { %v1166_v23 = vsel %vm1165_vm15, %v1134_v63, %v1133_v44  ;;  %v777_v43 = vmax.f32 %v775_v33, %v776_v7  ;;  %v1045_v0 = vmax.f32 %v1586_v61, %v763_v38  ;;  %v1046_v32 = vmax.f32 %v1590_v5, %v770_v40 }
 0x101   : > { %v881_v16 = vrot.slane %v880_v10, 1  ;;  %v888_v25 = vrot.slane %v887_v58, 1  ;;  %v894_v48 = vmax.f32 %v892_v9, %v893_v18  ;;  %v474_v8 = vsel %vm442_vm1, %v426_v4, %v458_v27 }
 0x102   : > { %v1136_v50 = vunpack.c.l.b16 %v1072_v2  ;;  %v875_v53 = vmax.f32 %v873_v21, %v874_v39  ;;  %v534_v51 = vrot.slane %v474_v8, 2  ;;  %v535_v19 = vrot.slane %v474_v8, 4 }
 0x103   : > { %v1168_v62 = vsel %vm1167_vm0, %v1135_v41, %v1166_v23  ;;  %v784_v56 = vmax.f32 %v782_v52, %v783_v57  ;;  %v882_v3 = vmax.f32 %v880_v10, %v881_v16  ;;  %v889_v45 = vmax.f32 %v887_v58, %v888_v25 }
 0x104   : > { %v1047_v33 = vmax.f32 %v1594_v13, %v777_v43  ;;  %v1077_v30 = vpack.c.bf16 %v1045_v0, %v1045_v0  ;;  %v536_v61 = vrot.slane %v474_v8, 6  ;;  %v981_v5 = vsel %vm588_vm3, %v474_v8, -inf }
 0x105   : > { %v1078_v63 = vpack.c.bf16 %v1046_v32, %v1046_v32  ;;  %v895_v46 = vrot.slane %v894_v48, 1  ;;  %v1054_v28 = vmax.f32 %v1610_v59, %v882_v3  ;;  %v982_v4 = vrot.slane %v981_v5, 4 }
 0x106   : > { %v1053_v39 = vmax.f32 %v1604_v36, %v875_v53  ;;  %v988_v54 = vsel %vm588_vm3, %v534_v51, -inf  ;;  %v995_v9 = vsel %vm588_vm3, %v535_v19, -inf  ;;  %v1002_v52 = vsel %vm588_vm3, %v536_v61, -inf }
 0x107   : > { %v1048_v38 = vmax.f32 %v1596_v14, %v784_v56  ;;  %v1055_v13 = vmax.f32 %v1612_v60, %v889_v45  ;;  %v1086_v40 = vpack.c.bf16 %v1054_v28, %v1054_v28  ;;  %v983_v7 = vmax.f32 %v981_v5, %v982_v4 }
 0x108   : > { %v989_v21 = vrot.slane %v988_v54, 4  ;;  %v996_v55 = vrot.slane %v995_v9, 4  ;;  %v1003_v18 = vrot.slane %v1002_v52, 4  ;;  %v415_v59 = vadd.f32 %v1551_v17, %v1689_v6 }
 0x109   : > { %v1079_v2 = vpack.c.bf16 %v1047_v33, %v1047_v33  ;;  %v1142_v36 = vunpack.c.l.b16 %v1078_v63  ;;  %v896_v44 = vmax.f32 %v894_v48, %v895_v46  ;;  %v984_v41 = vrot.slane %v983_v7, 2 }
 0x10a   : > { %v1085_v57 = vpack.c.bf16 %v1053_v39, %v1053_v39  ;;  %v990_v10 = vmax.f32 %v988_v54, %v989_v21  ;;  %v997_v58 = vmax.f32 %v995_v9, %v996_v55  ;;  %vm431_vm4 = vcmp.ge.f32.partialorder %v415_v59, 0.0 }
 0x10b   : > { %v1715_v14 = vsel %vm1169_vm2, %v1136_v50, %v1168_v62  ;;  %v1141_v60 = vunpack.c.l.b16 %v1077_v30  ;;  %v1004_v27 = vmax.f32 %v1002_v52, %v1003_v18  ;;  %v447_v23 = vmul.f32 0.1, %v415_v59 }
 0x10c   : > { %v1080_v43 = vpack.c.bf16 %v1048_v38, %v1048_v38  ;;  %v1087_v0 = vpack.c.bf16 %v1055_v13, %v1055_v13  ;;  %v1150_v32 = vunpack.c.l.b16 %v1086_v40  ;;  %v985_v16 = vmax.f32 %v983_v7, %v984_v41 }
 0x10d   : > { %v1143_v25 = vunpack.c.l.b16 %v1079_v2  ;;  %v1179_v17 = vsel %vm1165_vm15, %v1142_v36, %v1141_v60  ;;  %v991_v6 = vrot.slane %v990_v10, 2  ;;  %v463_v48 = vsel %vm431_vm4, %v415_v59, %v447_v23 }
 0x10e   : > { %v1056_v8 = vmax.f32 %v1617_v12, %v896_v44  ;;  %v1149_v53 = vunpack.c.l.b16 %v1085_v57  ;;  %v998_v51 = vrot.slane %v997_v58, 2  ;;  %v501_v19 = vrot.slane %v463_v48, 2 }
 0x10f   : > { %v1005_v56 = vrot.slane %v1004_v27, 2  ;;  %v502_v50 = vrot.slane %v463_v48, 4  ;;  %v503_v62 = vrot.slane %v463_v48, 6  ;;  %v673_v3 = vsel %vm588_vm3, %v463_v48, -inf }
 0x110   : > { %v1151_v45 = vunpack.c.l.b16 %v1087_v0  ;;  %v1186_v33 = vsel %vm1165_vm15, %v1150_v32, %v1149_v53  ;;  %v986_v30 = vrot.slane %v985_v16, 1  ;;  %v674_v61 = vrot.slane %v673_v3, 4  ;;  %v375_v0 = vpop.f32.mrf.mxu2 }
 0x111   : > { %v992_v5 = vmax.f32 %v990_v10, %v991_v6  ;;  %v680_v63 = vsel %vm588_vm3, %v501_v19, -inf  ;;  %v687_v46 = vsel %vm588_vm3, %v502_v50, -inf  ;;  %v694_v12 = vsel %vm588_vm3, %v503_v62, -inf  ;;  %v385_v50 = vpop.f32.mrf.mxu3 }
 0x112   : > { %v1180_v28 = vsel %vm1167_vm0, %v1143_v25, %v1179_v17  ;;  %v1088_v4 = vpack.c.bf16 %v1056_v8, %v1056_v8  ;;  %v999_v39 = vmax.f32 %v997_v58, %v998_v51  ;;  %v675_v54 = vmax.f32 %v673_v3, %v674_v61  ;;  %v1419_v51 = vld [vmem:[%s1860_s2] ss:$0 sm:$0xff] }
 0x113   : > { %v1006_v9 = vmax.f32 %v1004_v27, %v1005_v56  ;;  %v681_v52 = vrot.slane %v680_v63, 4  ;;  %v688_v38 = vrot.slane %v687_v46, 4  ;;  %v695_v13 = vrot.slane %v694_v12, 4  ;;  %v1420_v61 = vld [vmem:[%s1861_s3] ss:$0 sm:$0xff] }
 0x114   : > { %v1144_v40 = vunpack.c.l.b16 %v1080_v43  ;;  %v1187_v7 = vsel %vm1167_vm0, %v1151_v45, %v1186_v33  ;;  %v987_v21 = vmax.f32 %v985_v16, %v986_v30  ;;  %v676_v55 = vrot.slane %v675_v54, 2  ;;  %v365_v43 = vpop.f32.mrf.mxu1 }
 0x115   : > { %v993_v18 = vrot.slane %v992_v5, 1  ;;  %v682_v59 = vmax.f32 %v680_v63, %v681_v52  ;;  %v689_v2 = vmax.f32 %v687_v46, %v688_v38  ;;  %v696_v36 = vmax.f32 %v694_v12, %v695_v13 }
 0x116   : > { %v1727_v44 = vsel %vm1169_vm2, %v1144_v40, %v1180_v28  ;;  %v1152_v41 = vunpack.c.l.b16 %v1088_v4  ;;  %v1000_v57 = vrot.slane %v999_v39, 1  ;;  %v677_v10 = vmax.f32 %v675_v54, %v676_v55 }
 0x117   : > { %v1007_v58 = vrot.slane %v1006_v9, 1  ;;  %v683_v60 = vrot.slane %v682_v59, 2  ;;  %v690_v27 = vrot.slane %v689_v2, 2  ;;  %v697_v23 = vrot.slane %v696_v36, 2 }
 0x118   : > { %v1732_v32 = vsel %vm1169_vm2, %v1152_v41, %v1187_v7  ;;  %v1735_v16 = vmax.f32 %v1619_v34, %v987_v21  ;;  %v678_v25 = vrot.slane %v677_v10, 1  ;;  %v1737_v17 = vmax.f32 %v992_v5, %v993_v18 }
 0x119   : > { %v684_v6 = vmax.f32 %v682_v59, %v683_v60  ;;  %v691_v48 = vmax.f32 %v689_v2, %v690_v27  ;;  %v698_v8 = vmax.f32 %v696_v36, %v697_v23  ;;  %v1745_v53 = vmax.f32 %v999_v39, %v1000_v57 }
 0x11a   : > { %v679_v34 = vmax.f32 %v677_v10, %v678_v25  ;;  %vm1173_vm6 = vcmask 1045509   ;;  %v400_v19 = vmul.f32 %v1419_v51, %v365_v43  ;;  %v404_v56 = vmul.f32 %v1419_v51, %v375_v0 }
 0x11b   : > { %v1755_v62 = vmax.f32 %v1006_v9, %v1007_v58  ;;  %v685_v3 = vrot.slane %v684_v6, 1  ;;  %v692_v45 = vrot.slane %v691_v48, 1  ;;  %v699_v33 = vrot.slane %v698_v8, 1 }
 0x11c   : > { %v1041_v30 = vmax.f32 %v1634_v22, %v679_v34  ;;  %vm1175_vm7 = vcmask 1046534   ;;  %v419_v5 = vadd.f32 %v1420_v61, %v400_v19  ;;  %v423_v63 = vadd.f32 %v1420_v61, %v404_v56 }
 0x11d   : > { %v686_v46 = vmax.f32 %v684_v6, %v685_v3  ;;  %v693_v12 = vmax.f32 %v691_v48, %v692_v45  ;;  %v700_v28 = vmax.f32 %v698_v8, %v699_v33  ;;  %v408_v4 = vmul.f32 %v1419_v51, %v385_v50 }
 0x11e   : > { %v1073_v39 = vpack.c.bf16 %v1041_v30, %v1041_v30  ;;  %vm1177_vm8 = vcmask 1047559   ;;  %vm435_vm9 = vcmp.ge.f32.partialorder %v419_v5, 0.0  ;;  %v451_v54 = vmul.f32 0.1, %v419_v5 }
 0x11f   : > { %v1042_v22 = vmax.f32 %v1637_v24, %v686_v46  ;;  %v1043_v9 = vmax.f32 %v1639_v26, %v693_v12  ;;  %v1044_v52 = vmax.f32 %v1642_v31, %v700_v28  ;;  %vm439_vm10 = vcmp.ge.f32.partialorder %v423_v63, 0.0 }
 0x120   : > { %v1137_v38 = vunpack.c.l.b16 %v1073_v39  ;;  %v467_v13 = vsel %vm435_vm9, %v419_v5, %v451_v54  ;;  %v455_v40 = vmul.f32 0.1, %v423_v63  ;;  %v1769_v7 = vadd.f32 %v1420_v61, %v408_v4 }
 0x121   : > { %v1074_v21 = vpack.c.bf16 %v1042_v22, %v1042_v22  ;;  %v1075_v55 = vpack.c.bf16 %v1043_v9, %v1043_v9  ;;  %v1076_v18 = vpack.c.bf16 %v1044_v52, %v1044_v52  ;;  %v513_v59 = vrot.slane %v467_v13, 2 }
 0x122   : > { %v1172_v2 = vsel %vm1171_vm5, %v1137_v38, %v1715_v14  ;;  %v514_v36 = vrot.slane %v467_v13, 4  ;;  %v515_v24 = vrot.slane %v467_v13, 6  ;;  %v785_v26 = vsel %vm588_vm3, %v467_v13, -inf }
 0x123   : > { %v1138_v41 = vunpack.c.l.b16 %v1074_v21  ;;  %v1139_v31 = vunpack.c.l.b16 %v1075_v55  ;;  %v1140_v57 = vunpack.c.l.b16 %v1076_v18  ;;  %v786_v10 = vrot.slane %v785_v26, 4 }
 0x124   : > { %v792_v58 = vsel %vm588_vm3, %v513_v59, -inf  ;;  %v799_v60 = vsel %vm588_vm3, %v514_v36, -inf  ;;  %v806_v27 = vsel %vm588_vm3, %v515_v24, -inf  ;;  %v471_v23 = vsel %vm439_vm10, %v423_v63, %v455_v40 }
 0x125   : > { %v1174_v43 = vsel %vm1173_vm6, %v1138_v41, %v1172_v2  ;;  %v787_v14 = vmax.f32 %v785_v26, %v786_v10  ;;  %v793_v0 = vrot.slane %v792_v58, 4  ;;  %v800_v25 = vrot.slane %v799_v60, 4 }
 0x126   : > { %v1176_v6 = vsel %vm1175_vm7, %v1139_v31, %v1174_v43  ;;  %v807_v48 = vrot.slane %v806_v27, 4  ;;  %v525_v8 = vrot.slane %v471_v23, 2  ;;  %v526_v34 = vrot.slane %v471_v23, 4 }
 0x127   : > { %v1178_v51 = vsel %vm1177_vm8, %v1140_v57, %v1176_v6  ;;  %v788_v19 = vrot.slane %v787_v14, 2  ;;  %v794_v56 = vmax.f32 %v792_v58, %v793_v0  ;;  %v801_v50 = vmax.f32 %v799_v60, %v800_v25 }
 0x128   : > { %v1200_v3 = vpack.c.b16 %v1178_v51, %v1178_v51  ;;  %v808_v45 = vmax.f32 %v806_v27, %v807_v48  ;;  %v527_v33 = vrot.slane %v471_v23, 6  ;;  %v897_v30 = vsel %vm588_vm3, %v471_v23, -inf }
 0x129   : > { %v789_v61 = vmax.f32 %v787_v14, %v788_v19  ;;  %v795_v5 = vrot.slane %v794_v56, 2  ;;  %v802_v63 = vrot.slane %v801_v50, 2  ;;  %v898_v46 = vrot.slane %v897_v30, 4 }
 0x12a   : > { %1208 = vst [vmem:[%s1783_s28] sm:$0xf] %v1200_v3  ;;  %v809_v12 = vrot.slane %v808_v45, 2  ;;  %v904_v28 = vsel %vm588_vm3, %v525_v8, -inf  ;;  %v911_v4 = vsel %vm588_vm3, %v526_v34, -inf  ;;  %v918_v39 = vsel %vm588_vm3, %v527_v33, -inf }
 0x12b   : > { %v790_v54 = vrot.slane %v789_v61, 1  ;;  %v796_v22 = vmax.f32 %v794_v56, %v795_v5  ;;  %v803_v9 = vmax.f32 %v801_v50, %v802_v63  ;;  %v899_v52 = vmax.f32 %v897_v30, %v898_v46 }
 0x12c   : > { %v810_v38 = vmax.f32 %v808_v45, %v809_v12  ;;  %v905_v13 = vrot.slane %v904_v28, 4  ;;  %v912_v40 = vrot.slane %v911_v4, 4  ;;  %v919_v21 = vrot.slane %v918_v39, 4 }
 0x12d   : > { %v791_v55 = vmax.f32 %v789_v61, %v790_v54  ;;  %v797_v18 = vrot.slane %v796_v22, 1  ;;  %v804_v59 = vrot.slane %v803_v9, 1  ;;  %v900_v2 = vrot.slane %v899_v52, 2 }
 0x12e   : > { %v811_v36 = vrot.slane %v810_v38, 1  ;;  %v906_v24 = vmax.f32 %v904_v28, %v905_v13  ;;  %v913_v26 = vmax.f32 %v911_v4, %v912_v40  ;;  %v920_v41 = vmax.f32 %v918_v39, %v919_v21 }
 0x12f   : > { %v798_v31 = vmax.f32 %v796_v22, %v797_v18  ;;  %v805_v57 = vmax.f32 %v803_v9, %v804_v59  ;;  %v1049_v10 = vmax.f32 %v1644_v15, %v791_v55  ;;  %v901_v58 = vmax.f32 %v899_v52, %v900_v2 }
 0x130   : > { %v812_v60 = vmax.f32 %v810_v38, %v811_v36  ;;  %v907_v27 = vrot.slane %v906_v24, 2  ;;  %v914_v23 = vrot.slane %v913_v26, 2  ;;  %v921_v43 = vrot.slane %v920_v41, 2 }
 0x131   : > { %v1050_v14 = vmax.f32 %v1646_v29, %v798_v31  ;;  %v1051_v0 = vmax.f32 %v1648_v47, %v805_v57  ;;  %v1081_v25 = vpack.c.bf16 %v1049_v10, %v1049_v10  ;;  %v902_v6 = vrot.slane %v901_v58, 1 }
 0x132   : > { %v1052_v48 = vmax.f32 %v1650_v49, %v812_v60  ;;  %v908_v8 = vmax.f32 %v906_v24, %v907_v27  ;;  %v915_v34 = vmax.f32 %v913_v26, %v914_v23  ;;  %v922_v51 = vmax.f32 %v920_v41, %v921_v43 }
 0x133   : > { %v1082_v19 = vpack.c.bf16 %v1050_v14, %v1050_v14  ;;  %v1083_v56 = vpack.c.bf16 %v1051_v0, %v1051_v0  ;;  %v1145_v50 = vunpack.c.l.b16 %v1081_v25  ;;  %v903_v15 = vmax.f32 %v901_v58, %v902_v6  ;;  %v1873_v58 = vld [vmem:[#allocation2_spill] sm:$0xff] }
 0x134   : > { %v1084_v3 = vpack.c.bf16 %v1052_v48, %v1052_v48  ;;  %v909_v45 = vrot.slane %v908_v8, 1  ;;  %v916_v33 = vrot.slane %v915_v34, 1  ;;  %v923_v30 = vrot.slane %v922_v51, 1 }
 0x135   : > { %v1146_v61 = vunpack.c.l.b16 %v1082_v19  ;;  %v1147_v5 = vunpack.c.l.b16 %v1083_v56  ;;  %v1182_v29 = vsel %vm1171_vm5, %v1145_v50, %v1727_v44  ;;  %v1057_v47 = vmax.f32 %v1662_v1, %v903_v15 }
 0x136   : > { %v1148_v63 = vunpack.c.l.b16 %v1084_v3  ;;  %v910_v49 = vmax.f32 %v908_v8, %v909_v45  ;;  %v917_v46 = vmax.f32 %v915_v34, %v916_v33  ;;  %v924_v12 = vmax.f32 %v922_v51, %v923_v30  ;;  %v1874_v8 = vld [vmem:[#allocation5_spill] sm:$0xff]  ;;  %v1875_v3 = vld [vmem:[#allocation6_spill] sm:$0xff]  ;;  %v1876_v33 = vld [vmem:[#allocation3_spill] sm:$0xff] }
 0x137   : > { %v1183_v28 = vsel %vm1173_vm6, %v1146_v61, %v1182_v29  ;;  %v1089_v4 = vpack.c.bf16 %v1057_v47, %v1057_v47  ;;  %vm443_vm11 = vcmp.ge.f32.partialorder %v1769_v7, 0.0  ;;  %v459_v39 = vmul.f32 0.1, %v1769_v7 }
 0x138   : > { %v1184_v54 = vsel %vm1175_vm7, %v1147_v5, %v1183_v28  ;;  %v1058_v22 = vmax.f32 %v1666_v11, %v910_v49  ;;  %v1059_v44 = vmax.f32 %v1668_v20, %v917_v46  ;;  %v1060_v1 = vmax.f32 %v1670_v37, %v924_v12  ;;  %v1877_v46 = vld [vmem:[#allocation4_spill] sm:$0xff] }
 0x139   : > { %v1062_v9 = vmax.f32 %v1621_v35, %v1737_v17  ;;  %v1185_v52 = vsel %vm1177_vm8, %v1148_v63, %v1184_v54  ;;  %v1153_v38 = vunpack.c.l.b16 %v1089_v4  ;;  %v475_v13 = vsel %vm443_vm11, %v1769_v7, %v459_v39 }
 0x13a   : > { %v1201_v40 = vpack.c.b16 %v1185_v52, %v1185_v52  ;;  %v1090_v21 = vpack.c.bf16 %v1058_v22, %v1058_v22  ;;  %v1091_v55 = vpack.c.bf16 %v1059_v44, %v1059_v44  ;;  %v1092_v18 = vpack.c.bf16 %v1060_v1, %v1060_v1 }
 0x13b   : > { %v1189_v59 = vsel %vm1171_vm5, %v1153_v38, %v1732_v32  ;;  %v537_v11 = vrot.slane %v475_v13, 2  ;;  %v538_v2 = vrot.slane %v475_v13, 4  ;;  %v539_v20 = vrot.slane %v475_v13, 6 }
 0x13c   : > { %1209 = vst [vmem:[%s1783_s28 + $0x4] sm:$0xf] %v1201_v40  ;;  %v1154_v37 = vunpack.c.l.b16 %v1090_v21  ;;  %v1155_v36 = vunpack.c.l.b16 %v1091_v55  ;;  %v1156_v24 = vunpack.c.l.b16 %v1092_v18  ;;  %v1009_v35 = vsel %vm588_vm3, %v475_v13, -inf }
 0x13d   : > { %v1010_v17 = vrot.slane %v1009_v35, 4  ;;  %v1016_v26 = vsel %vm588_vm3, %v537_v11, -inf  ;;  %v1023_v7 = vsel %vm588_vm3, %v538_v2, -inf  ;;  %v1030_v41 = vsel %vm588_vm3, %v539_v20, -inf }
 0x13e   : > { %v1190_v31 = vsel %vm1173_vm6, %v1154_v37, %v1189_v59  ;;  %v1017_v57 = vrot.slane %v1016_v26, 4  ;;  %v1024_v32 = vrot.slane %v1023_v7, 4  ;;  %v1031_v10 = vrot.slane %v1030_v41, 4 }
 0x13f   : > { %v1063_v60 = vmax.f32 %v1873_v58, %v1745_v53  ;;  %v1094_v27 = vpack.c.bf16 %v1062_v9, %v1062_v9  ;;  %v1191_v23 = vsel %vm1175_vm7, %v1155_v36, %v1190_v31  ;;  %v1011_v43 = vmax.f32 %v1009_v35, %v1010_v17 }
 0x140   : > { %v1192_v14 = vsel %vm1177_vm8, %v1156_v24, %v1191_v23  ;;  %v1018_v0 = vmax.f32 %v1016_v26, %v1017_v57  ;;  %v1025_v25 = vmax.f32 %v1023_v7, %v1024_v32  ;;  %v1032_v6 = vmax.f32 %v1030_v41, %v1031_v10 }
 0x141   : > { %v965_v48 = vrot.slane %v1678_v42, 1  ;;  %v972_v34 = vrot.slane %v1874_v8, 1  ;;  %v1202_v51 = vpack.c.b16 %v1192_v14, %v1192_v14  ;;  %v1012_v19 = vrot.slane %v1011_v43, 2 }
 0x142   : > { %v1093_v56 = vpack.c.bf16 %v1735_v16, %v1735_v16  ;;  %v1019_v53 = vrot.slane %v1018_v0, 2  ;;  %v1026_v50 = vrot.slane %v1025_v25, 2  ;;  %v1033_v15 = vrot.slane %v1032_v6, 2 }
 0x143   : > { %v979_v45 = vrot.slane %v1875_v3, 1  ;;  %v1064_v30 = vmax.f32 %v1876_v33, %v1755_v62  ;;  %v1095_v61 = vpack.c.bf16 %v1063_v60, %v1063_v60  ;;  %1210 = vst [vmem:[%s1783_s28 + $0x8] sm:$0xf] %v1202_v51  ;;  %v1013_v5 = vmax.f32 %v1011_v43, %v1012_v19 }
 0x144   : > { %v1158_v29 = vunpack.c.l.b16 %v1094_v27  ;;  %v1020_v47 = vmax.f32 %v1018_v0, %v1019_v53  ;;  %v1027_v63 = vmax.f32 %v1025_v25, %v1026_v50  ;;  %v1034_v49 = vmax.f32 %v1032_v6, %v1033_v15 }
 0x145   : > { %v1878_v12 = vrot.slane %v1877_v46, 1  ;;  %v966_v16 = vmax.f32 %v1678_v42, %v965_v48  ;;  %v973_v4 = vmax.f32 %v1874_v8, %v972_v34  ;;  %v1014_v39 = vrot.slane %v1013_v5, 1 }
 0x146   : > { %v1157_v54 = vunpack.c.l.b16 %v1093_v56  ;;  %v1021_v22 = vrot.slane %v1020_v47, 1  ;;  %v1028_v44 = vrot.slane %v1027_v63, 1  ;;  %v1035_v62 = vrot.slane %v1034_v49, 1 }
 0x147   : > { %v959_v28 = vmax.f32 %v1877_v46, %v1878_v12  ;;  %v980_v1 = vmax.f32 %v1875_v3, %v979_v45  ;;  %v1096_v9 = vpack.c.bf16 %v1064_v30, %v1064_v30  ;;  %v1159_v52 = vunpack.c.l.b16 %v1095_v61 }
 0x148   : > { %v1015_v38 = vmax.f32 %v1013_v5, %v1014_v39  ;;  %v1193_v13 = vsel %vm1165_vm15, %v1158_v29, %v1157_v54  ;;  %v1022_v40 = vmax.f32 %v1020_v47, %v1021_v22  ;;  %v1029_v21 = vmax.f32 %v1027_v63, %v1028_v44 }
 0x149   : > { %v1036_v55 = vmax.f32 %v1034_v49, %v1035_v62  ;;  %v1194_v2 = vsel %vm1167_vm0, %v1159_v52, %v1193_v13  ;;  %v1160_v37 = vunpack.c.l.b16 %v1096_v9 }
 0x14a   : > { %v1065_v18 = vmax.f32 %v959_v28, %v1015_v38  ;;  %v1066_v59 = vmax.f32 %v966_v16, %v1022_v40  ;;  %v1067_v42 = vmax.f32 %v973_v4, %v1029_v21 }
 0x14b   : > { %v1068_v11 = vmax.f32 %v980_v1, %v1036_v55  ;;  %v1195_v26 = vsel %vm1169_vm2, %v1160_v37, %v1194_v2 }
 0x14c   : > { %v1097_v20 = vpack.c.bf16 %v1065_v18, %v1065_v18  ;;  %v1098_v36 = vpack.c.bf16 %v1066_v59, %v1066_v59  ;;  %v1099_v24 = vpack.c.bf16 %v1067_v42, %v1067_v42 }
 0x14d   : > { %v1100_v35 = vpack.c.bf16 %v1068_v11, %v1068_v11 }
 0x14e   : > { %v1161_v17 = vunpack.c.l.b16 %v1097_v20  ;;  %v1162_v7 = vunpack.c.l.b16 %v1098_v36  ;;  %v1163_v41 = vunpack.c.l.b16 %v1099_v24 }
 0x14f   : > { %v1164_v57 = vunpack.c.l.b16 %v1100_v35 }
 0x150   : > { %v1196_v31 = vsel %vm1171_vm5, %v1161_v17, %v1195_v26 }
 0x151   : > { %v1197_v32 = vsel %vm1173_vm6, %v1162_v7, %v1196_v31 }
 0x152   : > { %v1198_v10 = vsel %vm1175_vm7, %v1163_v41, %v1197_v32 }
 0x153   : > { %v1199_v58 = vsel %vm1177_vm8, %v1164_v57, %v1198_v10 }
 0x154   : > { %v1203_v60 = vpack.c.b16 %v1199_v58, %v1199_v58 }
 0x156   : > { %1211 = vst [vmem:[%s1783_s28 + $0xc] sm:$0xf] %v1203_v60 }
 0x157 PF: > { %s14_s19 = sadd.s32 1, %s1459_s19   ;;  %s1879_s15 = smov %s1451_s17 }
 0x158   : > { %p11_p8 = scmp.ge.s32.totalorder %s14_s19, 6   ;;  %s1880_s16 = smov %s1455_s18 }
 0x159   : > { %s1881_s17 = smov %s1884_s20  ;;  %s1882_s18 = smov %s1888_s21 }
 0x15a   :  { %13 = sbr.rel (!%p11_p8) target bundleno = 3 (0x3), region = 66 }

// kernel: yolov3_forward.3
= control target key start
LH: loop header
LB: loop body
LE: loop exit
PB: predicated region body
PF: predicated region fallthrough
CT: control target
= control target key end

     0   :  { %s2840_s21 = smov 0   ;;  %s2842_s22 = smov 0   ;;  %s3694_s0 = inlined_call_operand.vmem [shape: bf16[2,10,10,128], index: 0, kind: input, shape index: {}]   ;;  %s3695_s1 = inlined_call_operand.vmem [shape: bf16[1152,128], index: 1, kind: input, shape index: {}]   ;;  %s3696_s2 = inlined_call_operand.vmem [shape: f32[1,128], index: 2, kind: input, shape index: {}]   ;;  %s3697_s3 = inlined_call_operand.vmem [shape: f32[1,128], index: 3, kind: input, shape index: {}]   ;;  %s3698_s4 = inlined_call_operand.vmem [shape: bf16[128,128], index: 4, kind: input, shape index: {}]   ;;  %s3699_s5 = inlined_call_operand.vmem [shape: f32[1,128], index: 5, kind: input, shape index: {}]   ;;  %s3700_s6 = inlined_call_operand.vmem [shape: f32[2,4,4,128], index: 6, kind: output, shape index: {}]  }
   0x1   :  { %s2844_s23 = smov 0  }
   0x2 LB: > { %s28_s24 = sadd.s32 1, %s2799_s22  ;;  %p2290_p0 = scmp.ge.s32.totalorder %s2803_s23, 1  ;;  %s2803_s23 = sphi %s2844_s23, %s16_s23   ;;  %s2799_s22 = sphi %s2842_s22, %s3702_s22   ;;  %s2795_s21 = sphi %s2840_s21, %s3701_s21  }
   0x3   : > { %p30_p1 = scmp.ge.s32.totalorder %s28_s24, 2  ;;  %p230_p2 = scmp.lt.s32.totalorder %s2803_s23, 3 }
   0x5   : > { %s3704_s24 = smov (%p30_p1, %s28_s24), 0  ;;  %p231_p3 = pnand %p2290_p0, %p230_p2 }
   0x6   : > { %p266_p4 = scmp.lt.s32.totalorder (!%p231_p3), %s2795_s21, 1 }
   0x7   : > { %234 = sbr.rel (%p231_p3) target bundleno = 522 (0x20a), region = 44 }
   0xc   : > { %v2672_v0 = vld [vmem:[%s3695_s1 + $0x38] sm:$0xff]  ;;  %v2671_v2 = vld [vmem:[%s3695_s1 + $0x30] sm:$0xff]  ;;  %s3706_s21 = smov (!%p266_p4, %s2795_s21), 1  ;;  %v2670_v5 = vld [vmem:[%s3695_s1 + $0x28] sm:$0xff]  ;;  %vm1801_vm1 = vcmask 1041408   ;;  %vm2110_vm9 = vcmask 1041409  }
   0xd   : > { %v2680_v1 = vld [vmem:[%s3695_s1 + $0x78] sm:$0xff]  ;;  %2745 = vmatpush.bf16.msra.mxu2 %v2672_v0  ;;  %v2679_v3 = vld [vmem:[%s3695_s1 + $0x70] sm:$0xff]  ;;  %1436 = vmatpush.bf16.msra.mxu0 %v2672_v0  ;;  %s2753_s11 = smul.u32 80, %s3706_s21  ;;  %v2678_v6 = vld [vmem:[%s3695_s1 + $0x68] sm:$0xff]  ;;  %vm2112_vm10 = vcmask 1042434   ;;  %vm2114_vm11 = vcmask 1043459  }
   0xe   : > { %1465 = vmatpush.bf16.msra.mxu1 %v2680_v1  ;;  %v2696_v4 = vld [vmem:[%s3695_s1 + $0xf8] sm:$0xff]  ;;  %v2695_v7 = vld [vmem:[%s3695_s1 + $0xf0] sm:$0xff]  ;;  %v2669_v14 = vld [vmem:[%s3695_s1 + $0x20] sm:$0xff]  ;;  %vm2116_vm12 = vcmask 1044484   ;;  %vm2118_vm13 = vcmask 1045509   ;;  %vm2120_vm14 = vcmask 1046534  }
   0xf   : > { %s2885_s18 = scalar_lea.vmem %s3694_s0, %s2753_s11  ;;  %1523 = vmatpush.bf16.msra.mxu3 %v2696_v4  ;;  %v2677_v15 = vld [vmem:[%s3695_s1 + $0x60] sm:$0xff]  ;;  %v2694_v18 = vld [vmem:[%s3695_s1 + $0xe8] sm:$0xff]  ;;  %v2668_v21 = vld [vmem:[%s3695_s1 + $0x18] sm:$0xff]  ;;  %vm2122_vm15 = vcmask 1047559  }
  0x10   : > { %v2891_v8 = vld [vmem:[%s2885_s18] sm:$0xf]  ;;  %v2894_v9 = vld [vmem:[%s2885_s18 + $0x8] sm:$0xf]  ;;  %v2897_v10 = vld [vmem:[%s2885_s18 + $0x4] sm:$0x1] }
  0x11   : > { %2746 = vmatpush.bf16.msra.mxu2 %v2671_v2  ;;  %1437 = vmatpush.bf16.msra.mxu0 %v2671_v2  ;;  %v2900_v11 = vld [vmem:[%s2885_s18 + $0xc] sm:$0x1]  ;;  %v372_v12 = vunpack.c.l.b16 %v2891_v8  ;;  %v374_v13 = vunpack.c.l.b16 %v2894_v9  ;;  %v373_v16 = vunpack.c.l.b16 %v2897_v10  ;;  %v2676_v22 = vld [vmem:[%s3695_s1 + $0x58] sm:$0xff]  ;;  %v2693_v27 = vld [vmem:[%s3695_s1 + $0xe0] sm:$0xff] }
  0x12   : > { %1466 = vmatpush.bf16.msra.mxu1 %v2679_v3  ;;  %v375_v17 = vunpack.c.l.b16 %v2900_v11  ;;  %v2667_v28 = vld [vmem:[%s3695_s1 + $0x10] sm:$0xff]  ;;  %v2945_v34 = vld [vmem:[%s2885_s18 + $0x18] sm:$0xf]  ;;  %v2948_v35 = vld [vmem:[%s2885_s18 + $0x1c] sm:$0x1] }
  0x13   : > { %1524 = vmatpush.bf16.msra.mxu3 %v2695_v7  ;;  %v388_v19 = vpack.c.b16 %v373_v16, %v372_v12  ;;  %v2936_v29 = vld [vmem:[%s2885_s18 + $0x10] sm:$0xf]  ;;  %v2939_v30 = vld [vmem:[%s2885_s18 + $0x14] sm:$0x1]  ;;  %v2692_v36 = vld [vmem:[%s3695_s1 + $0xd8] sm:$0xff]  ;;  %v378_v43 = vunpack.c.l.b16 %v2945_v34  ;;  %v379_v44 = vunpack.c.l.b16 %v2948_v35  ;;  %v932_v63 = vpack.c.b16 %v374_v13, %v372_v12 }
  0x14   : > { %v389_v20 = vpack.c.b16 %v375_v17, %v374_v13  ;;  %v2675_v33 = vld [vmem:[%s3695_s1 + $0x50] sm:$0xff]  ;;  %v376_v37 = vunpack.c.l.b16 %v2936_v29  ;;  %v377_v38 = vunpack.c.l.b16 %v2939_v30  ;;  %v2956_v39 = vld [vmem:[%s2885_s18 + $0x20] sm:$0xf]  ;;  %v2959_v40 = vld [vmem:[%s2885_s18 + $0x28] sm:$0xf] }
  0x15   : > { %2747 = vmatpush.bf16.msra.mxu2 %v2670_v5  ;;  %1438 = vmatpush.bf16.msra.mxu0 %v2670_v5  ;;  %v399_v23 = vshll.u32 %v388_v19, 16  ;;  %v397_v25 = vshrl.u32 %v388_v19, 16  ;;  %v2666_v45 = vld [vmem:[%s3695_s1 + $0x8] sm:$0xff]  ;;  %v2691_v47 = vld [vmem:[%s3695_s1 + $0xd0] sm:$0xff]  ;;  %v380_v48 = vunpack.c.l.b16 %v2956_v39  ;;  %v382_v49 = vunpack.c.l.b16 %v2959_v40  ;;  %v2665_v54 = vld [vmem:[%s3695_s1] sm:$0xff] }
  0x16   : > { %1467 = vmatpush.bf16.msra.mxu1 %v2678_v6  ;;  %v406_v24 = vshll.u32 %v389_v20, 16  ;;  %v404_v26 = vshrl.u32 %v389_v20, 16  ;;  %v2674_v46 = vld [vmem:[%s3695_s1 + $0x48] sm:$0xff]  ;;  %v390_v52 = vpack.c.b16 %v377_v38, %v376_v37  ;;  %v391_v53 = vpack.c.b16 %v379_v44, %v378_v43  ;;  %v2673_v55 = vld [vmem:[%s3695_s1 + $0x40] sm:$0xff]  ;;  %v2688_v56 = vld [vmem:[%s3695_s1 + $0xb8] sm:$0xff] }
  0x17   : > { %1525 = vmatpush.bf16.msra.mxu3 %v2694_v18  ;;  %v401_v31 = vrot.slane %v399_v23, 1  ;;  %v2704_v57 = vld [vmem:[%s3695_s1 + $0x138] sm:$0xff]  ;;  %v2690_v58 = vld [vmem:[%s3695_s1 + $0xc8] sm:$0xff]  ;;  %v950_v59 = vpack.c.b16 %v382_v49, %v380_v48  ;;  %v2295_v1 = vld [vmem:[%s2885_s18 + $0x10] sm:$0xf] }
  0x18   : > { %v408_v32 = vrot.slane %v406_v24, 1  ;;  %v413_v61 = vshll.u32 %v390_v52, 16  ;;  %v420_v62 = vshll.u32 %v391_v53, 16  ;;  %v2294_v0 = vld [vmem:[%s2885_s18 + $0x8] sm:$0xf]  ;;  %v2687_v3 = vld [vmem:[%s3695_s1 + $0xb0] sm:$0xff] }
  0x19   : > { %2748 = vmatpush.bf16.msra.mxu2 %v2669_v14  ;;  %1439 = vmatpush.bf16.msra.mxu0 %v2669_v14  ;;  %v402_v41 = vor.u32 %v401_v31, %v397_v25  ;;  %v3008_v2 = vld [vmem:[%s2885_s18 + $0x24] sm:$0x1]  ;;  %v2703_v4 = vld [vmem:[%s3695_s1 + $0x130] sm:$0xff]  ;;  %v411_v5 = vshrl.u32 %v390_v52, 16  ;;  %v418_v6 = vshrl.u32 %v391_v53, 16  ;;  %v2712_v8 = vld [vmem:[%s3695_s1 + $0x178] sm:$0xff]  ;;  %v500_v14 = vunpack.c.l.b16 %v2294_v0 }
  0x1a   : > { %1468 = vmatpush.bf16.msra.mxu1 %v2677_v15  ;;  %v409_v42 = vor.u32 %v408_v32, %v404_v26  ;;  %v2689_v7 = vld [vmem:[%s3695_s1 + $0xc0] sm:$0xff]  ;;  %v3023_v9 = vld [vmem:[%s2885_s18 + $0x2c] sm:$0x1]  ;;  %v415_v12 = vrot.slane %v413_v61, 1  ;;  %v422_v13 = vrot.slane %v420_v62, 1  ;;  %v502_v15 = vunpack.c.l.b16 %v2295_v1  ;;  %v2728_v18 = vld [vmem:[%s3695_s1 + $0x1f8] sm:$0xff] }
  0x1b   : > { %1526 = vmatpush.bf16.msra.mxu3 %v2693_v27  ;;  %v740_v50 = vunpack.c.l.b16 %v402_v41  ;;  %v2711_v19 = vld [vmem:[%s3695_s1 + $0x170] sm:$0xff]  ;;  %v381_v20 = vunpack.c.l.b16 %v3008_v2  ;;  %v383_v25 = vunpack.c.l.b16 %v3023_v9  ;;  %v2702_v26 = vld [vmem:[%s3695_s1 + $0x128] sm:$0xff]  ;;  %v2701_v39 = vld [vmem:[%s3695_s1 + $0x120] sm:$0xff]  ;;  %v941_v1 = vpack.c.b16 %v378_v43, %v376_v37 }
  0x1c   : > { %v746_v51 = vunpack.c.l.b16 %v409_v42  ;;  %v3039_v23 = vld [vmem:[%s2885_s18 + $0x14] sm:$0x1]  ;;  %v935_v24 = vpack.c.b16 %v502_v15, %v500_v14  ;;  %v416_v27 = vor.u32 %v415_v12, %v411_v5  ;;  %v3049_v32 = vld [vmem:[%s2885_s18 + $0x30] sm:$0xf]  ;;  %v2710_v42 = vld [vmem:[%s3695_s1 + $0x168] sm:$0xff] }
  0x1d   : > { %2749 = vmatpush.bf16.msra.mxu2 %v2668_v21  ;;  %1440 = vmatpush.bf16.msra.mxu0 %v2668_v21  ;;  %v2686_v21 = vld [vmem:[%s3695_s1 + $0xa8] sm:$0xff]  ;;  %v2727_v31 = vld [vmem:[%s3695_s1 + $0x1f0] sm:$0xff]  ;;  %v503_v41 = vunpack.c.l.b16 %v3039_v23  ;;  %v2296_v5 = vld [vmem:[%s2885_s18 + $0x18] sm:$0xf] }
  0x1e   : > { %1469 = vmatpush.bf16.msra.mxu1 %v2676_v22  ;;  %v933_v60 = vpack.c.b16 %v746_v51, %v740_v50  ;;  %v3036_v22 = vld [vmem:[%s2885_s18 + $0xc] sm:$0x1]  ;;  %v752_v51 = vunpack.c.l.b16 %v416_v27  ;;  %v3105_v0 = vld [vmem:[%s2885_s18 + $0x34] sm:$0x1]  ;;  %v2724_v35 = vld [vmem:[%s3695_s1 + $0x1d8] sm:$0xff] }
  0x1f   : > { %1527 = vmatpush.bf16.msra.mxu3 %v2692_v36  ;;  %v501_v36 = vunpack.c.l.b16 %v3036_v22  ;;  %v3085_v40 = vpack.c.b16 %v503_v41, %v502_v15  ;;  %v2699_v34 = vld [vmem:[%s3695_s1 + $0x110] sm:$0xff]  ;;  %v2708_v15 = vld [vmem:[%s3695_s1 + $0x158] sm:$0xff]  ;;  %v385_v11 = vunpack.c.l.b16 %v3105_v0 }
  0x20   : > { %v2707_v10 = vld [vmem:[%s3695_s1 + $0x150] sm:$0xff] }
  0x21   : > { %2750 = vmatpush.bf16.msra.mxu2 %v2667_v28  ;;  %1441 = vmatpush.bf16.msra.mxu0 %v2667_v28  ;;  %v423_v28 = vor.u32 %v422_v13, %v418_v6  ;;  %v3081_v53 = vpack.c.b16 %v501_v36, %v500_v14  ;;  %v2297_v6 = vld [vmem:[%s2885_s18 + $0x20] sm:$0xf]  ;;  %v532_v43 = vshrl.u32 %v3085_v40, 16 }
  0x22   : > { %1470 = vmatpush.bf16.msra.mxu1 %v2675_v33  ;;  %v3052_v33 = vld [vmem:[%s2885_s18 + $0x38] sm:$0xf] }
  0x23   : > { %1528 = vmatpush.bf16.msra.mxu3 %v2691_v47  ;;  %v3072_v47 = vpack.c.b16 %v383_v25, %v382_v49  ;;  %v386_v50 = vunpack.c.l.b16 %v3052_v33  ;;  %v758_v52 = vunpack.c.l.b16 %v423_v28  ;;  %v298_v49 = vld [vmem:[%s2885_s18] sm:$0xe]  ;;  %v525_v37 = vshrl.u32 %v3081_v53, 16  ;;  %v2720_v33 = vld [vmem:[%s3695_s1 + $0x1b8] sm:$0xff] }
  0x24   : > { %v460_v62 = vunpack.c.l.b16 %v298_v49  ;;  %v2725_v49 = vld [vmem:[%s3695_s1 + $0x1e0] sm:$0xff] }
  0x25   : > { %2751 = vmatpush.bf16.msra.mxu2 %v2666_v45  ;;  %1442 = vmatpush.bf16.msra.mxu0 %v2666_v45  ;;  %v3063_v45 = vpack.c.b16 %v381_v20, %v380_v48  ;;  %v384_v48 = vunpack.c.l.b16 %v3049_v32  ;;  %v942_v61 = vpack.c.b16 %v758_v52, %v752_v51  ;;  %v432_v13 = vshrl.u32 %v3072_v47, 16  ;;  %v2697_v32 = vld [vmem:[%s3695_s1 + $0x100] sm:$0xff] }
  0x26   : > { %1471 = vmatpush.bf16.msra.mxu1 %v2674_v46  ;;  %v2685_v46 = vld [vmem:[%s3695_s1 + $0xa0] sm:$0xff] }
  0x27   : > { %1529 = vmatpush.bf16.msra.mxu3 %v2690_v58  ;;  %v2700_v58 = vld [vmem:[%s3695_s1 + $0x118] sm:$0xff]  ;;  %v425_v29 = vshrl.u32 %v3063_v45, 16 }
  0x29   : > { %2752 = vmatpush.bf16.msra.mxu2 %v2665_v54  ;;  %1443 = vmatpush.bf16.msra.mxu0 %v2665_v54  ;;  %v299_v54 = vld [vmem:[%s2885_s18 + $0x8] sm:$0xe] }
  0x2a   : > { %1472 = vmatpush.bf16.msra.mxu1 %v2673_v55  ;;  %v2709_v55 = vld [vmem:[%s3695_s1 + $0x160] sm:$0xff] }
  0x2b   : > { %1530 = vmatpush.bf16.msra.mxu3 %v2689_v7  ;;  %v3116_v7 = vld [vmem:[%s2885_s18 + $0x3c] sm:$0x1] }
  0x2c   : > { %1454 = vmatmul.bf16.vlgmr.msra.gmra.mxu2 %v950_v59  ;;  %1444 = vmatmul.bf16.vlgmr.msra.gmra.mxu0 %v932_v63  ;;  %v434_v59 = vshll.u32 %v3072_v47, 16  ;;  %v461_v63 = vunpack.c.l.b16 %v299_v54 }
  0x2d   : > { %1494 = vmatpush.bf16.msrb.mxu2 %v2688_v56  ;;  %1552 = vmatpush.bf16.msrb.mxu0 %v2704_v57  ;;  %v2684_v56 = vld [vmem:[%s3695_s1 + $0x98] sm:$0xff]  ;;  %v427_v57 = vshll.u32 %v3063_v45, 16 }
  0x2e   : > { %1473 = vmatmul.bf16.vlgmr.msra.gmra.mxu1 %v933_v60  ;;  %1531 = vmatmul.bf16.vlgmr.msra.gmra.mxu3 %v935_v24  ;;  %v959_v60 = vpack.c.b16 %v386_v50, %v384_v48  ;;  %v436_v14 = vrot.slane %v434_v59, 1  ;;  %v504_v24 = vunpack.c.l.b16 %v2296_v5  ;;  %v2681_v59 = vld [vmem:[%s3695_s1 + $0x80] sm:$0xff] }
  0x2f   : > { %1581 = vmatpush.bf16.msrb.mxu1 %v2712_v8  ;;  %1639 = vmatpush.bf16.msrb.mxu3 %v2728_v18  ;;  %v2683_v8 = vld [vmem:[%s3695_s1 + $0x90] sm:$0xff]  ;;  %v429_v12 = vrot.slane %v427_v57, 1  ;;  %v468_v18 = vpack.c.b16 %v373_v16, %v460_v62  ;;  %v387_v16 = vunpack.c.l.b16 %v3116_v7  ;;  %v3167_v57 = vpack.c.b16 %v385_v11, %v384_v48 }
  0x30   : > { %v437_v51 = vor.u32 %v436_v14, %v432_v13 }
  0x31   : > { %1495 = vmatpush.bf16.msrb.mxu2 %v2687_v3  ;;  %1553 = vmatpush.bf16.msrb.mxu0 %v2703_v4  ;;  %v527_v3 = vshll.u32 %v3081_v53, 16  ;;  %v534_v4 = vshll.u32 %v3085_v40, 16  ;;  %v430_v47 = vor.u32 %v429_v12, %v425_v29  ;;  %v476_v52 = vrot.slane %v468_v18, 1 }
  0x32   : > { %v441_v29 = vshll.u32 %v3167_v57, 16 }
  0x33   : > { %1582 = vmatpush.bf16.msrb.mxu1 %v2711_v19  ;;  %1640 = vmatpush.bf16.msrb.mxu3 %v2727_v31  ;;  %v469_v19 = vpack.c.b16 %v375_v17, %v461_v63  ;;  %v529_v27 = vrot.slane %v527_v3, 1  ;;  %v536_v28 = vrot.slane %v534_v4, 1  ;;  %v3139_v31 = vld [vmem:[%s2885_s18 + $0x24] sm:$0x1]  ;;  %v2682_v17 = vld [vmem:[%s3695_s1 + $0x88] sm:$0xff]  ;;  %v764_v48 = vunpack.c.l.b16 %v430_v47 }
  0x34   : > { %v507_v40 = vunpack.c.l.b16 %v3139_v31  ;;  %v300_v3 = vld [vmem:[%s2885_s18 + $0x10] sm:$0xe]  ;;  %v301_v4 = vld [vmem:[%s2885_s18 + $0x18] sm:$0xe]  ;;  %v2718_v47 = vld [vmem:[%s3695_s1 + $0x1a8] sm:$0xff] }
  0x35   : > { %1496 = vmatpush.bf16.msrb.mxu2 %v2686_v21  ;;  %1554 = vmatpush.bf16.msrb.mxu0 %v2702_v26  ;;  %v3136_v21 = vld [vmem:[%s2885_s18 + $0x1c] sm:$0x1]  ;;  %v506_v26 = vunpack.c.l.b16 %v2297_v6  ;;  %v477_v53 = vrot.slane %v469_v19, 1  ;;  %v530_v54 = vor.u32 %v529_v27, %v525_v37  ;;  %v462_v37 = vunpack.c.l.b16 %v300_v3  ;;  %v303_v3 = vld [vmem:[%s2885_s18 + $0x28] sm:$0xe] }
  0x36   : > { %v439_v27 = vshrl.u32 %v3167_v57, 16  ;;  %v2734_v57 = vld [vmem:[%s3695_s1 + $0x228] sm:$0xff] }
  0x37   : > { %1583 = vmatpush.bf16.msrb.mxu1 %v2710_v42  ;;  %v2726_v42 = vld [vmem:[%s3695_s1 + $0x1e8] sm:$0xff]  ;;  %v944_v45 = vpack.c.b16 %v506_v26, %v504_v24  ;;  %v747_v62 = vunpack.c.l.b16 %v477_v53  ;;  %v519_v63 = vpack.c.b16 %v507_v40, %v506_v26  ;;  %v742_v5 = vunpack.c.l.b16 %v530_v54  ;;  %v2299_v26 = vld [vmem:[%s2885_s18 + $0x30] sm:$0xf] }
  0x38   : > { %1641 = vmatpush.bf16.msrb.mxu3 %v2726_v42  ;;  %v3220_v53 = vld [vmem:[%s2885_s18 + $0x2c] sm:$0x1] }
  0x39   : > { %1497 = vmatpush.bf16.msrb.mxu2 %v2685_v46  ;;  %1555 = vmatpush.bf16.msrb.mxu0 %v2701_v39  ;;  %v2698_v46 = vld [vmem:[%s3695_s1 + $0x108] sm:$0xff]  ;;  %v505_v39 = vunpack.c.l.b16 %v3136_v21  ;;  %v548_v18 = vshll.u32 %v519_v63, 16 }
  0x3b   : > { %1584 = vmatpush.bf16.msrb.mxu1 %v2709_v55  ;;  %v537_v55 = vor.u32 %v536_v28, %v532_v43  ;;  %v463_v43 = vunpack.c.l.b16 %v301_v4  ;;  %v443_v28 = vrot.slane %v441_v29, 1  ;;  %v550_v54 = vrot.slane %v548_v18, 1  ;;  %v2733_v4 = vld [vmem:[%s3695_s1 + $0x220] sm:$0xff]  ;;  %v2310_v29 = vld [vmem:[%s2885_s18 + $0x8] sm:$0xe] }
  0x3c   : > { %1459 = vmatmul.bf16.gmra.mxu2 %v959_v60  ;;  %1449 = vmatmul.bf16.gmra.mxu0 %v941_v1  ;;  %v770_v60 = vunpack.c.l.b16 %v437_v51  ;;  %v2736_v1 = vld [vmem:[%s3695_s1 + $0x238] sm:$0xff]  ;;  %v465_v18 = vunpack.c.l.b16 %v303_v3 }
  0x3d   : > { %1498 = vmatpush.bf16.msrb.mxu2 %v2684_v56  ;;  %1556 = vmatpush.bf16.msrb.mxu0 %v2700_v58  ;;  %v2706_v56 = vld [vmem:[%s3695_s1 + $0x148] sm:$0xff]  ;;  %v3173_v58 = vpack.c.b16 %v387_v16, %v386_v50  ;;  %v3186_v50 = vpack.c.b16 %v505_v39, %v504_v24  ;;  %v748_v6 = vunpack.c.l.b16 %v537_v55  ;;  %v3223_v55 = vld [vmem:[%s2885_s18 + $0x34] sm:$0x1] }
  0x3e   : > { %1478 = vmatmul.bf16.gmra.mxu1 %v942_v61  ;;  %1536 = vmatmul.bf16.gmra.mxu3 %v944_v45  ;;  %v741_v61 = vunpack.c.l.b16 %v476_v52  ;;  %v951_v14 = vpack.c.b16 %v770_v60, %v764_v48  ;;  %v2298_v24 = vld [vmem:[%s2885_s18 + $0x28] sm:$0xf]  ;;  %v470_v45 = vpack.c.b16 %v377_v38, %v462_v37  ;;  %v510_v38 = vunpack.c.l.b16 %v2299_v26 }
  0x3f   : > { %1585 = vmatpush.bf16.msrb.mxu1 %v2708_v15  ;;  %1642 = vmatpush.bf16.msrb.mxu3 %v2725_v49  ;;  %v448_v12 = vshll.u32 %v3173_v58, 16  ;;  %v541_v13 = vshll.u32 %v3186_v50, 16  ;;  %v936_v19 = vpack.c.b16 %v748_v6, %v742_v5  ;;  %v446_v42 = vshrl.u32 %v3173_v58, 16 }
  0x40   : > { %v934_v15 = vpack.c.b16 %v747_v62, %v741_v61  ;;  %v539_v51 = vshrl.u32 %v3186_v50, 16  ;;  %v546_v49 = vshrl.u32 %v519_v63, 16  ;;  %v508_v30 = vunpack.c.l.b16 %v2298_v24 }
  0x41   : > { %1499 = vmatpush.bf16.msrb.mxu2 %v2683_v8  ;;  %1557 = vmatpush.bf16.msrb.mxu0 %v2699_v34  ;;  %v2705_v8 = vld [vmem:[%s3695_s1 + $0x140] sm:$0xff]  ;;  %v2719_v34 = vld [vmem:[%s3695_s1 + $0x1b0] sm:$0xff]  ;;  %v543_v52 = vrot.slane %v541_v13, 1  ;;  %v444_v58 = vor.u32 %v443_v28, %v439_v27  ;;  %v511_v48 = vunpack.c.l.b16 %v3223_v55  ;;  %v478_v50 = vrot.slane %v470_v45, 1  ;;  %v2732_v27 = vld [vmem:[%s3695_s1 + $0x218] sm:$0xff] }
  0x42   : > { %v551_v62 = vor.u32 %v550_v54, %v546_v49 }
  0x43   : > { %1586 = vmatpush.bf16.msrb.mxu1 %v2707_v10  ;;  %v450_v10 = vrot.slane %v448_v12, 1  ;;  %1643 = vmatpush.bf16.msrb.mxu3 %v2724_v35  ;;  %v544_v61 = vor.u32 %v543_v52, %v539_v51  ;;  %v776_v5 = vunpack.c.l.b16 %v444_v58  ;;  %v2311_v12 = vld [vmem:[%s2885_s18 + $0x10] sm:$0xe]  ;;  %v753_v37 = vunpack.c.l.b16 %v478_v50  ;;  %v3272_v51 = vld [vmem:[%s2885_s18 + $0x14] sm:$0x1] }
  0x44   : > { %v589_v24 = vunpack.c.l.b16 %v2311_v12  ;;  %v3275_v52 = vld [vmem:[%s2885_s18 + $0x1c] sm:$0x1]  ;;  %v2301_v35 = vld [vmem:[%s2885_s18 + $0x40] sm:$0xf] }
  0x45   : > { %1500 = vmatpush.bf16.msrb.mxu2 %v2682_v17  ;;  %1558 = vmatpush.bf16.msrb.mxu0 %v2698_v46  ;;  %v2735_v17 = vld [vmem:[%s3695_s1 + $0x230] sm:$0xff]  ;;  %v471_v46 = vpack.c.b16 %v379_v44, %v463_v43  ;;  %v509_v44 = vunpack.c.l.b16 %v3220_v53  ;;  %v754_v13 = vunpack.c.l.b16 %v544_v61  ;;  %v631_v2 = vunpack.c.l.b16 %v3275_v52  ;;  %v2722_v61 = vld [vmem:[%s3695_s1 + $0x1c8] sm:$0xff] }
  0x47   : > { %1587 = vmatpush.bf16.msrb.mxu1 %v2706_v56  ;;  %v953_v56 = vpack.c.b16 %v510_v38, %v508_v30  ;;  %v479_v60 = vrot.slane %v471_v46, 1  ;;  %v3241_v63 = vpack.c.b16 %v509_v44, %v508_v30  ;;  %v473_v30 = vpack.c.b16 %v383_v25, %v465_v18 }
  0x49   : > { %1501 = vmatpush.bf16.msrb.mxu2 %v2681_v59  ;;  %1559 = vmatpush.bf16.msrb.mxu0 %v2697_v32  ;;  %v451_v59 = vor.u32 %v450_v10, %v446_v42  ;;  %v2717_v32 = vld [vmem:[%s3695_s1 + $0x1a0] sm:$0xff]  ;;  %v759_v43 = vunpack.c.l.b16 %v479_v60  ;;  %v555_v26 = vshll.u32 %v3241_v63, 16  ;;  %v2715_v42 = vld [vmem:[%s3695_s1 + $0x190] sm:$0xff]  ;;  %v481_v60 = vrot.slane %v473_v30, 1 }
  0x4a   : > { %v3266_v10 = vld [vmem:[%s2885_s18 + $0x10] sm:$0xf]  ;;  %v2729_v30 = vld [vmem:[%s3695_s1 + $0x200] sm:$0xff] }
  0x4b   : > { %1588 = vmatpush.bf16.msrb.mxu1 %v2705_v8  ;;  %v782_v6 = vunpack.c.l.b16 %v451_v59  ;;  %v3250_v8 = vpack.c.b16 %v511_v48, %v510_v38  ;;  %v943_v46 = vpack.c.b16 %v759_v43, %v753_v37  ;;  %v628_v49 = vunpack.c.l.b16 %v3266_v10  ;;  %v2300_v38 = vld [vmem:[%s2885_s18 + $0x38] sm:$0xf]  ;;  %v2713_v37 = vld [vmem:[%s3695_s1 + $0x180] sm:$0xff]  ;;  %v2730_v43 = vld [vmem:[%s3695_s1 + $0x208] sm:$0xff] }
  0x4c   : > { %1502 = vmatmul.bf16.vlgmr.msrb.gmra.mxu2 %v934_v15  ;;  %1560 = vmatmul.bf16.vlgmr.msrb.gmra.mxu0 %v936_v19  ;;  %v588_v19 = vunpack.c.l.b16 %v2310_v29  ;;  %v597_v59 = vpack.c.b16 %v503_v41, %v589_v24  ;;  %v512_v23 = vunpack.c.l.b16 %v2300_v38  ;;  %v2714_v41 = vld [vmem:[%s3695_s1 + $0x188] sm:$0xff] }
  0x4d   : > { %1610 = vmatpush.bf16.msra.mxu2 %v2720_v33  ;;  %1668 = vmatpush.bf16.msra.mxu0 %v2736_v1  ;;  %v2723_v33 = vld [vmem:[%s3695_s1 + $0x1d0] sm:$0xff]  ;;  %v302_v1 = vld [vmem:[%s2885_s18 + $0x20] sm:$0xe]  ;;  %v562_v28 = vshll.u32 %v3250_v8, 16  ;;  %v960_v45 = vpack.c.b16 %v782_v6, %v776_v5  ;;  %v560_v9 = vshrl.u32 %v3250_v8, 16 }
  0x4e   : > { %1483 = vmatmul.bf16.gmra.mxu1 %v951_v14  ;;  %1541 = vmatmul.bf16.gmra.mxu3 %v953_v56  ;;  %v760_v14 = vunpack.c.l.b16 %v551_v62  ;;  %v464_v15 = vunpack.c.l.b16 %v302_v1  ;;  %v629_v56 = vunpack.c.l.b16 %v3272_v51  ;;  %v596_v58 = vpack.c.b16 %v501_v36, %v588_v19  ;;  %v2731_v62 = vld [vmem:[%s3695_s1 + $0x210] sm:$0xff]  ;;  %v3314_v1 = vld [vmem:[%s2885_s18 + $0x44] sm:$0x1] }
  0x4f   : > { %1644 = vmatpush.bf16.msrb.mxu3 %v2723_v33  ;;  %v564_v25 = vrot.slane %v562_v28, 1  ;;  %v514_v36 = vunpack.c.l.b16 %v2301_v35  ;;  %v605_v8 = vrot.slane %v597_v59, 1  ;;  %v515_v18 = vunpack.c.l.b16 %v3314_v1  ;;  %v2313_v59 = vld [vmem:[%s2885_s18 + $0x20] sm:$0xe] }
  0x50   : > { %v472_v54 = vpack.c.b16 %v381_v20, %v464_v15  ;;  %v557_v20 = vrot.slane %v555_v26, 1  ;;  %v644_v22 = vpack.c.b16 %v629_v56, %v628_v49  ;;  %v604_v6 = vrot.slane %v596_v58, 1  ;;  %v2312_v58 = vld [vmem:[%s2885_s18 + $0x18] sm:$0xe] }
  0x51   : > { %1611 = vmatpush.bf16.msra.mxu2 %v2719_v34  ;;  %1669 = vmatpush.bf16.msra.mxu0 %v2735_v17  ;;  %v2716_v34 = vld [vmem:[%s3695_s1 + $0x198] sm:$0xff]  ;;  %v962_v3 = vpack.c.b16 %v514_v36, %v512_v23  ;;  %v565_v12 = vor.u32 %v564_v25, %v560_v9  ;;  %v523_v35 = vpack.c.b16 %v515_v18, %v514_v36  ;;  %v3348_v36 = vld [vmem:[%s2885_s18 + $0x2c] sm:$0x1] }
  0x52   : > { %v3269_v17 = vld [vmem:[%s2885_s18 + $0x18] sm:$0xf]  ;;  %v480_v50 = vrot.slane %v472_v54, 1  ;;  %v653_v19 = vshrl.u32 %v644_v22, 16  ;;  %v743_v28 = vunpack.c.l.b16 %v604_v6 }
  0x53   : > { %1645 = vmatpush.bf16.msrb.mxu3 %v2722_v61  ;;  %v305_v54 = vld [vmem:[%s2885_s18 + $0x38] sm:$0xe]  ;;  %v3345_v61 = vld [vmem:[%s2885_s18 + $0x24] sm:$0x1]  ;;  %v576_v6 = vshll.u32 %v523_v35, 16 }
  0x55   : > { %1612 = vmatpush.bf16.msra.mxu2 %v2718_v47  ;;  %1670 = vmatpush.bf16.msra.mxu0 %v2734_v57  ;;  %v945_v47 = vpack.c.b16 %v760_v14, %v754_v13  ;;  %v630_v57 = vunpack.c.l.b16 %v3269_v17  ;;  %v765_v13 = vunpack.c.l.b16 %v480_v50  ;;  %v771_v14 = vunpack.c.l.b16 %v481_v60  ;;  %v3339_v50 = vld [vmem:[%s2885_s18 + $0x20] sm:$0xf]  ;;  %v3342_v60 = vld [vmem:[%s2885_s18 + $0x28] sm:$0xf] }
  0x57   : > { %v645_v33 = vpack.c.b16 %v631_v2, %v630_v57 }
  0x59   : > { %1613 = vmatpush.bf16.msra.mxu2 %v2717_v32  ;;  %1671 = vmatpush.bf16.msra.mxu0 %v2733_v4  ;;  %v553_v32 = vshrl.u32 %v3241_v63, 16  ;;  %v3311_v63 = vld [vmem:[%s2885_s18 + $0x3c] sm:$0x1]  ;;  %v655_v4 = vshll.u32 %v644_v22, 16  ;;  %v662_v5 = vshll.u32 %v645_v33, 16  ;;  %v660_v26 = vshrl.u32 %v645_v33, 16 }
  0x5a   : > { %v513_v15 = vunpack.c.l.b16 %v3311_v63  ;;  %v467_v33 = vunpack.c.l.b16 %v305_v54 }
  0x5b   : > { %v558_v29 = vor.u32 %v557_v20, %v553_v32  ;;  %v657_v24 = vrot.slane %v655_v4, 1  ;;  %v952_v32 = vpack.c.b16 %v771_v14, %v765_v13  ;;  %v633_v4 = vunpack.c.l.b16 %v3345_v61 }
  0x5c   : > { %1507 = vmatmul.bf16.gmra.mxu2 %v943_v46  ;;  %1565 = vmatmul.bf16.gmra.mxu0 %v945_v47  ;;  %v772_v46 = vunpack.c.l.b16 %v565_v12  ;;  %v304_v47 = vld [vmem:[%s2885_s18 + $0x30] sm:$0xe]  ;;  %v522_v38 = vpack.c.b16 %v513_v15, %v512_v23  ;;  %v590_v23 = vunpack.c.l.b16 %v2312_v58  ;;  %v475_v14 = vpack.c.b16 %v387_v16, %v467_v33 }
  0x5d   : > { %1614 = vmatpush.bf16.msra.mxu2 %v2716_v34  ;;  %1672 = vmatpush.bf16.msra.mxu0 %v2732_v27  ;;  %v2721_v34 = vld [vmem:[%s3695_s1 + $0x1c0] sm:$0xff]  ;;  %v664_v27 = vrot.slane %v662_v5, 1  ;;  %v658_v20 = vor.u32 %v657_v24, %v653_v19 }
  0x5e   : > { %1488 = vmatmul.bf16.gmra.mxu1 %v960_v45  ;;  %1546 = vmatmul.bf16.gmra.mxu3 %v962_v3  ;;  %v766_v45 = vunpack.c.l.b16 %v558_v29  ;;  %v632_v3 = vunpack.c.l.b16 %v3339_v50  ;;  %v569_v5 = vshll.u32 %v522_v38, 16  ;;  %v635_v29 = vunpack.c.l.b16 %v3348_v36  ;;  %v2338_v36 = vld [vmem:[%s2885_s18 + $0x30] sm:$0xe] }
  0x5f   : > { %1646 = vmatpush.bf16.msrb.mxu3 %v2721_v34  ;;  %v665_v9 = vor.u32 %v664_v27, %v660_v26  ;;  %v744_v12 = vunpack.c.l.b16 %v658_v20  ;;  %v598_v19 = vpack.c.b16 %v505_v39, %v590_v23  ;;  %v567_v26 = vshrl.u32 %v522_v38, 16  ;;  %v2314_v38 = vld [vmem:[%s2885_s18 + $0x28] sm:$0xe]  ;;  %v2315_v20 = vld [vmem:[%s2885_s18 + $0x30] sm:$0xe] }
  0x60   : > { %v954_v22 = vpack.c.b16 %v772_v46, %v766_v45  ;;  %v571_v0 = vrot.slane %v569_v5, 1  ;;  %v578_v27 = vrot.slane %v576_v6, 1  ;;  %v592_v33 = vunpack.c.l.b16 %v2314_v38 }
  0x61   : > { %1615 = vmatpush.bf16.msra.mxu2 %v2715_v42  ;;  %1673 = vmatpush.bf16.msra.mxu0 %v2731_v62  ;;  %v749_v42 = vunpack.c.l.b16 %v605_v8  ;;  %v591_v62 = vunpack.c.l.b16 %v2313_v59  ;;  %v634_v8 = vunpack.c.l.b16 %v3342_v60  ;;  %v750_v34 = vunpack.c.l.b16 %v665_v9  ;;  %v2334_v9 = vld [vmem:[%s2885_s18 + $0x10] sm:$0xe] }
  0x62   : > { %v606_v7 = vrot.slane %v598_v19, 1  ;;  %v572_v16 = vor.u32 %v571_v0, %v567_v26  ;;  %v593_v5 = vunpack.c.l.b16 %v2315_v20  ;;  %v716_v6 = vunpack.c.l.b16 %v2334_v9  ;;  %v3384_v19 = vld [vmem:[%s2885_s18 + $0x3c] sm:$0x1]  ;;  %v2337_v20 = vld [vmem:[%s2885_s18 + $0x28] sm:$0xe] }
  0x63   : > { %v937_v25 = vpack.c.b16 %v749_v42, %v743_v28  ;;  %v647_v13 = vpack.c.b16 %v635_v29, %v634_v8  ;;  %v599_v24 = vpack.c.b16 %v507_v40, %v591_v62  ;;  %v939_v28 = vpack.c.b16 %v750_v34, %v744_v12  ;;  %v3375_v34 = vld [vmem:[%s2885_s18 + $0x30] sm:$0xf] }
  0x64   : > { %v755_v59 = vunpack.c.l.b16 %v606_v7  ;;  %v724_v7 = vpack.c.b16 %v629_v56, %v716_v6  ;;  %v719_v10 = vunpack.c.l.b16 %v2337_v20 }
  0x65   : > { %1616 = vmatpush.bf16.msra.mxu2 %v2714_v41  ;;  %1674 = vmatpush.bf16.msra.mxu0 %v2730_v43  ;;  %v466_v41 = vunpack.c.l.b16 %v304_v47  ;;  %v676_v45 = vshll.u32 %v647_v13, 16  ;;  %v483_v47 = vrot.slane %v475_v14, 1  ;;  %v607_v21 = vrot.slane %v599_v24, 1 }
  0x66   : > { %v674_v54 = vshrl.u32 %v647_v13, 16  ;;  %v636_v24 = vunpack.c.l.b16 %v3375_v34  ;;  %v732_v56 = vrot.slane %v724_v7, 1 }
  0x67   : > { %v474_v43 = vpack.c.b16 %v385_v11, %v466_v41  ;;  %v574_v11 = vshrl.u32 %v523_v35, 16  ;;  %v783_v58 = vunpack.c.l.b16 %v483_v47  ;;  %v601_v47 = vpack.c.b16 %v511_v48, %v593_v5  ;;  %v3421_v5 = vld [vmem:[%s2885_s18 + $0x44] sm:$0x1] }
  0x68   : > { %v745_v38 = vunpack.c.l.b16 %v732_v56 }
  0x69   : > { %1617 = vmatpush.bf16.msra.mxu2 %v2713_v37  ;;  %1675 = vmatpush.bf16.msra.mxu0 %v2729_v30  ;;  %v646_v37 = vpack.c.b16 %v633_v4, %v632_v3  ;;  %v482_v46 = vrot.slane %v474_v43, 1  ;;  %v579_v39 = vor.u32 %v578_v27, %v574_v11  ;;  %v678_v30 = vrot.slane %v676_v45, 1  ;;  %v3381_v43 = vld [vmem:[%s2885_s18 + $0x34] sm:$0x1] }
  0x6a   : > { %v637_v26 = vunpack.c.l.b16 %v3381_v43  ;;  %v639_v27 = vunpack.c.l.b16 %v3384_v19  ;;  %v609_v51 = vrot.slane %v601_v47, 1 }
  0x6b   : > { %v669_v42 = vshll.u32 %v646_v37, 16  ;;  %v667_v31 = vshrl.u32 %v646_v37, 16  ;;  %v777_v35 = vunpack.c.l.b16 %v482_v46  ;;  %v784_v41 = vunpack.c.l.b16 %v579_v39  ;;  %v3378_v37 = vld [vmem:[%s2885_s18 + $0x38] sm:$0xf] }
  0x6c   : > { %1512 = vmatmul.bf16.gmra.mxu2 %v952_v32  ;;  %1570 = vmatmul.bf16.gmra.mxu0 %v954_v22  ;;  %v761_v32 = vunpack.c.l.b16 %v607_v21  ;;  %v778_v22 = vunpack.c.l.b16 %v572_v16  ;;  %v679_v62 = vor.u32 %v678_v30, %v674_v54  ;;  %v638_v11 = vunpack.c.l.b16 %v3378_v37 }
  0x6d   : > { %v671_v40 = vrot.slane %v669_v42, 1  ;;  %v961_v13 = vpack.c.b16 %v783_v58, %v777_v35  ;;  %v648_v46 = vpack.c.b16 %v637_v26, %v636_v24  ;;  %v773_v30 = vunpack.c.l.b16 %v609_v51  ;;  %v2316_v58 = vld [vmem:[%s2885_s18 + $0x38] sm:$0xe] }
  0x6e   : > { %1589 = vmatmul.bf16.vlgmr.msrb.gmra.mxu1 %v937_v25  ;;  %1647 = vmatmul.bf16.vlgmr.msrb.gmra.mxu3 %v939_v28  ;;  %v2335_v25 = vld [vmem:[%s2885_s18 + $0x18] sm:$0xe]  ;;  %v946_v14 = vpack.c.b16 %v761_v32, %v755_v59  ;;  %v963_v0 = vpack.c.b16 %v784_v41, %v778_v22  ;;  %v600_v28 = vpack.c.b16 %v509_v44, %v592_v33  ;;  %v762_v45 = vunpack.c.l.b16 %v679_v62  ;;  %v2317_v59 = vld [vmem:[%s2885_s18 + $0x40] sm:$0xe]  ;;  %v3418_v62 = vld [vmem:[%s2885_s18 + $0x48] sm:$0xf] }
  0x6f   : > { %v672_v23 = vor.u32 %v671_v40, %v667_v31  ;;  %v717_v12 = vunpack.c.l.b16 %v2335_v25  ;;  %v649_v53 = vpack.c.b16 %v639_v27, %v638_v11  ;;  %v683_v16 = vshll.u32 %v648_v46, 16  ;;  %v2336_v32 = vld [vmem:[%s2885_s18 + $0x20] sm:$0xe] }
  0x70   : > { %v608_v48 = vrot.slane %v600_v28, 1  ;;  %v938_v41 = vpack.c.b16 %v630_v57, %v628_v49  ;;  %v594_v6 = vunpack.c.l.b16 %v2316_v58  ;;  %v718_v28 = vunpack.c.l.b16 %v2336_v32 }
  0x71   : > { %v756_v42 = vunpack.c.l.b16 %v672_v23  ;;  %v725_v21 = vpack.c.b16 %v631_v2, %v717_v12  ;;  %v690_v55 = vshll.u32 %v649_v53, 16  ;;  %v681_v2 = vshrl.u32 %v648_v46, 16  ;;  %v3415_v23 = vld [vmem:[%s2885_s18 + $0x40] sm:$0xf] }
  0x72   : > { %v685_v39 = vrot.slane %v683_v16, 1  ;;  %v688_v31 = vshrl.u32 %v649_v53, 16  ;;  %v767_v54 = vunpack.c.l.b16 %v608_v48  ;;  %v595_v12 = vunpack.c.l.b16 %v2317_v59 }
  0x73   : > { %v948_v44 = vpack.c.b16 %v762_v45, %v756_v42  ;;  %v733_v52 = vrot.slane %v725_v21, 1  ;;  %v692_v40 = vrot.slane %v690_v55, 1  ;;  %v642_v17 = vunpack.c.l.b16 %v3418_v62 }
  0x74   : > { %v686_v9 = vor.u32 %v685_v39, %v681_v2  ;;  %v955_v22 = vpack.c.b16 %v773_v30, %v767_v54  ;;  %v602_v47 = vpack.c.b16 %v513_v15, %v594_v6  ;;  %v603_v7 = vpack.c.b16 %v515_v18, %v595_v12 }
  0x75   : > { %v751_v35 = vunpack.c.l.b16 %v733_v52  ;;  %v693_v25 = vor.u32 %v692_v40, %v688_v31  ;;  %v726_v21 = vpack.c.b16 %v633_v4, %v718_v28  ;;  %v727_v53 = vpack.c.b16 %v635_v29, %v719_v10  ;;  %v2339_v29 = vld [vmem:[%s2885_s18 + $0x38] sm:$0xe] }
  0x76   : > { %v768_v57 = vunpack.c.l.b16 %v686_v9  ;;  %v610_v48 = vrot.slane %v602_v47, 1  ;;  %v611_v51 = vrot.slane %v603_v7, 1  ;;  %v947_v30 = vpack.c.b16 %v634_v8, %v632_v3 }
  0x77   : > { %v940_v33 = vpack.c.b16 %v751_v35, %v745_v38  ;;  %v774_v42 = vunpack.c.l.b16 %v693_v25  ;;  %v734_v56 = vrot.slane %v726_v21, 1  ;;  %v735_v63 = vrot.slane %v727_v53, 1 }
  0x78   : > { %v779_v2 = vunpack.c.l.b16 %v610_v48  ;;  %v785_v61 = vunpack.c.l.b16 %v611_v51  ;;  %v720_v35 = vunpack.c.l.b16 %v2338_v36  ;;  %v721_v58 = vunpack.c.l.b16 %v2339_v29 }
  0x79   : > { %v757_v4 = vunpack.c.l.b16 %v734_v56  ;;  %v763_v39 = vunpack.c.l.b16 %v735_v63 }
  0x7a   : > { %v964_v54 = vpack.c.b16 %v785_v61, %v779_v2  ;;  %v728_v20 = vpack.c.b16 %v637_v26, %v720_v35  ;;  %v729_v9 = vpack.c.b16 %v639_v27, %v721_v58 }
  0x7b   : > { %v949_v38 = vpack.c.b16 %v763_v39, %v757_v4 }
  0x7c   : > { %1517 = vmatmul.bf16.gmra.mxu2 %v961_v13  ;;  %1575 = vmatmul.bf16.gmra.mxu0 %v963_v0  ;;  %v3424_v13 = vld [vmem:[%s2885_s18 + $0x4c] sm:$0x1]  ;;  %v641_v0 = vunpack.c.l.b16 %v3421_v5  ;;  %v736_v25 = vrot.slane %v728_v20, 1  ;;  %v737_v60 = vrot.slane %v729_v9, 1 }
  0x7d   : > { %v643_v49 = vunpack.c.l.b16 %v3424_v13 }
  0x7e   : > { %1594 = vmatmul.bf16.gmra.mxu1 %v946_v14  ;;  %1652 = vmatmul.bf16.gmra.mxu3 %v948_v44  ;;  %v640_v14 = vunpack.c.l.b16 %v3415_v23  ;;  %v957_v44 = vpack.c.b16 %v774_v42, %v768_v57  ;;  %v769_v3 = vunpack.c.l.b16 %v736_v25  ;;  %v775_v8 = vunpack.c.l.b16 %v737_v60 }
  0x7f   : > { %v651_v46 = vpack.c.b16 %v643_v49, %v642_v17 }
  0x80   : > { %v650_v45 = vpack.c.b16 %v641_v0, %v640_v14  ;;  %v958_v12 = vpack.c.b16 %v775_v8, %v769_v3  ;;  %v965_v7 = vpack.c.b16 %v642_v17, %v640_v14 }
  0x81   : > { %v704_v55 = vshll.u32 %v651_v46, 16  ;;  %v702_v18 = vshrl.u32 %v651_v46, 16 }
  0x82   : > { %v697_v16 = vshll.u32 %v650_v45, 16  ;;  %v695_v15 = vshrl.u32 %v650_v45, 16 }
  0x83   : > { %v706_v52 = vrot.slane %v704_v55, 1 }
  0x84   : > { %v699_v1 = vrot.slane %v697_v16, 1 }
  0x85   : > { %v707_v40 = vor.u32 %v706_v52, %v702_v18 }
  0x86   : > { %v700_v31 = vor.u32 %v699_v1, %v695_v15 }
  0x87   : > { %v786_v32 = vunpack.c.l.b16 %v707_v40 }
  0x88   : > { %v780_v59 = vunpack.c.l.b16 %v700_v31 }
  0x8a   : > { %v966_v50 = vpack.c.b16 %v786_v32, %v780_v59 }
  0x8c   : > { %1618 = vmatmul.bf16.vlgmr.msra.gmra.mxu2 %v938_v41  ;;  %1676 = vmatmul.bf16.vlgmr.msra.gmra.mxu0 %v940_v33  ;;  %v2341_v41 = vld [vmem:[%s2885_s18 + $0x48] sm:$0xe]  ;;  %v956_v33 = vpack.c.b16 %v638_v11, %v636_v24 }
  0x8d   : > { %v723_v26 = vunpack.c.l.b16 %v2341_v41 }
  0x8e   : > { %1599 = vmatmul.bf16.gmra.mxu1 %v955_v22  ;;  %1657 = vmatmul.bf16.gmra.mxu3 %v957_v44  ;;  %v2340_v22 = vld [vmem:[%s2885_s18 + $0x40] sm:$0xe]  ;;  %s2664_s18 = sshll.u32 %s3706_s21, 4 }
  0x8f   : > { %v722_v43 = vunpack.c.l.b16 %v2340_v22  ;;  %v731_v28 = vpack.c.b16 %v643_v49, %v723_v26  ;;  %s280_s20 = scalar_lea.vmem %s3700_s6, %s2664_s18 }
  0x91   : > { %v730_v27 = vpack.c.b16 %v641_v0, %v722_v43  ;;  %v739_v45 = vrot.slane %v731_v28, 1 }
  0x93   : > { %v738_v42 = vrot.slane %v730_v27, 1  ;;  %v787_v24 = vunpack.c.l.b16 %v739_v45 }
  0x95   : > { %v781_v37 = vunpack.c.l.b16 %v738_v42 }
  0x97   : > { %v967_v53 = vpack.c.b16 %v787_v24, %v781_v37 }
  0x9c   : > { %1623 = vmatmul.bf16.gmra.mxu2 %v947_v30  ;;  %1681 = vmatmul.bf16.gmra.mxu0 %v949_v38 }
  0x9e   : > { %1604 = vmatmul.bf16.gmra.mxu1 %v964_v54  ;;  %1662 = vmatmul.bf16.gmra.mxu3 %v966_v50 }
  0xa9   : > { %v1445_v13 = vpop.f32.mrf.mxu0 }
  0xab   : > { %v1474_v6 = vpop.f32.mrf.mxu1 }
  0xac   : > { %v1475_v19 = vadd.f32 %v1474_v6, %v1445_v13  ;;  %1628 = vmatmul.bf16.gmra.mxu2 %v956_v33  ;;  %1686 = vmatmul.bf16.gmra.mxu0 %v958_v12 }
  0xaf   : > { %v1455_v10 = vpop.f32.mrf.mxu2 }
  0xb1   : > { %v1447_v34 = vpop.f32.mrf.mxu0  ;;  %v1532_v11 = vpop.f32.mrf.mxu3 }
  0xb3   : > { %v1476_v57 = vpop.f32.mrf.mxu1 }
  0xb4   : > { %v1477_v46 = vadd.f32 %v1476_v57, %v1447_v34 }
  0xb7   : > { %v1457_v47 = vpop.f32.mrf.mxu2 }
  0xb9   : > { %v1450_v5 = vpop.f32.mrf.mxu0  ;;  %v1534_v49 = vpop.f32.mrf.mxu3 }
  0xbb   : > { %v1479_v21 = vpop.f32.mrf.mxu1 }
  0xbc   : > { %v1480_v0 = vadd.f32 %v1479_v21, %v1450_v5  ;;  %1633 = vmatmul.bf16.gmra.mxu2 %v965_v7  ;;  %1691 = vmatmul.bf16.gmra.mxu0 %v967_v53 }
  0xbf   : > { %v1460_v44 = vpop.f32.mrf.mxu2 }
  0xc1   : > { %v1452_v55 = vpop.f32.mrf.mxu0  ;;  %v1537_v56 = vpop.f32.mrf.mxu3 }
  0xc3   : > { %v1481_v16 = vpop.f32.mrf.mxu1 }
  0xc4   : > { %v1482_v48 = vadd.f32 %v1481_v16, %v1452_v55  ;;  %v3483_v55 = vld [vmem:[%s3696_s2] ss:$0 sm:$0xff] }
  0xc7   : > { %v3466_v51 = vpop.f32.mrf.mxu2 }
  0xc9   : > { %v1561_v23 = vpop.f32.mrf.mxu0  ;;  %v1539_v17 = vpop.f32.mrf.mxu3 }
  0xcb   : > { %v1484_v63 = vpop.f32.mrf.mxu1 }
  0xcc   : > { %v1485_v15 = vadd.f32 %v1484_v63, %v1455_v10 }
  0xcf   : > { %v1503_v1 = vpop.f32.mrf.mxu2 }
  0xd0   : > { %v1504_v62 = vadd.f32 %v1503_v1, %v1475_v19 }
  0xd1   : > { %v1563_v2 = vpop.f32.mrf.mxu0  ;;  %v1542_v54 = vpop.f32.mrf.mxu3 }
  0xd2   : > { %v1533_v18 = vadd.f32 %v1532_v11, %v1504_v62 }
  0xd3   : > { %v1486_v14 = vpop.f32.mrf.mxu1 }
  0xd4   : > { %v1487_v52 = vadd.f32 %v1486_v14, %v1457_v47  ;;  %v1562_v61 = vadd.f32 %v1561_v23, %v1533_v18 }
  0xd7   : > { %v1505_v4 = vpop.f32.mrf.mxu2 }
  0xd8   : > { %v1506_v39 = vadd.f32 %v1505_v4, %v1477_v46 }
  0xd9   : > { %v1566_v40 = vpop.f32.mrf.mxu0  ;;  %v1544_v9 = vpop.f32.mrf.mxu3 }
  0xda   : > { %v1535_v29 = vadd.f32 %v1534_v49, %v1506_v39 }
  0xdb   : > { %v1489_v36 = vpop.f32.mrf.mxu1 }
  0xdc   : > { %v1490_v31 = vadd.f32 %v1489_v36, %v1460_v44  ;;  %v1564_v30 = vadd.f32 %v1563_v2, %v1535_v29 }
  0xdf   : > { %v1508_v38 = vpop.f32.mrf.mxu2 }
  0xe0   : > { %v1509_v35 = vadd.f32 %v1508_v38, %v1480_v0 }
  0xe1   : > { %v1568_v32 = vpop.f32.mrf.mxu0  ;;  %v1547_v33 = vpop.f32.mrf.mxu3 }
  0xe2   : > { %v1538_v59 = vadd.f32 %v1537_v56, %v1509_v35 }
  0xe3   : > { %v1491_v58 = vpop.f32.mrf.mxu1 }
  0xe4   : > { %v1567_v20 = vadd.f32 %v1566_v40, %v1538_v59  ;;  %v1492_v4 = vadd.f32 %v1491_v58, %v3466_v51 }
  0xe7   : > { %v1510_v50 = vpop.f32.mrf.mxu2 }
  0xe8   : > { %v1511_v25 = vadd.f32 %v1510_v50, %v1482_v48 }
  0xe9   : > { %v1571_v3 = vpop.f32.mrf.mxu0  ;;  %v3472_v28 = vpop.f32.mrf.mxu3 }
  0xea   : > { %v1540_v60 = vadd.f32 %v1539_v17, %v1511_v25 }
  0xeb   : > { %v1590_v8 = vpop.f32.mrf.mxu1 }
  0xec   : > { %v3468_v22 = vadd.f32 %v1568_v32, %v1540_v60  ;;  %v1591_v0 = vadd.f32 %v1590_v8, %v1562_v61 }
  0xef   : > { %v1513_v41 = vpop.f32.mrf.mxu2 }
  0xf0   : > { %v1514_v6 = vadd.f32 %v1513_v41, %v1485_v15  ;;  %v3488_v15 = vld [vmem:[%s3697_s3] ss:$0 sm:$0xff] }
  0xf1   : > { %v1573_v43 = vpop.f32.mrf.mxu0  ;;  %v1648_v11 = vpop.f32.mrf.mxu3 }
  0xf2   : > { %v1543_v12 = vadd.f32 %v1542_v54, %v1514_v6 }
  0xf3   : > { %v1592_v13 = vpop.f32.mrf.mxu1 }
  0xf4   : > { %v3470_v26 = vadd.f32 %v1571_v3, %v1543_v12  ;;  %v1593_v23 = vadd.f32 %v1592_v13, %v1564_v30 }
  0xf7   : > { %v1515_v19 = vpop.f32.mrf.mxu2 }
  0xf8   : > { %v1516_v27 = vadd.f32 %v1515_v19, %v1487_v52 }
  0xf9   : > { %v1576_v57 = vpop.f32.mrf.mxu0  ;;  %v1650_v5 = vpop.f32.mrf.mxu3 }
  0xfa   : > { %v1545_v10 = vadd.f32 %v1544_v9, %v1516_v27 }
  0xfb   : > { %v1595_v45 = vpop.f32.mrf.mxu1 }
  0xfc   : > { %v3474_v42 = vadd.f32 %v1573_v43, %v1545_v10  ;;  %v1596_v38 = vadd.f32 %v1595_v45, %v1567_v20 }
  0xff   : > { %v1518_v34 = vpop.f32.mrf.mxu2 }
 0x100   : > { %v1519_v46 = vadd.f32 %v1518_v34, %v1490_v31 }
 0x101   : > { %v3476_v24 = vpop.f32.mrf.mxu0  ;;  %v1653_v14 = vpop.f32.mrf.mxu3 }
 0x102   : > { %v1548_v37 = vadd.f32 %v1547_v33, %v1519_v46 }
 0x103   : > { %v1597_v21 = vpop.f32.mrf.mxu1 }
 0x104   : > { %v3478_v47 = vadd.f32 %v1576_v57, %v1548_v37  ;;  %v1598_v34 = vadd.f32 %v1597_v21, %v3468_v22 }
 0x107   : > { %v1520_v7 = vpop.f32.mrf.mxu2 }
 0x108   : > { %v1521_v32 = vadd.f32 %v1520_v7, %v1492_v4 }
 0x109   : > { %v1677_v53 = vpop.f32.mrf.mxu0  ;;  %v1655_v6 = vpop.f32.mrf.mxu3 }
 0x10a   : > { %v1550_v10 = vadd.f32 %v3472_v28, %v1521_v32 }
 0x10b   : > { %v1600_v56 = vpop.f32.mrf.mxu1 }
 0x10c   : > { %v1601_v37 = vadd.f32 %v1600_v56, %v3470_v26  ;;  %v1579_v22 = vadd.f32 %v3476_v24, %v1550_v10 }
 0x10f   : > { %v1619_v49 = vpop.f32.mrf.mxu2 }
 0x110   : > { %v1620_v44 = vadd.f32 %v1619_v49, %v1591_v0 }
 0x111   : > { %v1679_v48 = vpop.f32.mrf.mxu0  ;;  %v1658_v4 = vpop.f32.mrf.mxu3 }
 0x112   : > { %v1649_v16 = vadd.f32 %v1648_v11, %v1620_v44 }
 0x113   : > { %v1602_v30 = vpop.f32.mrf.mxu1 }
 0x114   : > { %v1678_v63 = vadd.f32 %v1677_v53, %v1649_v16  ;;  %v3504_v28 = vadd.f32 %v1602_v30, %v3474_v42 }
 0x116   : > { %v1702_v1 = vmul.f32 %v3483_v55, %v1678_v63 }
 0x117   : > { %v1621_v62 = vpop.f32.mrf.mxu2 }
 0x118   : > { %v1713_v17 = vadd.f32 %v3488_v15, %v1702_v1  ;;  %v1622_v18 = vadd.f32 %v1621_v62, %v1593_v23 }
 0x119   : > { %v1682_v61 = vpop.f32.mrf.mxu0 }
 0x11a   : > { %vm1721_vm0 = vcmp.ge.f32.partialorder %v1713_v17, 0.0  ;;  %v1729_v52 = vmul.f32 0.1, %v1713_v17  ;;  %v1651_v2 = vadd.f32 %v1650_v5, %v1622_v18 }
 0x11b   : > { %v1605_v16 = vpop.f32.mrf.mxu1 }
 0x11c   : > { %v1737_v39 = vsel %vm1721_vm0, %v1713_v17, %v1729_v52  ;;  %v1680_v36 = vadd.f32 %v1679_v48, %v1651_v2  ;;  %v3511_v18 = vadd.f32 %v1605_v16, %v3478_v47  ;;  %v1660_v16 = vpop.f32.mrf.mxu3 }
 0x11d   : > { %v1753_v29 = vrot.slane %v1737_v39, 2  ;;  %v1754_v31 = vrot.slane %v1737_v39, 4  ;;  %v1755_v40 = vrot.slane %v1737_v39, 6  ;;  %v1802_v54 = vsel %vm1801_vm1, %v1737_v39, -inf }
 0x11e   : > { %v1803_v35 = vrot.slane %v1802_v54, 4  ;;  %v1703_v59 = vmul.f32 %v3483_v55, %v1680_v36 }
 0x11f   : > { %v1809_v9 = vsel %vm1801_vm1, %v1753_v29, -inf  ;;  %v1816_v50 = vsel %vm1801_vm1, %v1754_v31, -inf  ;;  %v1823_v25 = vsel %vm1801_vm1, %v1755_v40, -inf  ;;  %v1624_v51 = vpop.f32.mrf.mxu2 }
 0x120   : > { %v1804_v58 = vmax.f32 %v1802_v54, %v1803_v35  ;;  %v1810_v60 = vrot.slane %v1809_v9, 4  ;;  %v1817_v3 = vrot.slane %v1816_v50, 4  ;;  %v1824_v8 = vrot.slane %v1823_v25, 4 }
 0x121   : > { %v1714_v41 = vadd.f32 %v3488_v15, %v1703_v59  ;;  %v1625_v33 = vadd.f32 %v1624_v51, %v1596_v38  ;;  %v1684_v27 = vpop.f32.mrf.mxu0 }
 0x122   : > { %v1805_v20 = vrot.slane %v1804_v58, 2  ;;  %v1811_v12 = vmax.f32 %v1809_v9, %v1810_v60  ;;  %v1818_v43 = vmax.f32 %v1816_v50, %v1817_v3  ;;  %v1825_v45 = vmax.f32 %v1823_v25, %v1824_v8 }
 0x123   : > { %vm1722_vm2 = vcmp.ge.f32.partialorder %v1714_v41, 0.0  ;;  %v1730_v13 = vmul.f32 0.1, %v1714_v41  ;;  %v1654_v19 = vadd.f32 %v1653_v14, %v1625_v33  ;;  %v1607_v10 = vpop.f32.mrf.mxu1 }
 0x124   : > { %v1812_v57 = vrot.slane %v1811_v12, 2  ;;  %v1806_v11 = vmax.f32 %v1804_v58, %v1805_v20  ;;  %v1819_v7 = vrot.slane %v1818_v43, 2  ;;  %v1826_v23 = vrot.slane %v1825_v45, 2 }
 0x125   : > { %v1738_v46 = vsel %vm1722_vm2, %v1714_v41, %v1730_v13  ;;  %v1683_v53 = vadd.f32 %v1682_v61, %v1654_v19  ;;  %v2744_v41 = vld [vmem:[%s3698_s4 + $0x38] sm:$0xff] }
 0x126   : > { %v1756_v5 = vrot.slane %v1738_v46, 2  ;;  %v1757_v0 = vrot.slane %v1738_v46, 4  ;;  %v1758_v49 = vrot.slane %v1738_v46, 6  ;;  %v1830_v44 = vsel %vm1801_vm1, %v1738_v46, -inf  ;;  %2181 = vmatpush.bf16.msra.mxu1 %v2744_v41 }
 0x127   : > { %v1626_v48 = vpop.f32.mrf.mxu2  ;;  %v1813_v63 = vmax.f32 %v1811_v12, %v1812_v57  ;;  %v1831_v21 = vrot.slane %v1830_v44, 4  ;;  %v1807_v62 = vrot.slane %v1806_v11, 1  ;;  %v1820_v14 = vmax.f32 %v1818_v43, %v1819_v7 }
 0x128   : > { %v1837_v26 = vsel %vm1801_vm1, %v1756_v5, -inf  ;;  %v1844_v56 = vsel %vm1801_vm1, %v1757_v0, -inf  ;;  %v1851_v1 = vsel %vm1801_vm1, %v1758_v49, -inf  ;;  %v1704_v42 = vmul.f32 %v3483_v55, %v1683_v53 }
 0x129   : > { %v1838_v17 = vrot.slane %v1837_v26, 4  ;;  %v1832_v52 = vmax.f32 %v1830_v44, %v1831_v21  ;;  %v1845_v2 = vrot.slane %v1844_v56, 4  ;;  %v1852_v61 = vrot.slane %v1851_v1, 4  ;;  %v1687_v38 = vpop.f32.mrf.mxu0 }
 0x12a   : > { %v1814_v24 = vrot.slane %v1813_v63, 1  ;;  %v1827_v39 = vmax.f32 %v1825_v45, %v1826_v23  ;;  %v1627_v29 = vadd.f32 %v1626_v48, %v1598_v34  ;;  %v1715_v30 = vadd.f32 %v3488_v15, %v1704_v42 }
 0x12b   : > { %v1839_v36 = vmax.f32 %v1837_v26, %v1838_v17  ;;  %v1833_v31 = vrot.slane %v1832_v52, 2  ;;  %v1846_v40 = vmax.f32 %v1844_v56, %v1845_v2  ;;  %v1853_v54 = vmax.f32 %v1851_v1, %v1852_v61 }
 0x12c   : > { %v1808_v35 = vmax.f32 %v1806_v11, %v1807_v62  ;;  %v1821_v59 = vrot.slane %v1820_v14, 1  ;;  %v1656_v32 = vadd.f32 %v1655_v6, %v1627_v29  ;;  %vm1723_vm3 = vcmp.ge.f32.partialorder %v1715_v30, 0.0 }
 0x12d   : > { %v1840_v47 = vrot.slane %v1839_v36, 2  ;;  %v1834_v9 = vmax.f32 %v1832_v52, %v1833_v31  ;;  %v1847_v50 = vrot.slane %v1846_v40, 2  ;;  %v1854_v25 = vrot.slane %v1853_v54, 2 }
 0x12e   : > { %v1731_v60 = vmul.f32 0.1, %v1715_v30  ;;  %v1685_v3 = vadd.f32 %v1684_v27, %v1656_v32  ;;  %v1815_v33 = vmax.f32 %v1813_v63, %v1814_v24  ;;  %v1828_v20 = vrot.slane %v1827_v39, 1 }
 0x12f   : > { %v1629_v51 = vpop.f32.mrf.mxu2  ;;  %v1841_v58 = vmax.f32 %v1839_v36, %v1840_v47  ;;  %v1835_v12 = vrot.slane %v1834_v9, 1  ;;  %v1848_v43 = vmax.f32 %v1846_v40, %v1847_v50  ;;  %v1855_v19 = vmax.f32 %v1853_v54, %v1854_v25 }
 0x130   : > { %v1630_v8 = vadd.f32 %v1629_v51, %v1601_v37  ;;  %v1739_v6 = vsel %vm1723_vm3, %v1715_v30, %v1731_v60  ;;  %v1705_v57 = vmul.f32 %v3483_v55, %v1685_v3  ;;  %v3520_v5 = vmax.f32 %v1820_v14, %v1821_v59 }
 0x131   : > { %v1842_v13 = vrot.slane %v1841_v58, 1  ;;  %v1836_v45 = vmax.f32 %v1834_v9, %v1835_v12  ;;  %v1849_v34 = vrot.slane %v1848_v43, 1  ;;  %v1759_v46 = vrot.slane %v1739_v6, 2  ;;  %v3531_v14 = vpop.f32.mrf.mxu0  ;;  %v2743_v9 = vld [vmem:[%s3698_s4 + $0x30] sm:$0xff]  ;;  %v1663_v12 = vpop.f32.mrf.mxu3 }
 0x132   : > { %v1659_v27 = vadd.f32 %v1658_v4, %v1630_v8  ;;  %v1760_v11 = vrot.slane %v1739_v6, 4  ;;  %v1761_v7 = vrot.slane %v1739_v6, 6  ;;  %v1858_v53 = vsel %vm1801_vm1, %v1739_v6, -inf  ;;  %2182 = vmatpush.bf16.msra.mxu1 %v2743_v9  ;;  %v2741_v9 = vld [vmem:[%s3698_s4 + $0x20] sm:$0xff] }
 0x133   : > { %v1843_v37 = vmax.f32 %v1841_v58, %v1842_v13  ;;  %v3522_v0 = vmax.f32 %v1808_v35, %v1836_v45  ;;  %v1859_v49 = vrot.slane %v1858_v53, 4  ;;  %v3524_v44 = vadd.f32 %v1607_v10, %v1579_v22 }
 0x134   : > { %v1865_v63 = vsel %vm1801_vm1, %v1759_v46, -inf  ;;  %v1872_v23 = vsel %vm1801_vm1, %v1760_v11, -inf  ;;  %v1879_v21 = vsel %vm1801_vm1, %v1761_v7, -inf  ;;  %v1856_v26 = vrot.slane %v1855_v19, 1 }
 0x135   : > { %v3526_v48 = vmax.f32 %v1815_v33, %v1843_v37  ;;  %v1860_v56 = vmax.f32 %v1858_v53, %v1859_v49  ;;  %v1866_v1 = vrot.slane %v1865_v63, 4  ;;  %v1873_v62 = vrot.slane %v1872_v23, 4  ;;  %v2742_v37 = vld [vmem:[%s3698_s4 + $0x28] sm:$0xff] }
 0x136   : > { %v3533_v52 = vmax.f32 %v1827_v39, %v1828_v20  ;;  %v3535_v22 = vmax.f32 %v1848_v43, %v1849_v34  ;;  %v1716_v2 = vadd.f32 %v3488_v15, %v1705_v57  ;;  %v1688_v61 = vadd.f32 %v1687_v38, %v1659_v27  ;;  %2183 = vmatpush.bf16.msra.mxu1 %v2742_v37 }
 0x137   : > { %v1631_v17 = vpop.f32.mrf.mxu2  ;;  %v1861_v42 = vrot.slane %v1860_v56, 2  ;;  %v1867_v4 = vmax.f32 %v1865_v63, %v1866_v1  ;;  %v3538_v24 = vmax.f32 %v1872_v23, %v1873_v62  ;;  %v1880_v36 = vrot.slane %v1879_v21, 4 }
 0x138   : > { %vm1724_vm4 = vcmp.ge.f32.partialorder %v1716_v2, 0.0  ;;  %v1732_v29 = vmul.f32 0.1, %v1716_v2  ;;  %v1706_v31 = vmul.f32 %v3483_v55, %v1688_v61  ;;  %v1632_v40 = vadd.f32 %v1631_v17, %v3504_v28 }
 0x139   : > { %v3542_v54 = vmax.f32 %v1855_v19, %v1856_v26  ;;  %v2042_v39 = vpack.c.bf16 %v3522_v0, %v3522_v0  ;;  %v2043_v30 = vpack.c.bf16 %v3526_v48, %v3526_v48  ;;  %v1862_v38 = vmax.f32 %v1860_v56, %v1861_v42  ;;  %v1692_v27 = vpop.f32.mrf.mxu0 }
 0x13a   : > { %v1868_v35 = vrot.slane %v1867_v4, 2  ;;  %v1875_v59 = vrot.slane %v3538_v24, 2  ;;  %v1740_v47 = vsel %vm1724_vm4, %v1716_v2, %v1732_v29  ;;  %v1717_v32 = vadd.f32 %v3488_v15, %v1706_v31  ;;  %2184 = vmatpush.bf16.msra.mxu1 %v2741_v9 }
 0x13b   : > { %v1762_v28 = vrot.slane %v1740_v47, 2  ;;  %v1763_v50 = vrot.slane %v1740_v47, 4  ;;  %v1661_v25 = vadd.f32 %v1660_v16, %v1632_v40  ;;  %v3553_v51 = vmax.f32 %v1879_v21, %v1880_v36 }
 0x13c   : > { %v1764_v58 = vrot.slane %v1740_v47, 6  ;;  %v1886_v60 = vsel %vm1801_vm1, %v1740_v47, -inf  ;;  %vm1725_vm5 = vcmp.ge.f32.partialorder %v1717_v32, 0.0  ;;  %v1733_v3 = vmul.f32 0.1, %v1717_v32 }
 0x13d   : > { %v1863_v8 = vrot.slane %v1862_v38, 1  ;;  %v1887_v41 = vrot.slane %v1886_v60, 4  ;;  %v1893_v33 = vsel %vm1801_vm1, %v1762_v28, -inf  ;;  %v1900_v20 = vsel %vm1801_vm1, %v1763_v50, -inf }
 0x13e   : > { %v3558_v13 = vmax.f32 %v1867_v4, %v1868_v35  ;;  %v1894_v19 = vrot.slane %v1893_v33, 4  ;;  %v1901_v6 = vrot.slane %v1900_v20, 4  ;;  %v1741_v10 = vsel %vm1725_vm5, %v1717_v32, %v1733_v3 }
 0x13f   : > { %v1634_v43 = vpop.f32.mrf.mxu2  ;;  %v1888_v57 = vmax.f32 %v1886_v60, %v1887_v41  ;;  %v3561_v45 = vsel %vm1801_vm1, %v1764_v58, -inf  ;;  %v1765_v34 = vrot.slane %v1741_v10, 2  ;;  %v1766_v46 = vrot.slane %v1741_v10, 4  ;;  %v1665_v41 = vpop.f32.mrf.mxu3 }
 0x140   : > { %v1895_v11 = vmax.f32 %v1893_v33, %v1894_v19  ;;  %v3566_v7 = vmax.f32 %v1900_v20, %v1901_v6  ;;  %v1767_v53 = vrot.slane %v1741_v10, 6  ;;  %v1914_v49 = vsel %vm1801_vm1, %v1741_v10, -inf }
 0x141   : > { %v1889_v16 = vrot.slane %v1888_v57, 2  ;;  %v1915_v63 = vrot.slane %v1914_v49, 4  ;;  %v1921_v23 = vsel %vm1801_vm1, %v1765_v34, -inf  ;;  %v1928_v21 = vsel %vm1801_vm1, %v1766_v46, -inf }
 0x142   : > { %v3571_v26 = vmax.f32 %v1862_v38, %v1863_v8  ;;  %v1908_v56 = vrot.slane %v3561_v45, 4  ;;  %v1922_v1 = vrot.slane %v1921_v23, 4  ;;  %v1929_v62 = vrot.slane %v1928_v21, 4 }
 0x143   : > { %v1890_v17 = vmax.f32 %v1888_v57, %v1889_v16  ;;  %v1916_v2 = vmax.f32 %v1914_v49, %v1915_v63  ;;  %v1935_v61 = vsel %vm1801_vm1, %v1767_v53, -inf  ;;  %v1690_v42 = vadd.f32 %v3531_v14, %v1661_v25  ;;  %v1694_v57 = vpop.f32.mrf.mxu0 }
 0x144   : > { %v1896_v4 = vrot.slane %v1895_v11, 2  ;;  %v1923_v36 = vmax.f32 %v1921_v23, %v1922_v1  ;;  %v1930_v29 = vmax.f32 %v1928_v21, %v1929_v62  ;;  %v1936_v31 = vrot.slane %v1935_v61, 4 }
 0x145   : > { %v1903_v40 = vrot.slane %v3566_v7, 2  ;;  %v1917_v35 = vrot.slane %v1916_v2, 2  ;;  %v1707_v38 = vmul.f32 %v3483_v55, %v1690_v42  ;;  %v1635_v47 = vadd.f32 %v1634_v43, %v3511_v18 }
 0x146   : > { %v1924_v28 = vrot.slane %v1923_v36, 2  ;;  %v1931_v50 = vrot.slane %v1930_v29, 2  ;;  %v1937_v58 = vmax.f32 %v1935_v61, %v1936_v31  ;;  %v1891_v25 = vrot.slane %v1890_v17, 1 }
 0x147   : > { %v1636_v32 = vpop.f32.mrf.mxu2  ;;  %v1918_v60 = vmax.f32 %v1916_v2, %v1917_v35  ;;  %v1718_v3 = vadd.f32 %v3488_v15, %v1707_v38  ;;  %v1664_v8 = vadd.f32 %v1663_v12, %v1635_v47  ;;  %v3587_v34 = vmax.f32 %v1895_v11, %v1896_v4  ;;  %v2738_v47 = vld [vmem:[%s3698_s4 + $0x8] sm:$0xff] }
 0x148   : > { %v1637_v14 = vadd.f32 %v1636_v32, %v3524_v44  ;;  %v1925_v33 = vmax.f32 %v1923_v36, %v1924_v28  ;;  %v1932_v20 = vmax.f32 %v1930_v29, %v1931_v50  ;;  %v1938_v18 = vrot.slane %v1937_v58, 2  ;;  %v2740_v44 = vld [vmem:[%s3698_s4 + $0x18] sm:$0xff] }
 0x149   : > { %v1919_v19 = vrot.slane %v1918_v60, 1  ;;  %vm1726_vm6 = vcmp.ge.f32.partialorder %v1718_v3, 0.0  ;;  %v1734_v6 = vmul.f32 0.1, %v1718_v3  ;;  %v1693_v10 = vadd.f32 %v1692_v27, %v1664_v8  ;;  %2185 = vmatpush.bf16.msra.mxu1 %v2740_v44  ;;  %v2739_v27 = vld [vmem:[%s3698_s4 + $0x10] sm:$0xff] }
 0x14a   : > { %v1666_v43 = vadd.f32 %v1665_v41, %v1637_v14  ;;  %v1926_v46 = vrot.slane %v1925_v33, 1  ;;  %v1933_v37 = vrot.slane %v1932_v20, 1  ;;  %v3589_v53 = vmax.f32 %v1890_v17, %v1891_v25 }
 0x14b   : > { %v1939_v49 = vmax.f32 %v1937_v58, %v1938_v18  ;;  %v1742_v16 = vsel %vm1726_vm6, %v1718_v3, %v1734_v6  ;;  %v1708_v63 = vmul.f32 %v3483_v55, %v1693_v10  ;;  %v1920_v23 = vmax.f32 %v1918_v60, %v1919_v19  ;;  %v2737_v19 = vld [vmem:[%s3698_s4] sm:$0xff] }
 0x14c   : > { %v1695_v12 = vadd.f32 %v1694_v57, %v1666_v43  ;;  %v3595_v21 = vmax.f32 %v1925_v33, %v1926_v46  ;;  %v1768_v1 = vrot.slane %v1742_v16, 2  ;;  %v1870_v11 = vrot.slane %v3558_v13, 1 }
 0x14d   : > { %v1769_v62 = vrot.slane %v1742_v16, 4  ;;  %v1770_v2 = vrot.slane %v1742_v16, 6  ;;  %v1942_v17 = vsel %vm1801_vm1, %v1742_v16, -inf  ;;  %v1719_v61 = vadd.f32 %v3488_v15, %v1708_v63  ;;  %2186 = vmatpush.bf16.msra.mxu1 %v2739_v27 }
 0x14e   : > { %v3600_v42 = vmax.f32 %v1932_v20, %v1933_v37  ;;  %v1943_v4 = vrot.slane %v1942_v17, 4  ;;  %v1949_v36 = vsel %vm1801_vm1, %v1768_v1, -inf  ;;  %v1709_v29 = vmul.f32 %v3483_v55, %v1695_v12 }
 0x14f   : > { %v1950_v31 = vrot.slane %v1949_v36, 4  ;;  %v1956_v35 = vsel %vm1801_vm1, %v1769_v62, -inf  ;;  %v1963_v38 = vsel %vm1801_vm1, %v1770_v2, -inf  ;;  %vm1727_vm7 = vcmp.ge.f32.partialorder %v1719_v61, 0.0 }
 0x150   : > { %v1944_v32 = vmax.f32 %v1942_v17, %v1943_v4  ;;  %v1957_v9 = vrot.slane %v1956_v35, 4  ;;  %v1964_v28 = vrot.slane %v1963_v38, 4  ;;  %v1735_v50 = vmul.f32 0.1, %v1719_v61 }
 0x151   : > { %v1940_v58 = vrot.slane %v1939_v49, 1  ;;  %v1951_v14 = vmax.f32 %v1949_v36, %v1950_v31  ;;  %v1720_v25 = vadd.f32 %v3488_v15, %v1709_v29  ;;  %v1876_v55 = vmax.f32 %v3538_v24, %v1875_v59  ;;  %2187 = vmatpush.bf16.msra.mxu1 %v2738_v47 }
 0x152   : > { %v1945_v60 = vrot.slane %v1944_v32, 2  ;;  %v1958_v3 = vmax.f32 %v1956_v35, %v1957_v9  ;;  %v1965_v8 = vmax.f32 %v1963_v38, %v1964_v28  ;;  %v1743_v41 = vsel %vm1727_vm7, %v1719_v61, %v1735_v50 }
 0x153   : > { %v1952_v33 = vrot.slane %v1951_v14, 2  ;;  %v1771_v20 = vrot.slane %v1743_v41, 2  ;;  %v1772_v18 = vrot.slane %v1743_v41, 4  ;;  %v1773_v43 = vrot.slane %v1743_v41, 6 }
 0x154   : > { %v1946_v6 = vmax.f32 %v1944_v32, %v1945_v60  ;;  %v1959_v10 = vrot.slane %v1958_v3, 2  ;;  %v1966_v15 = vrot.slane %v1965_v8, 2  ;;  %v1970_v57 = vsel %vm1801_vm1, %v1743_v41, -inf }
 0x155   : > { %v1953_v44 = vmax.f32 %v1951_v14, %v1952_v33  ;;  %v1971_v24 = vrot.slane %v1970_v57, 4  ;;  %v1977_v59 = vsel %vm1801_vm1, %v1771_v20, -inf  ;;  %v1984_v46 = vsel %vm1801_vm1, %v1772_v18, -inf  ;;  %2188 = vmatpush.bf16.msra.mxu1 %v2737_v19 }
 0x156   : > { %v1947_v37 = vrot.slane %v1946_v6, 1  ;;  %v1960_v12 = vmax.f32 %v1958_v3, %v1959_v10  ;;  %v1967_v16 = vmax.f32 %v1965_v8, %v1966_v15  ;;  %v1978_v63 = vrot.slane %v1977_v59, 4 }
 0x157   : > { %v1954_v27 = vrot.slane %v1953_v44, 1  ;;  %v1972_v1 = vmax.f32 %v1970_v57, %v1971_v24  ;;  %v1985_v62 = vrot.slane %v1984_v46, 4  ;;  %v1991_v2 = vsel %vm1801_vm1, %v1773_v43, -inf }
 0x158   : > { %v1948_v17 = vmax.f32 %v1946_v6, %v1947_v37  ;;  %v1961_v61 = vrot.slane %v1960_v12, 1  ;;  %v1968_v4 = vrot.slane %v1967_v16, 1  ;;  %v1979_v36 = vmax.f32 %v1977_v59, %v1978_v63 }
 0x159   : > { %v3620_v29 = vmax.f32 %v1939_v49, %v1940_v58  ;;  %v1955_v31 = vmax.f32 %v1953_v44, %v1954_v27  ;;  %v1973_v35 = vrot.slane %v1972_v1, 2  ;;  %v1986_v38 = vmax.f32 %v1984_v46, %v1985_v62 }
 0x15a   : > { %v3622_v47 = vmax.f32 %v1920_v23, %v1948_v17  ;;  %v1980_v32 = vrot.slane %v1979_v36, 2  ;;  %v1992_v9 = vrot.slane %v1991_v2, 4  ;;  %v3625_v28 = vmax.f32 %v3558_v13, %v1870_v11 }
 0x15b   : > { %v3627_v50 = vmax.f32 %v1960_v12, %v1961_v61  ;;  %v3630_v14 = vmax.f32 %v3595_v21, %v1955_v31  ;;  %v1974_v60 = vmax.f32 %v1972_v1, %v1973_v35  ;;  %vm1728_vm8 = vcmp.ge.f32.partialorder %v1720_v25, 0.0 }
 0x15c   : > { %v3632_v3 = vmax.f32 %v1967_v16, %v1968_v4  ;;  %v1987_v49 = vrot.slane %v1986_v38, 2  ;;  %v1736_v58 = vmul.f32 0.1, %v1720_v25  ;;  %v1877_v8 = vrot.slane %v1876_v55, 1 }
 0x15d   : > { %v2050_v23 = vpack.c.bf16 %v3622_v47, %v3622_v47  ;;  %v1975_v41 = vrot.slane %v1974_v60, 1  ;;  %v1882_v33 = vrot.slane %v3553_v51, 2  ;;  %v1898_v13 = vrot.slane %v3587_v34, 1 }
 0x15e   : > { %v1981_v11 = vmax.f32 %v1979_v36, %v1980_v32  ;;  %v1744_v20 = vsel %vm1728_vm8, %v1720_v25, %v1736_v58  ;;  %v1878_v18 = vmax.f32 %v1876_v55, %v1877_v8  ;;  %v1904_v21 = vmax.f32 %v3566_v7, %v1903_v40 }
 0x15f   : > { %v1976_v43 = vmax.f32 %v1974_v60, %v1975_v41  ;;  %v1774_v19 = vrot.slane %v1744_v20, 2  ;;  %v1775_v6 = vrot.slane %v1744_v20, 4  ;;  %v1776_v10 = vrot.slane %v1744_v20, 6 }
 0x160   : > { %v1998_v15 = vsel %vm1801_vm1, %v1744_v20, -inf  ;;  %v1883_v57 = vmax.f32 %v3553_v51, %v1882_v33  ;;  %v1899_v44 = vmax.f32 %v3587_v34, %v1898_v13  ;;  %v1905_v24 = vrot.slane %v1904_v21, 1 }
 0x161   : > { %v1999_v59 = vrot.slane %v1998_v15, 4  ;;  %v2005_v46 = vsel %vm1801_vm1, %v1774_v19, -inf  ;;  %v2012_v25 = vsel %vm1801_vm1, %v1775_v6, -inf  ;;  %v2019_v55 = vsel %vm1801_vm1, %v1776_v10, -inf }
 0x162   : > { %v2006_v37 = vrot.slane %v2005_v46, 4  ;;  %v2013_v7 = vrot.slane %v2012_v25, 4  ;;  %v2020_v40 = vrot.slane %v2019_v55, 4  ;;  %v1884_v12 = vrot.slane %v1883_v57, 1 }
 0x163   : > { %v2000_v16 = vmax.f32 %v1998_v15, %v1999_v59  ;;  %v1906_v63 = vmax.f32 %v1904_v21, %v1905_v24  ;;  %v1909_v51 = vmax.f32 %v3561_v45, %v1908_v56  ;;  %v1982_v27 = vrot.slane %v1981_v11, 1 }
 0x164   : > { %v2007_v34 = vmax.f32 %v2005_v46, %v2006_v37  ;;  %v2014_v1 = vmax.f32 %v2012_v25, %v2013_v7  ;;  %v1885_v62 = vmax.f32 %v1883_v57, %v1884_v12  ;;  %v1988_v17 = vmax.f32 %v1986_v38, %v1987_v49 }
 0x165   : > { %v2001_v61 = vrot.slane %v2000_v16, 2  ;;  %v1910_v4 = vrot.slane %v1909_v51, 2  ;;  %v1983_v36 = vmax.f32 %v1981_v11, %v1982_v27  ;;  %v1993_v31 = vmax.f32 %v1991_v2, %v1992_v9 }
 0x166   : > { %v2008_v35 = vrot.slane %v2007_v34, 2  ;;  %v2015_v32 = vrot.slane %v2014_v1, 2  ;;  %v1989_v60 = vrot.slane %v1988_v17, 1  ;;  %v2021_v58 = vmax.f32 %v2019_v55, %v2020_v40 }
 0x167   : > { %v2002_v8 = vmax.f32 %v2000_v16, %v2001_v61  ;;  %v1911_v41 = vmax.f32 %v1909_v51, %v1910_v4  ;;  %v1994_v33 = vrot.slane %v1993_v31, 2  ;;  %v2028_v13 = vmax.f32 %v3520_v5, %v3535_v22 }
 0x168   : > { %v2009_v45 = vmax.f32 %v2007_v34, %v2008_v35  ;;  %v1990_v56 = vmax.f32 %v1988_v17, %v1989_v60  ;;  %v2016_v20 = vmax.f32 %v2014_v1, %v2015_v32  ;;  %v2022_v21 = vrot.slane %v2021_v58, 2 }
 0x169   : > { %v2003_v19 = vrot.slane %v2002_v8, 1  ;;  %v1912_v38 = vrot.slane %v1911_v41, 1  ;;  %v1995_v49 = vmax.f32 %v1993_v31, %v1994_v33  ;;  %v2029_v2 = vmax.f32 %v3533_v52, %v3542_v54 }
 0x16a   : > { %v2010_v9 = vrot.slane %v2009_v45, 1  ;;  %v2017_v11 = vrot.slane %v2016_v20, 1  ;;  %v2023_v6 = vmax.f32 %v2021_v58, %v2022_v21  ;;  %v2030_v10 = vmax.f32 %v3571_v26, %v3589_v53 }
 0x16b   : > { %v2004_v15 = vmax.f32 %v2002_v8, %v2003_v19  ;;  %v1913_v57 = vmax.f32 %v1911_v41, %v1912_v38  ;;  %v1996_v24 = vrot.slane %v1995_v49, 1  ;;  %v2031_v5 = vmax.f32 %v3625_v28, %v1899_v44 }
 0x16c   : > { %v2011_v22 = vmax.f32 %v2009_v45, %v2010_v9  ;;  %v2018_v59 = vmax.f32 %v2016_v20, %v2017_v11  ;;  %v2024_v46 = vrot.slane %v2023_v6, 1  ;;  %v2032_v25 = vmax.f32 %v1878_v18, %v1906_v63  ;;  %v2780_v11 = vld [vmem:[%s3699_s5] ss:$0 sm:$0xff] }
 0x16d   : > { %v1997_v55 = vmax.f32 %v1995_v49, %v1996_v24  ;;  %v2033_v37 = vmax.f32 %v1885_v62, %v1913_v57  ;;  %v2036_v52 = vmax.f32 %v3600_v42, %v3627_v50  ;;  %v2037_v54 = vmax.f32 %v3620_v29, %v3632_v3 }
 0x16e   : > { %v2025_v7 = vmax.f32 %v2023_v6, %v2024_v46  ;;  %v2038_v40 = vmax.f32 %v1976_v43, %v2004_v15  ;;  %v2039_v26 = vmax.f32 %v1983_v36, %v2011_v22  ;;  %v2040_v53 = vmax.f32 %v1990_v56, %v2018_v59 }
 0x16f   : > { %v2044_v12 = vpack.c.bf16 %v2028_v13, %v2028_v13  ;;  %v2051_v28 = vpack.c.bf16 %v3630_v14, %v3630_v14  ;;  %v2045_v16 = vpack.c.bf16 %v2029_v2, %v2029_v2  ;;  %v2046_v51 = vpack.c.bf16 %v2030_v10, %v2030_v10 }
 0x170   : > { %v2041_v44 = vmax.f32 %v1997_v55, %v2025_v7  ;;  %v2094_v18 = vunpack.c.l.b16 %v2042_v39  ;;  %v2047_v63 = vpack.c.bf16 %v2031_v5, %v2031_v5  ;;  %v2048_v42 = vpack.c.bf16 %v2032_v25, %v2032_v25 }
 0x171   : > { %v2052_v50 = vpack.c.bf16 %v2036_v52, %v2036_v52  ;;  %v2102_v29 = vunpack.c.l.b16 %v2050_v23  ;;  %v2049_v3 = vpack.c.bf16 %v2033_v37, %v2033_v37  ;;  %v2053_v43 = vpack.c.bf16 %v2037_v54, %v2037_v54 }
 0x172   : > { %v2095_v14 = vunpack.c.l.b16 %v2043_v30  ;;  %v2054_v27 = vpack.c.bf16 %v2038_v40, %v2038_v40  ;;  %v2055_v34 = vpack.c.bf16 %v2039_v26, %v2039_v26  ;;  %v2056_v1 = vpack.c.bf16 %v2040_v53, %v2040_v53 }
 0x173   : > { %v2096_v62 = vunpack.c.l.b16 %v2044_v12  ;;  %v2057_v17 = vpack.c.bf16 %v2041_v44, %v2041_v44  ;;  %v2097_v0 = vunpack.c.l.b16 %v2045_v16  ;;  %v2098_v39 = vunpack.c.l.b16 %v2046_v51 }
 0x174   : > { %v2103_v61 = vunpack.c.l.b16 %v2051_v28  ;;  %v2099_v4 = vunpack.c.l.b16 %v2047_v63  ;;  %v2100_v36 = vunpack.c.l.b16 %v2048_v42  ;;  %v2104_v31 = vunpack.c.l.b16 %v2052_v50 }
 0x175   : > { %v2111_v47 = vsel %vm2110_vm9, %v2095_v14, %v2094_v18  ;;  %v2105_v23 = vunpack.c.l.b16 %v2053_v43  ;;  %v2106_v35 = vunpack.c.l.b16 %v2054_v27  ;;  %v2107_v30 = vunpack.c.l.b16 %v2055_v34 }
 0x176   : > { %v2113_v48 = vsel %vm2112_vm10, %v2096_v62, %v2111_v47  ;;  %v2124_v60 = vsel %vm2110_vm9, %v2103_v61, %v2102_v29  ;;  %v2108_v58 = vunpack.c.l.b16 %v2056_v1  ;;  %v2101_v33 = vunpack.c.l.b16 %v2049_v3 }
 0x177   : > { %v2115_v32 = vsel %vm2114_vm11, %v2097_v0, %v2113_v48  ;;  %v2125_v41 = vsel %vm2112_vm10, %v2104_v31, %v2124_v60  ;;  %v2109_v21 = vunpack.c.l.b16 %v2057_v17 }
 0x178   : > { %v2117_v8 = vsel %vm2116_vm12, %v2098_v39, %v2115_v32  ;;  %v2126_v45 = vsel %vm2114_vm11, %v2105_v23, %v2125_v41 }
 0x179   : > { %v2119_v13 = vsel %vm2118_vm13, %v2099_v4, %v2117_v8  ;;  %v2127_v20 = vsel %vm2116_vm12, %v2106_v35, %v2126_v45 }
 0x17a   : > { %v2121_v56 = vsel %vm2120_vm14, %v2100_v36, %v2119_v13  ;;  %v2128_v38 = vsel %vm2118_vm13, %v2107_v30, %v2127_v20 }
 0x17b   : > { %v2123_v19 = vsel %vm2122_vm15, %v2101_v33, %v2121_v56  ;;  %v2129_v49 = vsel %vm2120_vm14, %v2108_v58, %v2128_v38 }
 0x17c   : > { %v2130_v2 = vsel %vm2122_vm15, %v2109_v21, %v2129_v49 }
 0x17d   : > { %v2131_v9 = vpack.c.b16 %v2130_v2, %v2123_v19 }
 0x17f   : > { %2189 = vmatmul.bf16.vlgmr.msra.gmra.mxu1 %v2131_v9 }
 0x1fc   : > { %v2190_v6 = vpop.f32.mrf.mxu1 }
 0x1fd   : > { %v2191_v10 = vadd.f32 %v2780_v11, %v2190_v6 }
 0x1ff   : > { %v2197_v15 = vrot.slane %v2191_v10, 4  ;;  %2201 = vst [vmem:[%s280_s20] sm:$0xf] %v2191_v10 }
 0x201   : > { %2202 = vst [vmem:[%s280_s20 + $0x4] sm:$0xf] %v2197_v15 }
 0x204   : > { %v2192_v57 = vpop.f32.mrf.mxu1 }
 0x205   : > { %v2193_v24 = vadd.f32 %v2780_v11, %v2192_v57 }
 0x207   : > { %v2198_v5 = vrot.slane %v2193_v24, 4  ;;  %2203 = vst [vmem:[%s280_s20 + $0x8] sm:$0xf] %v2193_v24 }
 0x209   : > { %2204 = vst [vmem:[%s280_s20 + $0xc] sm:$0xf] %v2198_v5 }
 0x20a PF: > { %s16_s23 = sadd.s32 1, %s2803_s23   ;;  %s3701_s21 = smov %s2799_s22 }
 0x20b   : > { %p13_p5 = scmp.ge.s32.totalorder %s16_s23, 4   ;;  %s3702_s22 = smov %s3704_s24 }
 0x20d   :  { %15 = sbr.rel (!%p13_p5) target bundleno = 2 (0x2), region = 76 }

</bundles_post_ra>
